<compile_context>
chip_gen: v7x
topology: tpu7x:2x2x1
jax: 0.10.0
libtpu: 0.0.40
codegen_flags: <defaults>
</compile_context>

<pallas_src>
import functools

import jax
import jax.numpy as jnp
from jax.experimental import pallas as pl
from jax.experimental.pallas import tpu as pltpu

_VMEM_LIMIT = 32 * 1024 * 1024


def _cdiv(a, b):
    return (a + b - 1) // b


def _round_up(x, m):
    return _cdiv(x, m) * m


def _choose_tm(m):
    # Big tiles amortize the ~0.35us/grid-step overhead; aim for >=2 grid steps
    # when the problem is big enough so both v7x TensorCores get work.
    return max(8, min(512, _round_up(_cdiv(m, 2), 8)))


# ---------------------------------------------------------------------------
# Fused matmul + bias + activation kernel (bf16 operands, f32 accumulate)
# ---------------------------------------------------------------------------
def _matmul_bias_act_kernel(x_ref, w_ref, b_ref, o_ref, *, act):
    acc = jnp.dot(x_ref[...], w_ref[...], preferred_element_type=jnp.float32)
    acc = acc + b_ref[...]                       # (tm, N) + (1, N), f32
    if act == "tanh":
        acc = jnp.tanh(acc)                      # f32 EUP path
    elif act == "softmax":                       # row-wise softmax (dim=1), f32
        m = jnp.max(acc, axis=-1, keepdims=True)
        e = jnp.exp(acc - m)
        acc = e / jnp.sum(e, axis=-1, keepdims=True)
    o_ref[...] = acc.astype(o_ref.dtype)


def pallas_matmul_bias_act(x, w, b, act="none", out_dtype=jnp.float32):
    """(M, K) @ (K, N) + b with optional fused activation, tiled over M."""
    M, K = x.shape
    K2, N = w.shape
    assert K == K2, (K, K2)
    x = x.astype(jnp.bfloat16)
    w = w.astype(jnp.bfloat16)
    tm = _choose_tm(M)
    Mp = _round_up(M, tm)
    x_pad = x if Mp == M else jnp.pad(x, ((0, Mp - M), (0, 0)))
    b2 = b.reshape(1, N).astype(jnp.float32)
    kernel = functools.partial(_matmul_bias_act_kernel, act=act)
    out = pl.pallas_call(
        kernel,
        out_shape=jax.ShapeDtypeStruct((Mp, N), out_dtype),
        grid=(Mp // tm,),
        in_specs=[
            pl.BlockSpec((tm, K), lambda i: (i, 0)),   # activations: tile over M
            pl.BlockSpec((K, N), lambda i: (0, 0)),    # weights: resident
            pl.BlockSpec((1, N), lambda i: (0, 0)),    # bias: resident
        ],
        out_specs=pl.BlockSpec((tm, N), lambda i: (i, 0)),
        compiler_params=pltpu.CompilerParams(
            dimension_semantics=("parallel",),
            vmem_limit_bytes=_VMEM_LIMIT,
        ),
    )(x_pad, w, b2)
    return out[:M]


# ---------------------------------------------------------------------------
# MaxPool2d(2, 2) in NHWC, lane-dense (rows = B*Ho, lanes = Wo*C)
# ---------------------------------------------------------------------------
def _max4_kernel(a_ref, b_ref, c_ref, d_ref, o_ref):
    o_ref[...] = jnp.maximum(jnp.maximum(a_ref[...], b_ref[...]),
                             jnp.maximum(c_ref[...], d_ref[...]))


def pallas_maxpool2_nhwc(x):
    B, H, W, C = x.shape
    Ho, Wo = H // 2, W // 2
    a = x[:, 0:2 * Ho:2, 0:2 * Wo:2, :]
    b = x[:, 0:2 * Ho:2, 1:2 * Wo:2, :]
    c = x[:, 1:2 * Ho:2, 0:2 * Wo:2, :]
    d = x[:, 1:2 * Ho:2, 1:2 * Wo:2, :]
    M, L = B * Ho, Wo * C                       # lane-dense last dim
    a = a.reshape(M, L)
    b = b.reshape(M, L)
    c = c.reshape(M, L)
    d = d.reshape(M, L)
    tm = _choose_tm(M)
    Mp = _round_up(M, tm)
    if Mp != M:
        pad = ((0, Mp - M), (0, 0))
        a, b, c, d = (jnp.pad(t, pad) for t in (a, b, c, d))
    out = pl.pallas_call(
        _max4_kernel,
        out_shape=jax.ShapeDtypeStruct((Mp, L), x.dtype),
        grid=(Mp // tm,),
        in_specs=[pl.BlockSpec((tm, L), lambda i: (i, 0)) for _ in range(4)],
        out_specs=pl.BlockSpec((tm, L), lambda i: (i, 0)),
        compiler_params=pltpu.CompilerParams(
            dimension_semantics=("parallel",),
            vmem_limit_bytes=_VMEM_LIMIT,
        ),
    )(a, b, c, d)
    return out[:M].reshape(B, Ho, Wo, C)


# ---------------------------------------------------------------------------
# Conv2d (valid) + tanh: NHWC channel-concat im2col + fused bf16 matmul kernel
# ---------------------------------------------------------------------------
def conv2d_tanh_nhwc(x, wmat, bias, stride=1, KH=3, KW=3):
    B, H, W, C = x.shape
    OH = (H - KH) // stride + 1
    OW = (W - KW) // stride + 1
    cols = []
    for i in range(KH):
        for j in range(KW):
            cols.append(x[:, i:i + stride * OH:stride, j:j + stride * OW:stride, :])
    K = KH * KW * C
    Kp = _round_up(K, 8)                         # pad contraction dim (free: in concat)
    if Kp != K:
        cols.append(jnp.zeros((B, OH, OW, Kp - K), x.dtype))
    patches = jnp.concatenate(cols, axis=-1)     # (B, OH, OW, Kp), order (kh, kw, c)
    patches = patches.reshape(B * OH * OW, Kp)   # leading-dim collapse only
    assert wmat.shape[0] == Kp, (wmat.shape, Kp)
    out = pallas_matmul_bias_act(patches, wmat, bias, act="tanh",
                                 out_dtype=jnp.bfloat16)
    return out.reshape(B, OH, OW, -1)            # stay NHWC


# ---------------------------------------------------------------------------
# Parameters (deterministic, PyTorch-default-style uniform(+-1/sqrt(fan_in)))
# ---------------------------------------------------------------------------
def _uniform(key, shape, fan_in):
    bound = 1.0 / float(fan_in) ** 0.5
    return jax.random.uniform(key, shape, jnp.float32, -bound, bound)


def init_vgg_params(key, pixels, actor=True):
    # Analytic replay of the torch dummy-forward that determines the flatten dim.
    s = pixels * 2
    s = (s - 3) // 2 + 1   # Conv2d 3x3 stride 2
    s = s // 2             # MaxPool2d(2)
    s = s - 2              # Conv2d 3x3
    s = s - 2              # Conv2d 3x3
    s = s // 2             # MaxPool2d(2)
    s = s - 2              # Conv2d 3x3
    s = s - 2              # Conv2d 3x3
    flat = 128 * s * s
    conv_defs = [(5, 32), (32, 64), (64, 64), (64, 128), (128, 128)]  # (IC, OC)
    keys = jax.random.split(key, 2 * len(conv_defs) + 2)
    params = {}
    for idx, (ic, oc) in enumerate(conv_defs):
        fan_in = ic * 9
        w = _uniform(keys[2 * idx], (oc, ic, 3, 3), fan_in)          # PyTorch layout
        # (OC, IC, KH, KW) -> (KH, KW, IC, OC) -> (9*IC, OC); row order matches the
        # (kh, kw, c) order of the NHWC channel-concat im2col; pad rows to /8; bf16.
        wmat = w.transpose(2, 3, 1, 0).reshape(9 * ic, oc)
        Kp = _round_up(9 * ic, 8)
        if Kp != 9 * ic:
            wmat = jnp.pad(wmat, ((0, Kp - 9 * ic), (0, 0)))
        params[f"w{idx}"] = wmat.astype(jnp.bfloat16)
        params[f"b{idx}"] = _uniform(keys[2 * idx + 1], (oc,), fan_in)
    out_dim = 2 if actor else 1
    hk = flat + 8
    params["head_w"] = _uniform(keys[-2], (hk, out_dim), hk).astype(jnp.bfloat16)
    params["head_b"] = _uniform(keys[-1], (out_dim,), hk)
    return params


# ---------------------------------------------------------------------------
# Forward pass (mirrors Vgg.forward)
# ---------------------------------------------------------------------------
def vgg_forward(params, x, info, actor=True):
    if x.ndim == 3:
        x = x[None]
    if info.ndim == 1:
        info = info[:, None]
    # Single layout change at the entry: NCHW (PyTorch convention) -> NHWC, bf16.
    x = jnp.transpose(x, (0, 2, 3, 1)).astype(jnp.bfloat16)
    # stage_1
    x = conv2d_tanh_nhwc(x, params["w0"], params["b0"], stride=2)
    x = pallas_maxpool2_nhwc(x)
    # TODO(synk): nn.Dropout(p=0.25) is identity here (eval/inference semantics).
    # stage_2
    x = conv2d_tanh_nhwc(x, params["w1"], params["b1"])
    x = conv2d_tanh_nhwc(x, params["w2"], params["b2"])
    x = pallas_maxpool2_nhwc(x)
    # stage_3
    x = conv2d_tanh_nhwc(x, params["w3"], params["b3"])
    x = conv2d_tanh_nhwc(x, params["w4"], params["b4"])
    # Flatten in NHWC order; head_w rows follow the same order (equivalent to the
    # NCHW module up to a fixed permutation of head rows; identical when the final
    # feature map is 1x1, as it is for pixels=32).
    xf = x.reshape(x.shape[0], -1)
    feat = jnp.concatenate([xf, info.astype(jnp.bfloat16)], axis=1)
    act = "softmax" if actor else "none"
    # Head kept as a Pallas call (negligible cost; review notes plain XLA is also fine).
    return pallas_matmul_bias_act(feat, params["head_w"], params["head_b"],
                                  act=act, out_dtype=jnp.float32)


if __name__ == "__main__":
    # pixels=32 -> input spatial 64x64 (smallest "nice" size for which all
    # valid-padding convs/pools stay positive; final feature map is 1x1).
    pixels = 32
    B = 2
    key = jax.random.PRNGKey(0)
    kp, kx, ki = jax.random.split(key, 3)
    params = init_vgg_params(kp, pixels, actor=True)
    x = jax.random.normal(kx, (B, 5, 2 * pixels, 2 * pixels), jnp.float32)
    info = jax.random.normal(ki, (B, 8), jnp.float32)

    out = jax.jit(lambda p, a, b: vgg_forward(p, a, b, actor=True))(params, x, info)
    out = jax.block_until_ready(out)

    assert out.shape == (B, 2), out.shape
    assert jnp.allclose(jnp.sum(out, axis=1), 1.0, atol=1e-5)  # softmax rows
    print("KERNEL_OK")
</pallas_src>

<mosaic_0001>
module attributes {stable_mosaic.version = 11 : i64} {
  func.func @_matmul_bias_act_kernel(%arg0: i32, %arg1: memref<512x48xbf16, #tpu.memory_space<vmem>>, %arg2: memref<48x32xbf16, #tpu.memory_space<vmem>>, %arg3: memref<1x32xf32, #tpu.memory_space<vmem>>, %arg4: memref<512x32xbf16, #tpu.memory_space<vmem>>) attributes {dimension_semantics = [#tpu.dimension_semantics<parallel>], iteration_bounds = array<i64: 4>, scalar_prefetch = 0 : i64, scratch_operands = 0 : i64, tpu.core_type = #tpu.core_type<tc>, window_params = [{transform_indices = @transform_0, window_bounds = array<i64: 512, 48>}, {pipeline_mode = #tpu.pipeline_mode<synchronous>, transform_indices = @transform_1, window_bounds = array<i64: 48, 32>}, {pipeline_mode = #tpu.pipeline_mode<synchronous>, transform_indices = @transform_2, window_bounds = array<i64: 1, 32>}, {transform_indices = @transform_3, window_bounds = array<i64: 512, 32>}]} {
    %c0 = arith.constant 0 : index
    %c0_0 = arith.constant 0 : index
    %0 = vector.load %arg1[%c0, %c0_0] : memref<512x48xbf16, #tpu.memory_space<vmem>>, vector<512x48xbf16>
    %c0_1 = arith.constant 0 : index
    %c0_2 = arith.constant 0 : index
    %1 = vector.load %arg2[%c0_1, %c0_2] : memref<48x32xbf16, #tpu.memory_space<vmem>>, vector<48x32xbf16>
    %cst = arith.constant dense<0.000000e+00> : vector<512x32xf32>
    %2 = tpu.matmul %0, %1, %cst {dimension_numbers = #tpu.dot_dimension_numbers<[1], [0], [0], [1], [0, 0, 1, 1], [], []>} : vector<512x48xbf16>, vector<48x32xbf16>, vector<512x32xf32> -> vector<512x32xf32>
    %c0_3 = arith.constant 0 : index
    %c0_4 = arith.constant 0 : index
    %3 = vector.load %arg3[%c0_3, %c0_4] : memref<1x32xf32, #tpu.memory_space<vmem>>, vector<1x32xf32>
    %4 = vector.broadcast %3 : vector<1x32xf32> to vector<512x32xf32>
    %5 = arith.addf %2, %4 : vector<512x32xf32>
    %6 = math.tanh %5 : vector<512x32xf32>
    %7 = arith.truncf %6 : vector<512x32xf32> to vector<512x32xbf16>
    %c0_5 = arith.constant 0 : index
    %c0_6 = arith.constant 0 : index
    %8 = vector.load %arg4[%c0_5, %c0_6] : memref<512x32xbf16, #tpu.memory_space<vmem>>, vector<512x32xbf16>
    tpu.vector_store %arg4[%c0_5, %c0_6], %7 {strides = array<i32>} : memref<512x32xbf16, #tpu.memory_space<vmem>>, vector<512x32xbf16>,
    return
  }
  func.func @transform_0(%arg0: i32) -> (i32, i32) {
    %c0_i32 = arith.constant 0 : i32
    %c0_i32_0 = arith.constant 0 : i32
    return %arg0, %c0_i32 : i32, i32
  }
  func.func @transform_1(%arg0: i32) -> (i32, i32) {
    %c0_i32 = arith.constant 0 : i32
    %c0_i32_0 = arith.constant 0 : i32
    %c0_i32_1 = arith.constant 0 : i32
    return %c0_i32, %c0_i32_0 : i32, i32
  }
  func.func @transform_2(%arg0: i32) -> (i32, i32) {
    %c0_i32 = arith.constant 0 : i32
    %c0_i32_0 = arith.constant 0 : i32
    %c0_i32_1 = arith.constant 0 : i32
    return %c0_i32, %c0_i32_0 : i32, i32
  }
  func.func @transform_3(%arg0: i32) -> (i32, i32) {
    %c0_i32 = arith.constant 0 : i32
    %c0_i32_0 = arith.constant 0 : i32
    return %arg0, %c0_i32 : i32, i32
  }
}

module attributes {stable_mosaic.version = 11 : i64} {
  func.func @_max4_kernel(%arg0: i32, %arg1: memref<16x480xbf16, #tpu.memory_space<vmem>>, %arg2: memref<16x480xbf16, #tpu.memory_space<vmem>>, %arg3: memref<16x480xbf16, #tpu.memory_space<vmem>>, %arg4: memref<16x480xbf16, #tpu.memory_space<vmem>>, %arg5: memref<16x480xbf16, #tpu.memory_space<vmem>>) attributes {dimension_semantics = [#tpu.dimension_semantics<parallel>], iteration_bounds = array<i64: 2>, scalar_prefetch = 0 : i64, scratch_operands = 0 : i64, tpu.core_type = #tpu.core_type<tc>, window_params = [{transform_indices = @transform_0, window_bounds = array<i64: 16, 480>}, {transform_indices = @transform_1, window_bounds = array<i64: 16, 480>}, {transform_indices = @transform_2, window_bounds = array<i64: 16, 480>}, {transform_indices = @transform_3, window_bounds = array<i64: 16, 480>}, {transform_indices = @transform_4, window_bounds = array<i64: 16, 480>}]} {
    %c0 = arith.constant 0 : index
    %c0_0 = arith.constant 0 : index
    %0 = vector.load %arg1[%c0, %c0_0] : memref<16x480xbf16, #tpu.memory_space<vmem>>, vector<16x480xbf16>
    %c0_1 = arith.constant 0 : index
    %c0_2 = arith.constant 0 : index
    %1 = vector.load %arg2[%c0_1, %c0_2] : memref<16x480xbf16, #tpu.memory_space<vmem>>, vector<16x480xbf16>
    %2 = arith.maximumf %0, %1 : vector<16x480xbf16>
    %c0_3 = arith.constant 0 : index
    %c0_4 = arith.constant 0 : index
    %3 = vector.load %arg3[%c0_3, %c0_4] : memref<16x480xbf16, #tpu.memory_space<vmem>>, vector<16x480xbf16>
    %c0_5 = arith.constant 0 : index
    %c0_6 = arith.constant 0 : index
    %4 = vector.load %arg4[%c0_5, %c0_6] : memref<16x480xbf16, #tpu.memory_space<vmem>>, vector<16x480xbf16>
    %5 = arith.maximumf %3, %4 : vector<16x480xbf16>
    %6 = arith.maximumf %2, %5 : vector<16x480xbf16>
    %c0_7 = arith.constant 0 : index
    %c0_8 = arith.constant 0 : index
    %7 = vector.load %arg5[%c0_7, %c0_8] : memref<16x480xbf16, #tpu.memory_space<vmem>>, vector<16x480xbf16>
    tpu.vector_store %arg5[%c0_7, %c0_8], %6 {strides = array<i32>} : memref<16x480xbf16, #tpu.memory_space<vmem>>, vector<16x480xbf16>,
    return
  }
  func.func @transform_0(%arg0: i32) -> (i32, i32) {
    %c0_i32 = arith.constant 0 : i32
    %c0_i32_0 = arith.constant 0 : i32
    return %arg0, %c0_i32 : i32, i32
  }
  func.func @transform_1(%arg0: i32) -> (i32, i32) {
    %c0_i32 = arith.constant 0 : i32
    %c0_i32_0 = arith.constant 0 : i32
    return %arg0, %c0_i32 : i32, i32
  }
  func.func @transform_2(%arg0: i32) -> (i32, i32) {
    %c0_i32 = arith.constant 0 : i32
    %c0_i32_0 = arith.constant 0 : i32
    return %arg0, %c0_i32 : i32, i32
  }
  func.func @transform_3(%arg0: i32) -> (i32, i32) {
    %c0_i32 = arith.constant 0 : i32
    %c0_i32_0 = arith.constant 0 : i32
    return %arg0, %c0_i32 : i32, i32
  }
  func.func @transform_4(%arg0: i32) -> (i32, i32) {
    %c0_i32 = arith.constant 0 : i32
    %c0_i32_0 = arith.constant 0 : i32
    return %arg0, %c0_i32 : i32, i32
  }
}

module attributes {stable_mosaic.version = 11 : i64} {
  func.func @_matmul_bias_act_kernel(%arg0: i32, %arg1: memref<176x288xbf16, #tpu.memory_space<vmem>>, %arg2: memref<288x64xbf16, #tpu.memory_space<vmem>>, %arg3: memref<1x64xf32, #tpu.memory_space<vmem>>, %arg4: memref<176x64xbf16, #tpu.memory_space<vmem>>) attributes {dimension_semantics = [#tpu.dimension_semantics<parallel>], iteration_bounds = array<i64: 2>, scalar_prefetch = 0 : i64, scratch_operands = 0 : i64, tpu.core_type = #tpu.core_type<tc>, window_params = [{transform_indices = @transform_0, window_bounds = array<i64: 176, 288>}, {pipeline_mode = #tpu.pipeline_mode<synchronous>, transform_indices = @transform_1, window_bounds = array<i64: 288, 64>}, {pipeline_mode = #tpu.pipeline_mode<synchronous>, transform_indices = @transform_2, window_bounds = array<i64: 1, 64>}, {transform_indices = @transform_3, window_bounds = array<i64: 176, 64>}]} {
    %c0 = arith.constant 0 : index
    %c0_0 = arith.constant 0 : index
    %0 = vector.load %arg1[%c0, %c0_0] : memref<176x288xbf16, #tpu.memory_space<vmem>>, vector<176x288xbf16>
    %c0_1 = arith.constant 0 : index
    %c0_2 = arith.constant 0 : index
    %1 = vector.load %arg2[%c0_1, %c0_2] : memref<288x64xbf16, #tpu.memory_space<vmem>>, vector<288x64xbf16>
    %cst = arith.constant dense<0.000000e+00> : vector<176x64xf32>
    %2 = tpu.matmul %0, %1, %cst {dimension_numbers = #tpu.dot_dimension_numbers<[1], [0], [0], [1], [0, 0, 1, 1], [], []>} : vector<176x288xbf16>, vector<288x64xbf16>, vector<176x64xf32> -> vector<176x64xf32>
    %c0_3 = arith.constant 0 : index
    %c0_4 = arith.constant 0 : index
    %3 = vector.load %arg3[%c0_3, %c0_4] : memref<1x64xf32, #tpu.memory_space<vmem>>, vector<1x64xf32>
    %4 = vector.broadcast %3 : vector<1x64xf32> to vector<176x64xf32>
    %5 = arith.addf %2, %4 : vector<176x64xf32>
    %6 = math.tanh %5 : vector<176x64xf32>
    %7 = arith.truncf %6 : vector<176x64xf32> to vector<176x64xbf16>
    %c0_5 = arith.constant 0 : index
    %c0_6 = arith.constant 0 : index
    %8 = vector.load %arg4[%c0_5, %c0_6] : memref<176x64xbf16, #tpu.memory_space<vmem>>, vector<176x64xbf16>
    tpu.vector_store %arg4[%c0_5, %c0_6], %7 {strides = array<i32>} : memref<176x64xbf16, #tpu.memory_space<vmem>>, vector<176x64xbf16>,
    return
  }
  func.func @transform_0(%arg0: i32) -> (i32, i32) {
    %c0_i32 = arith.constant 0 : i32
    %c0_i32_0 = arith.constant 0 : i32
    return %arg0, %c0_i32 : i32, i32
  }
  func.func @transform_1(%arg0: i32) -> (i32, i32) {
    %c0_i32 = arith.constant 0 : i32
    %c0_i32_0 = arith.constant 0 : i32
    %c0_i32_1 = arith.constant 0 : i32
    return %c0_i32, %c0_i32_0 : i32, i32
  }
  func.func @transform_2(%arg0: i32) -> (i32, i32) {
    %c0_i32 = arith.constant 0 : i32
    %c0_i32_0 = arith.constant 0 : i32
    %c0_i32_1 = arith.constant 0 : i32
    return %c0_i32, %c0_i32_0 : i32, i32
  }
  func.func @transform_3(%arg0: i32) -> (i32, i32) {
    %c0_i32 = arith.constant 0 : i32
    %c0_i32_0 = arith.constant 0 : i32
    return %arg0, %c0_i32 : i32, i32
  }
}

module attributes {stable_mosaic.version = 11 : i64} {
  func.func @_matmul_bias_act_kernel(%arg0: i32, %arg1: memref<128x576xbf16, #tpu.memory_space<vmem>>, %arg2: memref<576x64xbf16, #tpu.memory_space<vmem>>, %arg3: memref<1x64xf32, #tpu.memory_space<vmem>>, %arg4: memref<128x64xbf16, #tpu.memory_space<vmem>>) attributes {dimension_semantics = [#tpu.dimension_semantics<parallel>], iteration_bounds = array<i64: 2>, scalar_prefetch = 0 : i64, scratch_operands = 0 : i64, tpu.core_type = #tpu.core_type<tc>, window_params = [{transform_indices = @transform_0, window_bounds = array<i64: 128, 576>}, {pipeline_mode = #tpu.pipeline_mode<synchronous>, transform_indices = @transform_1, window_bounds = array<i64: 576, 64>}, {pipeline_mode = #tpu.pipeline_mode<synchronous>, transform_indices = @transform_2, window_bounds = array<i64: 1, 64>}, {transform_indices = @transform_3, window_bounds = array<i64: 128, 64>}]} {
    %c0 = arith.constant 0 : index
    %c0_0 = arith.constant 0 : index
    %0 = vector.load %arg1[%c0, %c0_0] : memref<128x576xbf16, #tpu.memory_space<vmem>>, vector<128x576xbf16>
    %c0_1 = arith.constant 0 : index
    %c0_2 = arith.constant 0 : index
    %1 = vector.load %arg2[%c0_1, %c0_2] : memref<576x64xbf16, #tpu.memory_space<vmem>>, vector<576x64xbf16>
    %cst = arith.constant dense<0.000000e+00> : vector<128x64xf32>
    %2 = tpu.matmul %0, %1, %cst {dimension_numbers = #tpu.dot_dimension_numbers<[1], [0], [0], [1], [0, 0, 1, 1], [], []>} : vector<128x576xbf16>, vector<576x64xbf16>, vector<128x64xf32> -> vector<128x64xf32>
    %c0_3 = arith.constant 0 : index
    %c0_4 = arith.constant 0 : index
    %3 = vector.load %arg3[%c0_3, %c0_4] : memref<1x64xf32, #tpu.memory_space<vmem>>, vector<1x64xf32>
    %4 = vector.broadcast %3 : vector<1x64xf32> to vector<128x64xf32>
    %5 = arith.addf %2, %4 : vector<128x64xf32>
    %6 = math.tanh %5 : vector<128x64xf32>
    %7 = arith.truncf %6 : vector<128x64xf32> to vector<128x64xbf16>
    %c0_5 = arith.constant 0 : index
    %c0_6 = arith.constant 0 : index
    %8 = vector.load %arg4[%c0_5, %c0_6] : memref<128x64xbf16, #tpu.memory_space<vmem>>, vector<128x64xbf16>
    tpu.vector_store %arg4[%c0_5, %c0_6], %7 {strides = array<i32>} : memref<128x64xbf16, #tpu.memory_space<vmem>>, vector<128x64xbf16>,
    return
  }
  func.func @transform_0(%arg0: i32) -> (i32, i32) {
    %c0_i32 = arith.constant 0 : i32
    %c0_i32_0 = arith.constant 0 : i32
    return %arg0, %c0_i32 : i32, i32
  }
  func.func @transform_1(%arg0: i32) -> (i32, i32) {
    %c0_i32 = arith.constant 0 : i32
    %c0_i32_0 = arith.constant 0 : i32
    %c0_i32_1 = arith.constant 0 : i32
    return %c0_i32, %c0_i32_0 : i32, i32
  }
  func.func @transform_2(%arg0: i32) -> (i32, i32) {
    %c0_i32 = arith.constant 0 : i32
    %c0_i32_0 = arith.constant 0 : i32
    %c0_i32_1 = arith.constant 0 : i32
    return %c0_i32, %c0_i32_0 : i32, i32
  }
  func.func @transform_3(%arg0: i32) -> (i32, i32) {
    %c0_i32 = arith.constant 0 : i32
    %c0_i32_0 = arith.constant 0 : i32
    return %arg0, %c0_i32 : i32, i32
  }
}

module attributes {stable_mosaic.version = 11 : i64} {
  func.func @_max4_kernel(%arg0: i32, %arg1: memref<8x320xbf16, #tpu.memory_space<vmem>>, %arg2: memref<8x320xbf16, #tpu.memory_space<vmem>>, %arg3: memref<8x320xbf16, #tpu.memory_space<vmem>>, %arg4: memref<8x320xbf16, #tpu.memory_space<vmem>>, %arg5: memref<8x320xbf16, #tpu.memory_space<vmem>>) attributes {dimension_semantics = [#tpu.dimension_semantics<parallel>], iteration_bounds = array<i64: 2>, scalar_prefetch = 0 : i64, scratch_operands = 0 : i64, tpu.core_type = #tpu.core_type<tc>, window_params = [{transform_indices = @transform_0, window_bounds = array<i64: 8, 320>}, {transform_indices = @transform_1, window_bounds = array<i64: 8, 320>}, {transform_indices = @transform_2, window_bounds = array<i64: 8, 320>}, {transform_indices = @transform_3, window_bounds = array<i64: 8, 320>}, {transform_indices = @transform_4, window_bounds = array<i64: 8, 320>}]} {
    %c0 = arith.constant 0 : index
    %c0_0 = arith.constant 0 : index
    %0 = vector.load %arg1[%c0, %c0_0] : memref<8x320xbf16, #tpu.memory_space<vmem>>, vector<8x320xbf16>
    %c0_1 = arith.constant 0 : index
    %c0_2 = arith.constant 0 : index
    %1 = vector.load %arg2[%c0_1, %c0_2] : memref<8x320xbf16, #tpu.memory_space<vmem>>, vector<8x320xbf16>
    %2 = arith.maximumf %0, %1 : vector<8x320xbf16>
    %c0_3 = arith.constant 0 : index
    %c0_4 = arith.constant 0 : index
    %3 = vector.load %arg3[%c0_3, %c0_4] : memref<8x320xbf16, #tpu.memory_space<vmem>>, vector<8x320xbf16>
    %c0_5 = arith.constant 0 : index
    %c0_6 = arith.constant 0 : index
    %4 = vector.load %arg4[%c0_5, %c0_6] : memref<8x320xbf16, #tpu.memory_space<vmem>>, vector<8x320xbf16>
    %5 = arith.maximumf %3, %4 : vector<8x320xbf16>
    %6 = arith.maximumf %2, %5 : vector<8x320xbf16>
    %c0_7 = arith.constant 0 : index
    %c0_8 = arith.constant 0 : index
    %7 = vector.load %arg5[%c0_7, %c0_8] : memref<8x320xbf16, #tpu.memory_space<vmem>>, vector<8x320xbf16>
    tpu.vector_store %arg5[%c0_7, %c0_8], %6 {strides = array<i32>} : memref<8x320xbf16, #tpu.memory_space<vmem>>, vector<8x320xbf16>,
    return
  }
  func.func @transform_0(%arg0: i32) -> (i32, i32) {
    %c0_i32 = arith.constant 0 : i32
    %c0_i32_0 = arith.constant 0 : i32
    return %arg0, %c0_i32 : i32, i32
  }
  func.func @transform_1(%arg0: i32) -> (i32, i32) {
    %c0_i32 = arith.constant 0 : i32
    %c0_i32_0 = arith.constant 0 : i32
    return %arg0, %c0_i32 : i32, i32
  }
  func.func @transform_2(%arg0: i32) -> (i32, i32) {
    %c0_i32 = arith.constant 0 : i32
    %c0_i32_0 = arith.constant 0 : i32
    return %arg0, %c0_i32 : i32, i32
  }
  func.func @transform_3(%arg0: i32) -> (i32, i32) {
    %c0_i32 = arith.constant 0 : i32
    %c0_i32_0 = arith.constant 0 : i32
    return %arg0, %c0_i32 : i32, i32
  }
  func.func @transform_4(%arg0: i32) -> (i32, i32) {
    %c0_i32 = arith.constant 0 : i32
    %c0_i32_0 = arith.constant 0 : i32
    return %arg0, %c0_i32 : i32, i32
  }
}

module attributes {stable_mosaic.version = 11 : i64} {
  func.func @_matmul_bias_act_kernel(%arg0: i32, %arg1: memref<16x576xbf16, #tpu.memory_space<vmem>>, %arg2: memref<576x128xbf16, #tpu.memory_space<vmem>>, %arg3: memref<1x128xf32, #tpu.memory_space<vmem>>, %arg4: memref<16x128xbf16, #tpu.memory_space<vmem>>) attributes {dimension_semantics = [#tpu.dimension_semantics<parallel>], iteration_bounds = array<i64: 2>, scalar_prefetch = 0 : i64, scratch_operands = 0 : i64, tpu.core_type = #tpu.core_type<tc>, window_params = [{transform_indices = @transform_0, window_bounds = array<i64: 16, 576>}, {pipeline_mode = #tpu.pipeline_mode<synchronous>, transform_indices = @transform_1, window_bounds = array<i64: 576, 128>}, {pipeline_mode = #tpu.pipeline_mode<synchronous>, transform_indices = @transform_2, window_bounds = array<i64: 1, 128>}, {transform_indices = @transform_3, window_bounds = array<i64: 16, 128>}]} {
    %c0 = arith.constant 0 : index
    %c0_0 = arith.constant 0 : index
    %0 = vector.load %arg1[%c0, %c0_0] : memref<16x576xbf16, #tpu.memory_space<vmem>>, vector<16x576xbf16>
    %c0_1 = arith.constant 0 : index
    %c0_2 = arith.constant 0 : index
    %1 = vector.load %arg2[%c0_1, %c0_2] : memref<576x128xbf16, #tpu.memory_space<vmem>>, vector<576x128xbf16>
    %cst = arith.constant dense<0.000000e+00> : vector<16x128xf32>
    %2 = tpu.matmul %0, %1, %cst {dimension_numbers = #tpu.dot_dimension_numbers<[1], [0], [0], [1], [0, 0, 1, 1], [], []>} : vector<16x576xbf16>, vector<576x128xbf16>, vector<16x128xf32> -> vector<16x128xf32>
    %c0_3 = arith.constant 0 : index
    %c0_4 = arith.constant 0 : index
    %3 = vector.load %arg3[%c0_3, %c0_4] : memref<1x128xf32, #tpu.memory_space<vmem>>, vector<1x128xf32>
    %4 = vector.broadcast %3 : vector<1x128xf32> to vector<16x128xf32>
    %5 = arith.addf %2, %4 : vector<16x128xf32>
    %6 = math.tanh %5 : vector<16x128xf32>
    %7 = arith.truncf %6 : vector<16x128xf32> to vector<16x128xbf16>
    %c0_5 = arith.constant 0 : index
    %c0_6 = arith.constant 0 : index
    %8 = vector.load %arg4[%c0_5, %c0_6] : memref<16x128xbf16, #tpu.memory_space<vmem>>, vector<16x128xbf16>
    tpu.vector_store %arg4[%c0_5, %c0_6], %7 {strides = array<i32>} : memref<16x128xbf16, #tpu.memory_space<vmem>>, vector<16x128xbf16>,
    return
  }
  func.func @transform_0(%arg0: i32) -> (i32, i32) {
    %c0_i32 = arith.constant 0 : i32
    %c0_i32_0 = arith.constant 0 : i32
    return %arg0, %c0_i32 : i32, i32
  }
  func.func @transform_1(%arg0: i32) -> (i32, i32) {
    %c0_i32 = arith.constant 0 : i32
    %c0_i32_0 = arith.constant 0 : i32
    %c0_i32_1 = arith.constant 0 : i32
    return %c0_i32, %c0_i32_0 : i32, i32
  }
  func.func @transform_2(%arg0: i32) -> (i32, i32) {
    %c0_i32 = arith.constant 0 : i32
    %c0_i32_0 = arith.constant 0 : i32
    %c0_i32_1 = arith.constant 0 : i32
    return %c0_i32, %c0_i32_0 : i32, i32
  }
  func.func @transform_3(%arg0: i32) -> (i32, i32) {
    %c0_i32 = arith.constant 0 : i32
    %c0_i32_0 = arith.constant 0 : i32
    return %arg0, %c0_i32 : i32, i32
  }
}

module attributes {stable_mosaic.version = 11 : i64} {
  func.func @_matmul_bias_act_kernel(%arg0: i32, %arg1: memref<8x1152xbf16, #tpu.memory_space<vmem>>, %arg2: memref<1152x128xbf16, #tpu.memory_space<vmem>>, %arg3: memref<1x128xf32, #tpu.memory_space<vmem>>, %arg4: memref<8x128xbf16, #tpu.memory_space<vmem>>) attributes {dimension_semantics = [#tpu.dimension_semantics<parallel>], iteration_bounds = array<i64: 1>, scalar_prefetch = 0 : i64, scratch_operands = 0 : i64, tpu.core_type = #tpu.core_type<tc>, window_params = [{transform_indices = @transform_0, window_bounds = array<i64: 8, 1152>}, {pipeline_mode = #tpu.pipeline_mode<synchronous>, transform_indices = @transform_1, window_bounds = array<i64: 1152, 128>}, {pipeline_mode = #tpu.pipeline_mode<synchronous>, transform_indices = @transform_2, window_bounds = array<i64: 1, 128>}, {transform_indices = @transform_3, window_bounds = array<i64: 8, 128>}]} {
    %c0 = arith.constant 0 : index
    %c0_0 = arith.constant 0 : index
    %0 = vector.load %arg1[%c0, %c0_0] : memref<8x1152xbf16, #tpu.memory_space<vmem>>, vector<8x1152xbf16>
    %c0_1 = arith.constant 0 : index
    %c0_2 = arith.constant 0 : index
    %1 = vector.load %arg2[%c0_1, %c0_2] : memref<1152x128xbf16, #tpu.memory_space<vmem>>, vector<1152x128xbf16>
    %cst = arith.constant dense<0.000000e+00> : vector<8x128xf32>
    %2 = tpu.matmul %0, %1, %cst {dimension_numbers = #tpu.dot_dimension_numbers<[1], [0], [0], [1], [0, 0, 1, 1], [], []>} : vector<8x1152xbf16>, vector<1152x128xbf16>, vector<8x128xf32> -> vector<8x128xf32>
    %c0_3 = arith.constant 0 : index
    %c0_4 = arith.constant 0 : index
    %3 = vector.load %arg3[%c0_3, %c0_4] : memref<1x128xf32, #tpu.memory_space<vmem>>, vector<1x128xf32>
    %4 = vector.broadcast %3 : vector<1x128xf32> to vector<8x128xf32>
    %5 = arith.addf %2, %4 : vector<8x128xf32>
    %6 = math.tanh %5 : vector<8x128xf32>
    %7 = arith.truncf %6 : vector<8x128xf32> to vector<8x128xbf16>
    %c0_5 = arith.constant 0 : index
    %c0_6 = arith.constant 0 : index
    %8 = vector.load %arg4[%c0_5, %c0_6] : memref<8x128xbf16, #tpu.memory_space<vmem>>, vector<8x128xbf16>
    tpu.vector_store %arg4[%c0_5, %c0_6], %7 {strides = array<i32>} : memref<8x128xbf16, #tpu.memory_space<vmem>>, vector<8x128xbf16>,
    return
  }
  func.func @transform_0(%arg0: i32) -> (i32, i32) {
    %c0_i32 = arith.constant 0 : i32
    %c0_i32_0 = arith.constant 0 : i32
    return %arg0, %c0_i32 : i32, i32
  }
  func.func @transform_1(%arg0: i32) -> (i32, i32) {
    %c0_i32 = arith.constant 0 : i32
    %c0_i32_0 = arith.constant 0 : i32
    %c0_i32_1 = arith.constant 0 : i32
    return %c0_i32, %c0_i32_0 : i32, i32
  }
  func.func @transform_2(%arg0: i32) -> (i32, i32) {
    %c0_i32 = arith.constant 0 : i32
    %c0_i32_0 = arith.constant 0 : i32
    %c0_i32_1 = arith.constant 0 : i32
    return %c0_i32, %c0_i32_0 : i32, i32
  }
  func.func @transform_3(%arg0: i32) -> (i32, i32) {
    %c0_i32 = arith.constant 0 : i32
    %c0_i32_0 = arith.constant 0 : i32
    return %arg0, %c0_i32 : i32, i32
  }
}

module attributes {stable_mosaic.version = 11 : i64} {
  func.func @_matmul_bias_act_kernel(%arg0: i32, %arg1: memref<8x136xbf16, #tpu.memory_space<vmem>>, %arg2: memref<136x2xbf16, #tpu.memory_space<vmem>>, %arg3: memref<1x2xf32, #tpu.memory_space<vmem>>, %arg4: memref<8x2xf32, #tpu.memory_space<vmem>>) attributes {dimension_semantics = [#tpu.dimension_semantics<parallel>], iteration_bounds = array<i64: 1>, scalar_prefetch = 0 : i64, scratch_operands = 0 : i64, tpu.core_type = #tpu.core_type<tc>, window_params = [{transform_indices = @transform_0, window_bounds = array<i64: 8, 136>}, {pipeline_mode = #tpu.pipeline_mode<synchronous>, transform_indices = @transform_1, window_bounds = array<i64: 136, 2>}, {pipeline_mode = #tpu.pipeline_mode<synchronous>, transform_indices = @transform_2, window_bounds = array<i64: 1, 2>}, {transform_indices = @transform_3, window_bounds = array<i64: 8, 2>}]} {
    %c0 = arith.constant 0 : index
    %c0_0 = arith.constant 0 : index
    %0 = vector.load %arg1[%c0, %c0_0] : memref<8x136xbf16, #tpu.memory_space<vmem>>, vector<8x136xbf16>
    %c0_1 = arith.constant 0 : index
    %c0_2 = arith.constant 0 : index
    %1 = vector.load %arg2[%c0_1, %c0_2] : memref<136x2xbf16, #tpu.memory_space<vmem>>, vector<136x2xbf16>
    %cst = arith.constant dense<0.000000e+00> : vector<8x2xf32>
    %2 = tpu.matmul %0, %1, %cst {dimension_numbers = #tpu.dot_dimension_numbers<[1], [0], [0], [1], [0, 0, 1, 1], [], []>} : vector<8x136xbf16>, vector<136x2xbf16>, vector<8x2xf32> -> vector<8x2xf32>
    %c0_3 = arith.constant 0 : index
    %c0_4 = arith.constant 0 : index
    %3 = vector.load %arg3[%c0_3, %c0_4] : memref<1x2xf32, #tpu.memory_space<vmem>>, vector<1x2xf32>
    %4 = vector.broadcast %3 : vector<1x2xf32> to vector<8x2xf32>
    %5 = arith.addf %2, %4 : vector<8x2xf32>
    %cst_5 = arith.constant dense<0xFF800000> : vector<8xf32>
    %6 = vector.multi_reduction <maximumf>, %5, %cst_5 [1] : vector<8x2xf32> to vector<8xf32>
    %7 = vector.shape_cast %6 : vector<8xf32> to vector<8x1xf32>
    %8 = vector.broadcast %7 : vector<8x1xf32> to vector<8x2xf32>
    %9 = arith.subf %5, %8 : vector<8x2xf32>
    %10 = math.exp %9 : vector<8x2xf32>
    %cst_6 = arith.constant dense<0.000000e+00> : vector<8xf32>
    %11 = vector.multi_reduction <add>, %10, %cst_6 [1] : vector<8x2xf32> to vector<8xf32>
    %12 = vector.shape_cast %11 : vector<8xf32> to vector<8x1xf32>
    %13 = vector.broadcast %12 : vector<8x1xf32> to vector<8x2xf32>
    %14 = arith.divf %10, %13 : vector<8x2xf32>
    %c0_7 = arith.constant 0 : index
    %c0_8 = arith.constant 0 : index
    %15 = vector.load %arg4[%c0_7, %c0_8] : memref<8x2xf32, #tpu.memory_space<vmem>>, vector<8x2xf32>
    tpu.vector_store %arg4[%c0_7, %c0_8], %14 {strides = array<i32>} : memref<8x2xf32, #tpu.memory_space<vmem>>, vector<8x2xf32>,
    return
  }
  func.func @transform_0(%arg0: i32) -> (i32, i32) {
    %c0_i32 = arith.constant 0 : i32
    %c0_i32_0 = arith.constant 0 : i32
    return %arg0, %c0_i32 : i32, i32
  }
  func.func @transform_1(%arg0: i32) -> (i32, i32) {
    %c0_i32 = arith.constant 0 : i32
    %c0_i32_0 = arith.constant 0 : i32
    %c0_i32_1 = arith.constant 0 : i32
    return %c0_i32, %c0_i32_0 : i32, i32
  }
  func.func @transform_2(%arg0: i32) -> (i32, i32) {
    %c0_i32 = arith.constant 0 : i32
    %c0_i32_0 = arith.constant 0 : i32
    %c0_i32_1 = arith.constant 0 : i32
    return %c0_i32, %c0_i32_0 : i32, i32
  }
  func.func @transform_3(%arg0: i32) -> (i32, i32) {
    %c0_i32 = arith.constant 0 : i32
    %c0_i32_0 = arith.constant 0 : i32
    return %arg0, %c0_i32 : i32, i32
  }
}

</mosaic_0001>

<bundles_post_ra>
// kernel: _lambda_.8
= control target key start
LH: loop header
LB: loop body
LE: loop exit
PB: predicated region body
PF: predicated region fallthrough
CT: control target
= control target key end

     0   :  { %s1774_s12 = smov 0   ;;  %s2072_s0 = inlined_call_operand.vmem [shape: bf16[2048,48], index: 0, kind: input, shape index: {}]   ;;  %s2073_s1 = inlined_call_operand.vmem [shape: bf16[48,32], index: 1, kind: input, shape index: {}]   ;;  %s2074_s2 = inlined_call_operand.vmem [shape: f32[1,32], index: 2, kind: input, shape index: {}]   ;;  %s2075_s3 = inlined_call_operand.vmem [shape: bf16[2048,32], index: 3, kind: output, shape index: {}]  }
   0x1 LB: > { %s1257_s13 = sadd.s32 4294967295, %s1752_s12   ;;  %p1261_p0 = scmp.ge.s32.totalorder %s1752_s12, 1  ;;  %s1752_s12 = sphi %s1774_s12, %s13_s12  }
   0x2   : > { %p138_p1 = scmp.lt.s32.totalorder %s1752_s12, 5 }
   0x4   : > { %p139_p2 = pnand %p1261_p0, %p138_p1 }
   0x5   : > { %v1583_v0 = vld [vmem:[%s2073_s1] sm:$0xff] (!%p139_p2)   ;;  %s1262_s16 = sshll.u32 (!%p139_p2), %s1257_s13, 6  ;;  %v1584_v1 = vld [vmem:[%s2073_s1 + $0x8] sm:$0xff] (!%p139_p2)   ;;  %v1585_v2 = vld [vmem:[%s2073_s1 + $0x10] sm:$0xff] (!%p139_p2)   ;;  %vm430_vm0 = vcmask (!%p139_p2), 392192   ;;  %vm1136_vm1 = vcmask (!%p139_p2), 257024  }
   0x6   : > { %142 = sbr.rel (%p139_p2) target bundleno = 312 (0x138), region = 32  ;;  %p163_p3 = scmp.lt.s32.totalorder (!%p139_p2), %s1262_s16, 255  ;;  %1499 = vmatprep.subr.bf16.mxu0 (!%p139_p2), %v1583_v0  ;;  %1569 = vmatprep.subr.bf16.mxu1 (!%p139_p2), %v1583_v0  ;;  %v1868_v35 = vld [vmem:[%s2074_s2] ss:$0 sm:$0xff] (!%p139_p2) }
   0x7   : > { %1500 = vmatpush3.bf16.msra.mxu0 (!%p139_p2), %v1583_v0  ;;  %1572 = vmatpush3.bf16.msra.mxu1 (!%p139_p2), %v1583_v0 }
   0x8   : > { %1501 = vmatprep.subr.bf16.mxu0 (!%p139_p2), %v1584_v1  ;;  %1570 = vmatprep.subr.bf16.mxu1 (!%p139_p2), %v1584_v1 }
   0xb   : > { %1502 = vmatpush3.bf16.msra.mxu0 (!%p139_p2), %v1584_v1  ;;  %1573 = vmatpush3.bf16.msra.mxu1 (!%p139_p2), %v1584_v1 }
   0xc   : > { %1503 = vmatprep.subr.bf16.mxu0 (!%p139_p2), %v1585_v2  ;;  %1571 = vmatprep.subr.bf16.mxu1 (!%p139_p2), %v1585_v2 }
   0xd   : > { %s2077_s16 = smov (!%p163_p3, %s1262_s16), 255 }
   0xe   : > { %s1263_s21 = sshll.u32 %s2077_s16, 2 }
   0xf   : > { %s1799_s24 = scalar_lea.vmem %s2072_s0, %s1263_s21  ;;  %1504 = vmatpush3.bf16.msra.mxu0 %v1585_v2  ;;  %1574 = vmatpush3.bf16.msra.mxu1 %v1585_v2  ;;  %s1889_s29 = scalar_lea.vmem %s2075_s3, %s1263_s21 }
  0x10   : > { %v1586_v3 = vld [vmem:[%s1799_s24] sm:$0xff]   ;;  %v1588_v5 = vld [vmem:[%s1799_s24 + $0x8] sm:$0xff]   ;;  %v1590_v7 = vld [vmem:[%s1799_s24 + $0x10] sm:$0xff]  }
  0x11   : > { %v1587_v4 = vld [vmem:[%s1799_s24 + $0x80] sm:$0xff]   ;;  %1505 = vmatprep.mubr.msk.bf16.mxu0 %vm430_vm0, %v1586_v3  ;;  %v1589_v6 = vld [vmem:[%s1799_s24 + $0x88] sm:$0xff]   ;;  %v1591_v8 = vld [vmem:[%s1799_s24 + $0x90] sm:$0xff]  }
  0x12   : > { %1537 = vmatprep.mubr.msk.bf16.mxu1 %vm430_vm0, %v1587_v4  ;;  %1506 = vmatmul.mubr.msk.bf16.vlgmr.msra.gmra.mrb[0].mxu0 %vm430_vm0, %v1588_v5  ;;  %v1592_v9 = vld [vmem:[%s1799_s24 + $0x18] sm:$0xff]   ;;  %v1594_v11 = vld [vmem:[%s1799_s24 + $0x20] sm:$0xff]   ;;  %v1596_v13 = vld [vmem:[%s1799_s24 + $0x28] sm:$0xff]  }
  0x13   : > { %1538 = vmatmul.mubr.msk.bf16.vlgmr.msra.gmra.mrb[0].mxu1 %vm430_vm0, %v1589_v6  ;;  %1509 = vmatprep.mubr.msk.bf16.mxu0 %vm430_vm0, %v1590_v7  ;;  %v1593_v10 = vld [vmem:[%s1799_s24 + $0x98] sm:$0xff]   ;;  %v1595_v12 = vld [vmem:[%s1799_s24 + $0xa0] sm:$0xff]   ;;  %v1597_v14 = vld [vmem:[%s1799_s24 + $0xa8] sm:$0xff]  }
  0x14   : > { %1541 = vmatprep.mubr.msk.bf16.mxu1 %vm430_vm0, %v1591_v8  ;;  %v1598_v15 = vld [vmem:[%s1799_s24 + $0x30] sm:$0xff]   ;;  %v1600_v17 = vld [vmem:[%s1799_s24 + $0x38] sm:$0xff]   ;;  %v1602_v19 = vld [vmem:[%s1799_s24 + $0x40] sm:$0xff]  }
  0x15   : > { %v1599_v16 = vld [vmem:[%s1799_s24 + $0xb0] sm:$0xff]   ;;  %v1601_v18 = vld [vmem:[%s1799_s24 + $0xb8] sm:$0xff]   ;;  %v1603_v20 = vld [vmem:[%s1799_s24 + $0xc0] sm:$0xff]  }
  0x16   : > { %v1604_v21 = vld [vmem:[%s1799_s24 + $0x48] sm:$0xff]   ;;  %v1606_v23 = vld [vmem:[%s1799_s24 + $0x50] sm:$0xff]   ;;  %v1608_v25 = vld [vmem:[%s1799_s24 + $0x58] sm:$0xff]  }
  0x17   : > { %v1605_v22 = vld [vmem:[%s1799_s24 + $0xc8] sm:$0xff]   ;;  %v1607_v24 = vld [vmem:[%s1799_s24 + $0xd0] sm:$0xff]   ;;  %v1609_v26 = vld [vmem:[%s1799_s24 + $0xd8] sm:$0xff]  }
  0x18   : > { %v1610_v27 = vld [vmem:[%s1799_s24 + $0x60] sm:$0xff]   ;;  %v1612_v29 = vld [vmem:[%s1799_s24 + $0x68] sm:$0xff]   ;;  %v1614_v31 = vld [vmem:[%s1799_s24 + $0x70] sm:$0xff]  }
  0x19   : > { %v1611_v28 = vld [vmem:[%s1799_s24 + $0xe0] sm:$0xff]   ;;  %v1613_v30 = vld [vmem:[%s1799_s24 + $0xe8] sm:$0xff]   ;;  %v1615_v32 = vld [vmem:[%s1799_s24 + $0xf0] sm:$0xff]  }
  0x1a   : > { %1510 = vmatmul.mubr.msk.bf16.gmra.mrb[4].mxu0 %vm430_vm0, %v1592_v9  ;;  %v1616_v33 = vld [vmem:[%s1799_s24 + $0x78] sm:$0xff]  }
  0x1b   : > { %1542 = vmatmul.mubr.msk.bf16.gmra.mrb[4].mxu1 %vm430_vm0, %v1593_v10  ;;  %1513 = vmatprep.mubr.msk.bf16.mxu0 %vm430_vm0, %v1594_v11  ;;  %v1617_v34 = vld [vmem:[%s1799_s24 + $0xf8] sm:$0xff]  }
  0x1c   : > { %1545 = vmatprep.mubr.msk.bf16.mxu1 %vm430_vm0, %v1595_v12 }
  0x22   : > { %1514 = vmatmul.mubr.msk.bf16.gmra.mrb[8].mxu0 %vm430_vm0, %v1596_v13 }
  0x23   : > { %1546 = vmatmul.mubr.msk.bf16.gmra.mrb[8].mxu1 %vm430_vm0, %v1597_v14  ;;  %1517 = vmatprep.mubr.msk.bf16.mxu0 %vm430_vm0, %v1598_v15 }
  0x24   : > { %1549 = vmatprep.mubr.msk.bf16.mxu1 %vm430_vm0, %v1599_v16 }
  0x2a   : > { %1518 = vmatmul.mubr.msk.bf16.gmra.mrb[12].mxu0 %vm430_vm0, %v1600_v17 }
  0x2b   : > { %1550 = vmatmul.mubr.msk.bf16.gmra.mrb[12].mxu1 %vm430_vm0, %v1601_v18  ;;  %1521 = vmatprep.mubr.msk.bf16.mxu0 %vm430_vm0, %v1602_v19 }
  0x2c   : > { %1553 = vmatprep.mubr.msk.bf16.mxu1 %vm430_vm0, %v1603_v20 }
  0x32   : > { %1522 = vmatmul.mubr.msk.bf16.gmra.mrb[16].mxu0 %vm430_vm0, %v1604_v21 }
  0x33   : > { %1554 = vmatmul.mubr.msk.bf16.gmra.mrb[16].mxu1 %vm430_vm0, %v1605_v22  ;;  %1525 = vmatprep.mubr.msk.bf16.mxu0 %vm430_vm0, %v1606_v23 }
  0x34   : > { %1557 = vmatprep.mubr.msk.bf16.mxu1 %vm430_vm0, %v1607_v24 }
  0x3a   : > { %1526 = vmatmul.mubr.msk.bf16.gmra.mrb[20].mxu0 %vm430_vm0, %v1608_v25 }
  0x3b   : > { %1558 = vmatmul.mubr.msk.bf16.gmra.mrb[20].mxu1 %vm430_vm0, %v1609_v26  ;;  %1529 = vmatprep.mubr.msk.bf16.mxu0 %vm430_vm0, %v1610_v27 }
  0x3c   : > { %1561 = vmatprep.mubr.msk.bf16.mxu1 %vm430_vm0, %v1611_v28 }
  0x42   : > { %1530 = vmatmul.mubr.msk.bf16.gmra.mrb[24].mxu0 %vm430_vm0, %v1612_v29 }
  0x43   : > { %1562 = vmatmul.mubr.msk.bf16.gmra.mrb[24].mxu1 %vm430_vm0, %v1613_v30  ;;  %1533 = vmatprep.mubr.msk.bf16.mxu0 %vm430_vm0, %v1614_v31 }
  0x44   : > { %1565 = vmatprep.mubr.msk.bf16.mxu1 %vm430_vm0, %v1615_v32 }
  0x4a   : > { %1534 = vmatmul.mubr.msk.bf16.gmra.mrb[28].mxu0 %vm430_vm0, %v1616_v33 }
  0x4b   : > { %1566 = vmatmul.mubr.msk.bf16.gmra.mrb[28].mxu1 %vm430_vm0, %v1617_v34 }
  0xe5   : > { %v1507_v36 = vpop.f32.mrb[0].mxu0 }
  0xe6   : > { %v1539_v37 = vpop.f32.mrb[0].mxu1  ;;  %v570_v38 = vadd.f32 %v1507_v36, %v1868_v35  ;;  %v561_v40 = vpop.f32.mrb[1].mxu0 }
  0xe7   : > { %v698_v39 = vadd.f32 %v1539_v37, %v1868_v35  ;;  %v689_v41 = vpop.f32.mrb[1].mxu1  ;;  %v562_v42 = vadd.f32 %v1868_v35, %v561_v40  ;;  %v1508_v44 = vpop.f32.mrb[2].mxu0 }
  0xe8   : > { %v690_v43 = vadd.f32 %v1868_v35, %v689_v41  ;;  %v1540_v45 = vpop.f32.mrb[2].mxu1  ;;  %1618 = vtanh.f32 %v570_v38  ;;  %v573_v46 = vadd.f32 %v1508_v44, %v1868_v35  ;;  %v564_v47 = vpop.f32.mrb[3].mxu0 }
  0xe9   : > { %v692_v48 = vpop.f32.mrb[3].mxu1  ;;  %1620 = vtanh.f32 %v698_v39  ;;  %v701_v49 = vadd.f32 %v1540_v45, %v1868_v35  ;;  %v565_v50 = vadd.f32 %v1868_v35, %v564_v47 }
  0xea   : > { %1622 = vtanh.f32 %v562_v42  ;;  %v693_v51 = vadd.f32 %v1868_v35, %v692_v48 }
  0xeb   : > { %1624 = vtanh.f32 %v690_v43 }
  0xec   : > { %1626 = vtanh.f32 %v573_v46 }
  0xed   : > { %1628 = vtanh.f32 %v701_v49  ;;  %v1511_v52 = vpop.f32.mrb[4].mxu0 }
  0xee   : > { %v1543_v53 = vpop.f32.mrb[4].mxu1  ;;  %1630 = vtanh.f32 %v565_v50  ;;  %v586_v54 = vadd.f32 %v1511_v52, %v1868_v35  ;;  %v577_v56 = vpop.f32.mrb[5].mxu0 }
  0xef   : > { %v714_v55 = vadd.f32 %v1543_v53, %v1868_v35  ;;  %v705_v57 = vpop.f32.mrb[5].mxu1  ;;  %1632 = vtanh.f32 %v693_v51  ;;  %v578_v58 = vadd.f32 %v1868_v35, %v577_v56  ;;  %v1512_v60 = vpop.f32.mrb[6].mxu0 }
  0xf0   : > { %v706_v59 = vadd.f32 %v1868_v35, %v705_v57  ;;  %v1544_v61 = vpop.f32.mrb[6].mxu1  ;;  %1634 = vtanh.f32 %v586_v54  ;;  %v589_v62 = vadd.f32 %v1512_v60, %v1868_v35  ;;  %v580_v63 = vpop.f32.mrb[7].mxu0 }
  0xf1   : > { %v708_v0 = vpop.f32.mrb[7].mxu1  ;;  %1636 = vtanh.f32 %v714_v55  ;;  %v717_v1 = vadd.f32 %v1544_v61, %v1868_v35  ;;  %v581_v3 = vadd.f32 %v1868_v35, %v580_v63 }
  0xf2   : > { %v1619_v2 = vpop.eup %1618  ;;  %1638 = vtanh.f32 %v578_v58  ;;  %v709_v6 = vadd.f32 %v1868_v35, %v708_v0 }
  0xf3   : > { %v1621_v4 = vpop.eup %1620  ;;  %v1402_v5 = vpack.c.bf16 %v1619_v2, %v1619_v2  ;;  %1640 = vtanh.f32 %v706_v59 }
  0xf4   : > { %v1623_v7 = vpop.eup %1622  ;;  %v1434_v8 = vpack.c.bf16 %v1621_v4, %v1621_v4  ;;  %1642 = vtanh.f32 %v589_v62 }
  0xf5   : > { %v1625_v9 = vpop.eup %1624  ;;  %1139 = vst.msk [vmem:[%s1889_s29 + $0x8] sm:$0xf] %vm1136_vm1, %v1402_v5  ;;  %v1400_v10 = vpack.c.bf16 %v1623_v7, %v1623_v7  ;;  %1644 = vtanh.f32 %v717_v1  ;;  %v1515_v11 = vpop.f32.mrb[8].mxu0 }
  0xf6   : > { %v1547_v12 = vpop.f32.mrb[8].mxu1  ;;  %v1627_v13 = vpop.eup %1626  ;;  %1171 = vst.msk [vmem:[%s1889_s29 + $0x88] sm:$0xf] %vm1136_vm1, %v1434_v8  ;;  %v1432_v14 = vpack.c.bf16 %v1625_v9, %v1625_v9  ;;  %1646 = vtanh.f32 %v581_v3  ;;  %v602_v15 = vadd.f32 %v1515_v11, %v1868_v35 }
  0xf7   : > { %v730_v16 = vadd.f32 %v1547_v12, %v1868_v35  ;;  %v593_v17 = vpop.f32.mrb[9].mxu0  ;;  %v721_v18 = vpop.f32.mrb[9].mxu1  ;;  %1137 = vst.msk [vmem:[%s1889_s29] sm:$0xf] %vm1136_vm1, %v1400_v10  ;;  %v1403_v20 = vpack.c.bf16 %v1627_v13, %v1627_v13  ;;  %1648 = vtanh.f32 %v709_v6 }
  0xf8   : > { %v1629_v19 = vpop.eup %1628  ;;  %v594_v21 = vadd.f32 %v1868_v35, %v593_v17  ;;  %v722_v22 = vadd.f32 %v1868_v35, %v721_v18  ;;  %v1516_v23 = vpop.f32.mrb[10].mxu0  ;;  %1169 = vst.msk [vmem:[%s1889_s29 + $0x80] sm:$0xf] %vm1136_vm1, %v1432_v14  ;;  %1650 = vtanh.f32 %v602_v15 }
  0xf9   : > { %v1548_v24 = vpop.f32.mrb[10].mxu1  ;;  %v1631_v25 = vpop.eup %1630  ;;  %v1435_v26 = vpack.c.bf16 %v1629_v19, %v1629_v19  ;;  %v605_v27 = vadd.f32 %v1516_v23, %v1868_v35  ;;  %1140 = vst.msk [vmem:[%s1889_s29 + $0xc] sm:$0xf] %vm1136_vm1, %v1403_v20  ;;  %1652 = vtanh.f32 %v730_v16 }
  0xfa   : > { %v596_v28 = vpop.f32.mrb[11].mxu0  ;;  %v724_v29 = vpop.f32.mrb[11].mxu1  ;;  %v1401_v31 = vpack.c.bf16 %v1631_v25, %v1631_v25  ;;  %v733_v32 = vadd.f32 %v1548_v24, %v1868_v35  ;;  %1654 = vtanh.f32 %v594_v21 }
  0xfb   : > { %v1633_v30 = vpop.eup %1632  ;;  %1172 = vst.msk [vmem:[%s1889_s29 + $0x8c] sm:$0xf] %vm1136_vm1, %v1435_v26  ;;  %v597_v36 = vadd.f32 %v1868_v35, %v596_v28  ;;  %1656 = vtanh.f32 %v722_v22  ;;  %v725_v39 = vadd.f32 %v1868_v35, %v724_v29 }
  0xfc   : > { %v1635_v33 = vpop.eup %1634  ;;  %v1433_v34 = vpack.c.bf16 %v1633_v30, %v1633_v30  ;;  %1138 = vst.msk [vmem:[%s1889_s29 + $0x4] sm:$0xf] %vm1136_vm1, %v1401_v31  ;;  %1658 = vtanh.f32 %v605_v27 }
  0xfd   : > { %v1637_v37 = vpop.eup %1636  ;;  %v1406_v38 = vpack.c.bf16 %v1635_v33, %v1635_v33  ;;  %1660 = vtanh.f32 %v733_v32  ;;  %v1519_v44 = vpop.f32.mrb[12].mxu0 }
  0xfe   : > { %v1639_v40 = vpop.eup %1638  ;;  %1170 = vst.msk [vmem:[%s1889_s29 + $0x84] sm:$0xf] %vm1136_vm1, %v1433_v34  ;;  %v1438_v41 = vpack.c.bf16 %v1637_v37, %v1637_v37  ;;  %v1551_v45 = vpop.f32.mrb[12].mxu1  ;;  %1662 = vtanh.f32 %v597_v36  ;;  %v618_v48 = vadd.f32 %v1519_v44, %v1868_v35 }
  0xff   : > { %v1641_v42 = vpop.eup %1640  ;;  %1143 = vst.msk [vmem:[%s1889_s29 + $0x18] sm:$0xf] %vm1136_vm1, %v1406_v38  ;;  %v1404_v43 = vpack.c.bf16 %v1639_v40, %v1639_v40  ;;  %v746_v49 = vadd.f32 %v1551_v45, %v1868_v35  ;;  %v609_v50 = vpop.f32.mrb[13].mxu0  ;;  %1664 = vtanh.f32 %v725_v39 }
 0x100   : > { %v1643_v46 = vpop.eup %1642  ;;  %1175 = vst.msk [vmem:[%s1889_s29 + $0x98] sm:$0xf] %vm1136_vm1, %v1438_v41  ;;  %v1436_v47 = vpack.c.bf16 %v1641_v42, %v1641_v42  ;;  %v737_v51 = vpop.f32.mrb[13].mxu1  ;;  %v610_v54 = vadd.f32 %v1868_v35, %v609_v50  ;;  %1666 = vtanh.f32 %v618_v48 }
 0x101   : > { %v1645_v52 = vpop.eup %1644  ;;  %1141 = vst.msk [vmem:[%s1889_s29 + $0x10] sm:$0xf] %vm1136_vm1, %v1404_v43  ;;  %v1407_v53 = vpack.c.bf16 %v1643_v46, %v1643_v46  ;;  %v738_v55 = vadd.f32 %v1868_v35, %v737_v51  ;;  %v1520_v56 = vpop.f32.mrb[14].mxu0  ;;  %1668 = vtanh.f32 %v746_v49 }
 0x102   : > { %v1552_v57 = vpop.f32.mrb[14].mxu1  ;;  %v1647_v58 = vpop.eup %1646  ;;  %1173 = vst.msk [vmem:[%s1889_s29 + $0x90] sm:$0xf] %vm1136_vm1, %v1436_v47  ;;  %v1439_v59 = vpack.c.bf16 %v1645_v52, %v1645_v52  ;;  %v621_v60 = vadd.f32 %v1520_v56, %v1868_v35  ;;  %1670 = vtanh.f32 %v610_v54 }
 0x103   : > { %v612_v61 = vpop.f32.mrb[15].mxu0  ;;  %v740_v62 = vpop.f32.mrb[15].mxu1  ;;  %1144 = vst.msk [vmem:[%s1889_s29 + $0x1c] sm:$0xf] %vm1136_vm1, %v1407_v53  ;;  %v1405_v0 = vpack.c.bf16 %v1647_v58, %v1647_v58  ;;  %v749_v1 = vadd.f32 %v1552_v57, %v1868_v35  ;;  %1672 = vtanh.f32 %v738_v55 }
 0x104   : > { %v1649_v63 = vpop.eup %1648  ;;  %1176 = vst.msk [vmem:[%s1889_s29 + $0x9c] sm:$0xf] %vm1136_vm1, %v1439_v59  ;;  %v613_v4 = vadd.f32 %v1868_v35, %v612_v61  ;;  %v741_v7 = vadd.f32 %v1868_v35, %v740_v62  ;;  %1674 = vtanh.f32 %v621_v60 }
 0x105   : > { %v1651_v2 = vpop.eup %1650  ;;  %v1437_v3 = vpack.c.bf16 %v1649_v63, %v1649_v63  ;;  %1142 = vst.msk [vmem:[%s1889_s29 + $0x14] sm:$0xf] %vm1136_vm1, %v1405_v0  ;;  %1676 = vtanh.f32 %v749_v1  ;;  %v1523_v12 = vpop.f32.mrb[16].mxu0 }
 0x106   : > { %v1653_v5 = vpop.eup %1652  ;;  %v1410_v6 = vpack.c.bf16 %v1651_v2, %v1651_v2  ;;  %v1555_v13 = vpop.f32.mrb[16].mxu1  ;;  %1678 = vtanh.f32 %v613_v4  ;;  %v634_v16 = vadd.f32 %v1523_v12, %v1868_v35 }
 0x107   : > { %v1655_v8 = vpop.eup %1654  ;;  %1174 = vst.msk [vmem:[%s1889_s29 + $0x94] sm:$0xf] %vm1136_vm1, %v1437_v3  ;;  %v1442_v9 = vpack.c.bf16 %v1653_v5, %v1653_v5  ;;  %v762_v17 = vadd.f32 %v1555_v13, %v1868_v35  ;;  %v625_v18 = vpop.f32.mrb[17].mxu0  ;;  %1680 = vtanh.f32 %v741_v7 }
 0x108   : > { %v1657_v10 = vpop.eup %1656  ;;  %1147 = vst.msk [vmem:[%s1889_s29 + $0x28] sm:$0xf] %vm1136_vm1, %v1410_v6  ;;  %v1408_v11 = vpack.c.bf16 %v1655_v8, %v1655_v8  ;;  %v753_v19 = vpop.f32.mrb[17].mxu1  ;;  %v626_v22 = vadd.f32 %v1868_v35, %v625_v18  ;;  %1682 = vtanh.f32 %v634_v16 }
 0x109   : > { %v1659_v14 = vpop.eup %1658  ;;  %1179 = vst.msk [vmem:[%s1889_s29 + $0xa8] sm:$0xf] %vm1136_vm1, %v1442_v9  ;;  %v1440_v15 = vpack.c.bf16 %v1657_v10, %v1657_v10  ;;  %v754_v23 = vadd.f32 %v1868_v35, %v753_v19  ;;  %v1524_v24 = vpop.f32.mrb[18].mxu0  ;;  %1684 = vtanh.f32 %v762_v17 }
 0x10a   : > { %v1661_v20 = vpop.eup %1660  ;;  %1145 = vst.msk [vmem:[%s1889_s29 + $0x20] sm:$0xf] %vm1136_vm1, %v1408_v11  ;;  %v1411_v21 = vpack.c.bf16 %v1659_v14, %v1659_v14  ;;  %v1556_v25 = vpop.f32.mrb[18].mxu1  ;;  %v637_v28 = vadd.f32 %v1524_v24, %v1868_v35  ;;  %1686 = vtanh.f32 %v626_v22 }
 0x10b   : > { %v1663_v26 = vpop.eup %1662  ;;  %1177 = vst.msk [vmem:[%s1889_s29 + $0xa0] sm:$0xf] %vm1136_vm1, %v1440_v15  ;;  %v1443_v27 = vpack.c.bf16 %v1661_v20, %v1661_v20  ;;  %v628_v29 = vpop.f32.mrb[19].mxu0  ;;  %v765_v33 = vadd.f32 %v1556_v25, %v1868_v35  ;;  %1688 = vtanh.f32 %v754_v23 }
 0x10c   : > { %v756_v30 = vpop.f32.mrb[19].mxu1  ;;  %v1665_v31 = vpop.eup %1664  ;;  %1148 = vst.msk [vmem:[%s1889_s29 + $0x2c] sm:$0xf] %vm1136_vm1, %v1411_v21  ;;  %v1409_v32 = vpack.c.bf16 %v1663_v26, %v1663_v26  ;;  %v629_v37 = vadd.f32 %v1868_v35, %v628_v29  ;;  %1690 = vtanh.f32 %v637_v28 }
 0x10d   : > { %v1667_v34 = vpop.eup %1666  ;;  %1180 = vst.msk [vmem:[%s1889_s29 + $0xac] sm:$0xf] %vm1136_vm1, %v1443_v27  ;;  %v1441_v36 = vpack.c.bf16 %v1665_v31, %v1665_v31  ;;  %v757_v40 = vadd.f32 %v1868_v35, %v756_v30  ;;  %1692 = vtanh.f32 %v765_v33  ;;  %v1527_v45 = vpop.f32.mrb[20].mxu0 }
 0x10e   : > { %v1669_v38 = vpop.eup %1668  ;;  %1146 = vst.msk [vmem:[%s1889_s29 + $0x24] sm:$0xf] %vm1136_vm1, %v1409_v32  ;;  %v1414_v39 = vpack.c.bf16 %v1667_v34, %v1667_v34  ;;  %v1559_v46 = vpop.f32.mrb[20].mxu1  ;;  %1694 = vtanh.f32 %v629_v37  ;;  %v650_v49 = vadd.f32 %v1527_v45, %v1868_v35 }
 0x10f   : > { %v1671_v41 = vpop.eup %1670  ;;  %1178 = vst.msk [vmem:[%s1889_s29 + $0xa4] sm:$0xf] %vm1136_vm1, %v1441_v36  ;;  %v1446_v42 = vpack.c.bf16 %v1669_v38, %v1669_v38  ;;  %v778_v50 = vadd.f32 %v1559_v46, %v1868_v35  ;;  %v641_v51 = vpop.f32.mrb[21].mxu0  ;;  %1696 = vtanh.f32 %v757_v40 }
 0x110   : > { %v1673_v43 = vpop.eup %1672  ;;  %1151 = vst.msk [vmem:[%s1889_s29 + $0x38] sm:$0xf] %vm1136_vm1, %v1414_v39  ;;  %v1412_v44 = vpack.c.bf16 %v1671_v41, %v1671_v41  ;;  %v769_v52 = vpop.f32.mrb[21].mxu1  ;;  %v642_v55 = vadd.f32 %v1868_v35, %v641_v51  ;;  %1698 = vtanh.f32 %v650_v49 }
 0x111   : > { %v1675_v47 = vpop.eup %1674  ;;  %1183 = vst.msk [vmem:[%s1889_s29 + $0xb8] sm:$0xf] %vm1136_vm1, %v1446_v42  ;;  %v1444_v48 = vpack.c.bf16 %v1673_v43, %v1673_v43  ;;  %v770_v56 = vadd.f32 %v1868_v35, %v769_v52  ;;  %v1528_v57 = vpop.f32.mrb[22].mxu0  ;;  %1700 = vtanh.f32 %v778_v50 }
 0x112   : > { %v1677_v53 = vpop.eup %1676  ;;  %1149 = vst.msk [vmem:[%s1889_s29 + $0x30] sm:$0xf] %vm1136_vm1, %v1412_v44  ;;  %v1415_v54 = vpack.c.bf16 %v1675_v47, %v1675_v47  ;;  %v1560_v58 = vpop.f32.mrb[22].mxu1  ;;  %v653_v61 = vadd.f32 %v1528_v57, %v1868_v35  ;;  %1702 = vtanh.f32 %v642_v55 }
 0x113   : > { %v1679_v59 = vpop.eup %1678  ;;  %1181 = vst.msk [vmem:[%s1889_s29 + $0xb0] sm:$0xf] %vm1136_vm1, %v1444_v48  ;;  %v1447_v60 = vpack.c.bf16 %v1677_v53, %v1677_v53  ;;  %v644_v62 = vpop.f32.mrb[23].mxu0  ;;  %v781_v2 = vadd.f32 %v1560_v58, %v1868_v35  ;;  %1704 = vtanh.f32 %v770_v56 }
 0x114   : > { %v772_v63 = vpop.f32.mrb[23].mxu1  ;;  %v1681_v0 = vpop.eup %1680  ;;  %1152 = vst.msk [vmem:[%s1889_s29 + $0x3c] sm:$0xf] %vm1136_vm1, %v1415_v54  ;;  %v1413_v1 = vpack.c.bf16 %v1679_v59, %v1679_v59  ;;  %v645_v5 = vadd.f32 %v1868_v35, %v644_v62  ;;  %1706 = vtanh.f32 %v653_v61 }
 0x115   : > { %v1683_v3 = vpop.eup %1682  ;;  %1184 = vst.msk [vmem:[%s1889_s29 + $0xbc] sm:$0xf] %vm1136_vm1, %v1447_v60  ;;  %v1445_v4 = vpack.c.bf16 %v1681_v0, %v1681_v0  ;;  %v773_v8 = vadd.f32 %v1868_v35, %v772_v63  ;;  %1708 = vtanh.f32 %v781_v2  ;;  %v1531_v13 = vpop.f32.mrb[24].mxu0 }
 0x116   : > { %v1685_v6 = vpop.eup %1684  ;;  %1150 = vst.msk [vmem:[%s1889_s29 + $0x34] sm:$0xf] %vm1136_vm1, %v1413_v1  ;;  %v1418_v7 = vpack.c.bf16 %v1683_v3, %v1683_v3  ;;  %v1563_v14 = vpop.f32.mrb[24].mxu1  ;;  %1710 = vtanh.f32 %v645_v5  ;;  %v666_v17 = vadd.f32 %v1531_v13, %v1868_v35 }
 0x117   : > { %v1687_v9 = vpop.eup %1686  ;;  %1182 = vst.msk [vmem:[%s1889_s29 + $0xb4] sm:$0xf] %vm1136_vm1, %v1445_v4  ;;  %v1450_v10 = vpack.c.bf16 %v1685_v6, %v1685_v6  ;;  %v794_v18 = vadd.f32 %v1563_v14, %v1868_v35  ;;  %v657_v19 = vpop.f32.mrb[25].mxu0  ;;  %1712 = vtanh.f32 %v773_v8 }
 0x118   : > { %v1689_v11 = vpop.eup %1688  ;;  %1155 = vst.msk [vmem:[%s1889_s29 + $0x48] sm:$0xf] %vm1136_vm1, %v1418_v7  ;;  %v1416_v12 = vpack.c.bf16 %v1687_v9, %v1687_v9  ;;  %v785_v20 = vpop.f32.mrb[25].mxu1  ;;  %v658_v23 = vadd.f32 %v1868_v35, %v657_v19  ;;  %1714 = vtanh.f32 %v666_v17 }
 0x119   : > { %v1691_v15 = vpop.eup %1690  ;;  %1187 = vst.msk [vmem:[%s1889_s29 + $0xc8] sm:$0xf] %vm1136_vm1, %v1450_v10  ;;  %v1448_v16 = vpack.c.bf16 %v1689_v11, %v1689_v11  ;;  %v786_v24 = vadd.f32 %v1868_v35, %v785_v20  ;;  %v1532_v25 = vpop.f32.mrb[26].mxu0  ;;  %1716 = vtanh.f32 %v794_v18 }
 0x11a   : > { %v1693_v21 = vpop.eup %1692  ;;  %1153 = vst.msk [vmem:[%s1889_s29 + $0x40] sm:$0xf] %vm1136_vm1, %v1416_v12  ;;  %v1419_v22 = vpack.c.bf16 %v1691_v15, %v1691_v15  ;;  %v1564_v26 = vpop.f32.mrb[26].mxu1  ;;  %v669_v29 = vadd.f32 %v1532_v25, %v1868_v35  ;;  %1718 = vtanh.f32 %v658_v23 }
 0x11b   : > { %v1695_v27 = vpop.eup %1694  ;;  %1185 = vst.msk [vmem:[%s1889_s29 + $0xc0] sm:$0xf] %vm1136_vm1, %v1448_v16  ;;  %v1451_v28 = vpack.c.bf16 %v1693_v21, %v1693_v21  ;;  %v660_v30 = vpop.f32.mrb[27].mxu0  ;;  %v797_v34 = vadd.f32 %v1564_v26, %v1868_v35  ;;  %1720 = vtanh.f32 %v786_v24 }
 0x11c   : > { %v788_v31 = vpop.f32.mrb[27].mxu1  ;;  %v1697_v32 = vpop.eup %1696  ;;  %1156 = vst.msk [vmem:[%s1889_s29 + $0x4c] sm:$0xf] %vm1136_vm1, %v1419_v22  ;;  %v1417_v33 = vpack.c.bf16 %v1695_v27, %v1695_v27  ;;  %v661_v38 = vadd.f32 %v1868_v35, %v660_v30  ;;  %1722 = vtanh.f32 %v669_v29 }
 0x11d   : > { %v1699_v36 = vpop.eup %1698  ;;  %1188 = vst.msk [vmem:[%s1889_s29 + $0xcc] sm:$0xf] %vm1136_vm1, %v1451_v28  ;;  %v1449_v37 = vpack.c.bf16 %v1697_v32, %v1697_v32  ;;  %v789_v41 = vadd.f32 %v1868_v35, %v788_v31  ;;  %1724 = vtanh.f32 %v797_v34  ;;  %v1535_v46 = vpop.f32.mrb[28].mxu0 }
 0x11e   : > { %v1701_v39 = vpop.eup %1700  ;;  %1154 = vst.msk [vmem:[%s1889_s29 + $0x44] sm:$0xf] %vm1136_vm1, %v1417_v33  ;;  %v1422_v40 = vpack.c.bf16 %v1699_v36, %v1699_v36  ;;  %v1567_v47 = vpop.f32.mrb[28].mxu1  ;;  %1726 = vtanh.f32 %v661_v38  ;;  %v682_v50 = vadd.f32 %v1535_v46, %v1868_v35 }
 0x11f   : > { %v1703_v42 = vpop.eup %1702  ;;  %1186 = vst.msk [vmem:[%s1889_s29 + $0xc4] sm:$0xf] %vm1136_vm1, %v1449_v37  ;;  %v1454_v43 = vpack.c.bf16 %v1701_v39, %v1701_v39  ;;  %v810_v51 = vadd.f32 %v1567_v47, %v1868_v35  ;;  %v673_v52 = vpop.f32.mrb[29].mxu0  ;;  %1728 = vtanh.f32 %v789_v41 }
 0x120   : > { %v1705_v44 = vpop.eup %1704  ;;  %1159 = vst.msk [vmem:[%s1889_s29 + $0x58] sm:$0xf] %vm1136_vm1, %v1422_v40  ;;  %v1420_v45 = vpack.c.bf16 %v1703_v42, %v1703_v42  ;;  %v801_v53 = vpop.f32.mrb[29].mxu1  ;;  %v674_v56 = vadd.f32 %v1868_v35, %v673_v52  ;;  %1730 = vtanh.f32 %v682_v50 }
 0x121   : > { %v1707_v48 = vpop.eup %1706  ;;  %1191 = vst.msk [vmem:[%s1889_s29 + $0xd8] sm:$0xf] %vm1136_vm1, %v1454_v43  ;;  %v1452_v49 = vpack.c.bf16 %v1705_v44, %v1705_v44  ;;  %v802_v57 = vadd.f32 %v1868_v35, %v801_v53  ;;  %v1536_v58 = vpop.f32.mrb[30].mxu0  ;;  %1732 = vtanh.f32 %v810_v51 }
 0x122   : > { %v1709_v54 = vpop.eup %1708  ;;  %1157 = vst.msk [vmem:[%s1889_s29 + $0x50] sm:$0xf] %vm1136_vm1, %v1420_v45  ;;  %v1423_v55 = vpack.c.bf16 %v1707_v48, %v1707_v48  ;;  %v1568_v59 = vpop.f32.mrb[30].mxu1  ;;  %v685_v62 = vadd.f32 %v1536_v58, %v1868_v35  ;;  %1734 = vtanh.f32 %v674_v56 }
 0x123   : > { %v1711_v60 = vpop.eup %1710  ;;  %1189 = vst.msk [vmem:[%s1889_s29 + $0xd0] sm:$0xf] %vm1136_vm1, %v1452_v49  ;;  %v1455_v61 = vpack.c.bf16 %v1709_v54, %v1709_v54  ;;  %v676_v63 = vpop.f32.mrb[31].mxu0  ;;  %v813_v3 = vadd.f32 %v1568_v59, %v1868_v35  ;;  %1736 = vtanh.f32 %v802_v57 }
 0x124   : > { %v804_v0 = vpop.f32.mrb[31].mxu1  ;;  %v1713_v1 = vpop.eup %1712  ;;  %1160 = vst.msk [vmem:[%s1889_s29 + $0x5c] sm:$0xf] %vm1136_vm1, %v1423_v55  ;;  %v1421_v2 = vpack.c.bf16 %v1711_v60, %v1711_v60  ;;  %v677_v6 = vadd.f32 %v1868_v35, %v676_v63  ;;  %1738 = vtanh.f32 %v685_v62 }
 0x125   : > { %v1715_v4 = vpop.eup %1714  ;;  %1192 = vst.msk [vmem:[%s1889_s29 + $0xdc] sm:$0xf] %vm1136_vm1, %v1455_v61  ;;  %v1453_v5 = vpack.c.bf16 %v1713_v1, %v1713_v1  ;;  %v805_v9 = vadd.f32 %v1868_v35, %v804_v0  ;;  %1740 = vtanh.f32 %v813_v3 }
 0x126   : > { %v1717_v7 = vpop.eup %1716  ;;  %1158 = vst.msk [vmem:[%s1889_s29 + $0x54] sm:$0xf] %vm1136_vm1, %v1421_v2  ;;  %v1426_v8 = vpack.c.bf16 %v1715_v4, %v1715_v4  ;;  %1742 = vtanh.f32 %v677_v6 }
 0x127   : > { %v1719_v10 = vpop.eup %1718  ;;  %1190 = vst.msk [vmem:[%s1889_s29 + $0xd4] sm:$0xf] %vm1136_vm1, %v1453_v5  ;;  %v1458_v11 = vpack.c.bf16 %v1717_v7, %v1717_v7  ;;  %1744 = vtanh.f32 %v805_v9 }
 0x128   : > { %v1721_v12 = vpop.eup %1720  ;;  %1163 = vst.msk [vmem:[%s1889_s29 + $0x68] sm:$0xf] %vm1136_vm1, %v1426_v8  ;;  %v1424_v13 = vpack.c.bf16 %v1719_v10, %v1719_v10 }
 0x129   : > { %v1723_v14 = vpop.eup %1722  ;;  %1195 = vst.msk [vmem:[%s1889_s29 + $0xe8] sm:$0xf] %vm1136_vm1, %v1458_v11  ;;  %v1456_v15 = vpack.c.bf16 %v1721_v12, %v1721_v12 }
 0x12a   : > { %v1725_v35 = vpop.eup %1724  ;;  %1161 = vst.msk [vmem:[%s1889_s29 + $0x60] sm:$0xf] %vm1136_vm1, %v1424_v13  ;;  %v1427_v16 = vpack.c.bf16 %v1723_v14, %v1723_v14 }
 0x12b   : > { %v1727_v17 = vpop.eup %1726  ;;  %1193 = vst.msk [vmem:[%s1889_s29 + $0xe0] sm:$0xf] %vm1136_vm1, %v1456_v15  ;;  %v1459_v18 = vpack.c.bf16 %v1725_v35, %v1725_v35 }
 0x12c   : > { %v1729_v19 = vpop.eup %1728  ;;  %1164 = vst.msk [vmem:[%s1889_s29 + $0x6c] sm:$0xf] %vm1136_vm1, %v1427_v16  ;;  %v1425_v20 = vpack.c.bf16 %v1727_v17, %v1727_v17 }
 0x12d   : > { %v1731_v21 = vpop.eup %1730  ;;  %1196 = vst.msk [vmem:[%s1889_s29 + $0xec] sm:$0xf] %vm1136_vm1, %v1459_v18  ;;  %v1457_v22 = vpack.c.bf16 %v1729_v19, %v1729_v19 }
 0x12e   : > { %v1733_v23 = vpop.eup %1732  ;;  %1162 = vst.msk [vmem:[%s1889_s29 + $0x64] sm:$0xf] %vm1136_vm1, %v1425_v20  ;;  %v1430_v24 = vpack.c.bf16 %v1731_v21, %v1731_v21 }
 0x12f   : > { %v1735_v25 = vpop.eup %1734  ;;  %1194 = vst.msk [vmem:[%s1889_s29 + $0xe4] sm:$0xf] %vm1136_vm1, %v1457_v22  ;;  %v1462_v26 = vpack.c.bf16 %v1733_v23, %v1733_v23 }
 0x130   : > { %v1737_v27 = vpop.eup %1736  ;;  %1167 = vst.msk [vmem:[%s1889_s29 + $0x78] sm:$0xf] %vm1136_vm1, %v1430_v24  ;;  %v1428_v28 = vpack.c.bf16 %v1735_v25, %v1735_v25 }
 0x131   : > { %v1739_v29 = vpop.eup %1738  ;;  %1199 = vst.msk [vmem:[%s1889_s29 + $0xf8] sm:$0xf] %vm1136_vm1, %v1462_v26  ;;  %v1460_v30 = vpack.c.bf16 %v1737_v27, %v1737_v27 }
 0x132   : > { %v1741_v31 = vpop.eup %1740  ;;  %1165 = vst.msk [vmem:[%s1889_s29 + $0x70] sm:$0xf] %vm1136_vm1, %v1428_v28  ;;  %v1431_v32 = vpack.c.bf16 %v1739_v29, %v1739_v29 }
 0x133   : > { %v1743_v33 = vpop.eup %1742  ;;  %1197 = vst.msk [vmem:[%s1889_s29 + $0xf0] sm:$0xf] %vm1136_vm1, %v1460_v30  ;;  %v1463_v34 = vpack.c.bf16 %v1741_v31, %v1741_v31 }
 0x134   : > { %v1745_v36 = vpop.eup %1744  ;;  %1168 = vst.msk [vmem:[%s1889_s29 + $0x7c] sm:$0xf] %vm1136_vm1, %v1431_v32  ;;  %v1429_v37 = vpack.c.bf16 %v1743_v33, %v1743_v33 }
 0x135   : > { %1200 = vst.msk [vmem:[%s1889_s29 + $0xfc] sm:$0xf] %vm1136_vm1, %v1463_v34  ;;  %v1461_v38 = vpack.c.bf16 %v1745_v36, %v1745_v36 }
 0x136   : > { %1166 = vst.msk [vmem:[%s1889_s29 + $0x74] sm:$0xf] %vm1136_vm1, %v1429_v37 }
 0x137   : > { %1198 = vst.msk [vmem:[%s1889_s29 + $0xf4] sm:$0xf] %vm1136_vm1, %v1461_v38 }
 0x138 PF: > { %s13_s12 = sadd.s32 1, %s1752_s12  }
 0x139   : > { %p10_p4 = scmp.ge.s32.totalorder %s13_s12, 6  }
 0x13b   :  { %12 = sbr.rel (!%p10_p4) target bundleno = 1 (0x1), region = 62 }

// kernel: _lambda_.9
= control target key start
LH: loop header
LB: loop body
LE: loop exit
PB: predicated region body
PF: predicated region fallthrough
CT: control target
= control target key end

     0   :  { %s478_s15 = smov 0   ;;  %s512_s0 = inlined_call_operand.vmem [shape: bf16[32,480], index: 0, kind: input, shape index: {}]   ;;  %s513_s1 = inlined_call_operand.vmem [shape: bf16[32,480], index: 1, kind: input, shape index: {}]   ;;  %s514_s2 = inlined_call_operand.vmem [shape: bf16[32,480], index: 2, kind: input, shape index: {}]   ;;  %s515_s3 = inlined_call_operand.vmem [shape: bf16[32,480], index: 3, kind: input, shape index: {}]   ;;  %s516_s4 = inlined_call_operand.vmem [shape: bf16[32,480], index: 4, kind: output, shape index: {}]  }
   0x1 LB: > { %s410_s16 = sadd.s32 4294967295, %s451_s15   ;;  %p414_p0 = scmp.ge.s32.totalorder %s451_s15, 1  ;;  %s451_s15 = sphi %s478_s15, %s14_s15  }
   0x2   : > { %p200_p1 = scmp.lt.s32.totalorder %s451_s15, 3 }
   0x4   : > { %p201_p2 = pnand %p414_p0, %p200_p1 }
   0x5   : > { %s415_s17 = sshll.u32 (!%p201_p2), %s410_s16, 1  ;;  %vm310_vm0 = vcmask (!%p201_p2), 1043456   ;;  %vm311_vm1 = vcmask (!%p201_p2), 785412  }
   0x6   : > { %204 = sbr.rel (%p201_p2) target bundleno = 29 (0x1d), region = 36  ;;  %p247_p3 = scmp.lt.s32.totalorder (!%p201_p2), %s415_s17, 3  ;;  %vm492_vm2 = vmor (!%p201_p2), %vm311_vm1, %vm310_vm0 }
   0xd   : > { %s520_s17 = smov (!%p247_p3, %s415_s17), 3 }
   0xe   : > { %s432_s18 = sshll.u32 %s520_s17, 4 }
   0xf   : > { %s251_s21 = scalar_lea.vmem %s512_s0, %s432_s18  ;;  %s258_s24 = scalar_lea.vmem %s513_s1, %s432_s18 }
  0x10   : > { %s265_s27 = scalar_lea.vmem %s514_s2, %s432_s18  ;;  %s272_s30 = scalar_lea.vmem %s515_s3, %s432_s18  ;;  %v281_v1 = vld [vmem:[%s251_s21] sm:$0xff]  ;;  %v282_v3 = vld [vmem:[%s251_s21 + $0x8] sm:$0xff]  ;;  %v283_v12 = vld [vmem:[%s251_s21 + $0x10] sm:$0xff] }
  0x11   : > { %v285_v2 = vld [vmem:[%s258_s24] sm:$0xff]  ;;  %v286_v7 = vld [vmem:[%s258_s24 + $0x8] sm:$0xff]  ;;  %s279_s7 = scalar_lea.vmem %s516_s4, %s432_s18  ;;  %v287_v14 = vld [vmem:[%s258_s24 + $0x10] sm:$0xff] }
  0x12   : > { %v289_v4 = vmax.bf16 %v285_v2, %v281_v1  ;;  %v293_v5 = vld [vmem:[%s265_s27] sm:$0xff]  ;;  %v290_v9 = vmax.bf16 %v286_v7, %v282_v3  ;;  %v294_v10 = vld [vmem:[%s265_s27 + $0x8] sm:$0xff]  ;;  %v295_v15 = vld [vmem:[%s265_s27 + $0x10] sm:$0xff]  ;;  %v291_v18 = vmax.bf16 %v287_v14, %v283_v12 }
  0x13   : > { %v297_v6 = vld [vmem:[%s272_s30] sm:$0xff]  ;;  %v298_v11 = vld [vmem:[%s272_s30 + $0x8] sm:$0xff]  ;;  %v299_v16 = vld [vmem:[%s272_s30 + $0x10] sm:$0xff] }
  0x14   : > { %v301_v8 = vmax.bf16 %v297_v6, %v293_v5  ;;  %v302_v13 = vmax.bf16 %v298_v11, %v294_v10  ;;  %v303_v19 = vmax.bf16 %v299_v16, %v295_v15  ;;  %v284_v20 = vld [vmem:[%s251_s21 + $0x18] sm:$0xff] }
  0x15   : > { %v288_v21 = vld [vmem:[%s258_s24 + $0x18] sm:$0xff] }
  0x16   : > { %v305_v17 = vmax.bf16 %v301_v8, %v289_v4  ;;  %v296_v22 = vld [vmem:[%s265_s27 + $0x18] sm:$0xff]  ;;  %v306_v23 = vmax.bf16 %v302_v13, %v290_v9  ;;  %v292_v24 = vmax.bf16 %v288_v21, %v284_v20  ;;  %v307_v26 = vmax.bf16 %v303_v19, %v291_v18 }
  0x17   : > { %v300_v25 = vld [vmem:[%s272_s30 + $0x18] sm:$0xff] }
  0x18   : > { %309 = vst [vmem:[%s279_s7] sm:$0xff] %v305_v17  ;;  %v304_v27 = vmax.bf16 %v300_v25, %v296_v22  ;;  %313 = vst.msk [vmem:[%s279_s7 + $0x8] sm:$0xff] %vm492_vm2, %v306_v23 }
  0x19   : > { %314 = vst [vmem:[%s279_s7 + $0x10] sm:$0xff] %v307_v26 }
  0x1a   : > { %v308_v28 = vmax.bf16 %v304_v27, %v292_v24 }
  0x1c   : > { %315 = vst.msk [vmem:[%s279_s7 + $0x18] sm:$0xff] %vm492_vm2, %v308_v28 }
  0x1d PF: > { %s14_s15 = sadd.s32 1, %s451_s15  }
  0x1e   : > { %p11_p4 = scmp.ge.s32.totalorder %s14_s15, 4  }
  0x20   :  { %13 = sbr.rel (!%p11_p4) target bundleno = 1 (0x1), region = 75 }

// kernel: _lambda_.10
= control target key start
LH: loop header
LB: loop body
LE: loop exit
PB: predicated region body
PF: predicated region fallthrough
CT: control target
= control target key end

     0   :  { %s1409_s12 = smov 0   ;;  %s1627_s0 = inlined_call_operand.vmem [shape: bf16[352,288], index: 0, kind: input, shape index: {}]   ;;  %s1628_s1 = inlined_call_operand.vmem [shape: bf16[288,64], index: 1, kind: input, shape index: {}]   ;;  %s1629_s2 = inlined_call_operand.vmem [shape: f32[1,64], index: 2, kind: input, shape index: {}]   ;;  %s1630_s3 = inlined_call_operand.vmem [shape: bf16[352,64], index: 3, kind: output, shape index: {}]  }
   0x1 LB: > { %s1003_s13 = sadd.s32 4294967295, %s1385_s12   ;;  %p1007_p0 = scmp.ge.s32.totalorder %s1385_s12, 1  ;;  %s1385_s12 = sphi %s1409_s12, %s13_s12  }
   0x2   : > { %p139_p1 = scmp.lt.s32.totalorder %s1385_s12, 3 }
   0x4   : > { %p140_p2 = pnand %p1007_p0, %p139_p1 }
   0x5   : > { %v1273_v0 = vld [vmem:[%s1628_s1 + $0x40] sm:$0xff] (!%p140_p2)   ;;  %v1387_v2 = vmov (!%p140_p2), 0.0   ;;  %s164_s18 = smul.u32 (!%p140_p2), 22, %s1003_s13  ;;  %v1275_v3 = vld [vmem:[%s1628_s1 + $0x48] sm:$0xff] (!%p140_p2)   ;;  %vm1388_vm0 = vmmov (!%p140_p2), 0   ;;  %v1277_v5 = vld [vmem:[%s1628_s1 + $0x50] sm:$0xff] (!%p140_p2)  }
   0x6   : > { %143 = sbr.rel (%p140_p2) target bundleno = 353 (0x161), region = 32  ;;  %v1274_v1 = vld [vmem:[%s1628_s1] sm:$0xff] (!%p140_p2)   ;;  %1214 = vmatprep.subr.bf16.mxu1 (!%p140_p2), %v1387_v2  ;;  %1119 = vmatprep.subr.bf16.mxu0 (!%p140_p2), %v1273_v0  ;;  %v1276_v4 = vld [vmem:[%s1628_s1 + $0x8] sm:$0xff] (!%p140_p2)   ;;  %v1278_v6 = vld [vmem:[%s1628_s1 + $0x10] sm:$0xff] (!%p140_p2)   ;;  %vm538_vm1 = vcmask (!%p140_p2), 261120   ;;  %vm924_vm2 = vcmask (!%p140_p2), 519168  }
   0x7   : > { %1120 = vmatpush3.bf16.msra.mxu0 (!%p140_p2), %v1274_v1  ;;  %p165_p3 = scmp.lt.s32.totalorder (!%p140_p2), %s164_s18, 43  ;;  %1218 = vmatprep.mubr.msk.bf16.mxu1 (!%p140_p2), %vm1388_vm0, %v1387_v2  ;;  %v1279_v7 = vld [vmem:[%s1628_s1 + $0x58] sm:$0xff] (!%p140_p2)   ;;  %v1281_v9 = vld [vmem:[%s1628_s1 + $0x60] sm:$0xff] (!%p140_p2)   ;;  %v1283_v12 = vld [vmem:[%s1628_s1 + $0x68] sm:$0xff] (!%p140_p2)  }
   0x8   : > { %1121 = vmatprep.subr.bf16.mxu0 (!%p140_p2), %v1275_v3  ;;  %v1280_v8 = vld [vmem:[%s1628_s1 + $0x18] sm:$0xff] (!%p140_p2)   ;;  %v1287_v10 = vld [vmem:[%s1628_s1 + $0x80] sm:$0xff] (!%p140_p2)   ;;  %v1284_v13 = vld [vmem:[%s1628_s1 + $0x28] sm:$0xff] (!%p140_p2)  }
   0x9   : > { %v1282_v11 = vld [vmem:[%s1628_s1 + $0x20] sm:$0xff] (!%p140_p2)   ;;  %1215 = vmatpush3.bf16.msra.mxu1 (!%p140_p2), %v1287_v10  ;;  %v1285_v14 = vld [vmem:[%s1628_s1 + $0x70] sm:$0xff] (!%p140_p2)   ;;  %v1293_v16 = vld [vmem:[%s1628_s1 + $0x88] sm:$0xff] (!%p140_p2)  }
   0xa   : > { %1216 = vmatprep.subr.bf16.mxu1 (!%p140_p2), %v1387_v2  ;;  %v1286_v18 = vld [vmem:[%s1628_s1 + $0x30] sm:$0xff] (!%p140_p2)   ;;  %v1288_v19 = vld [vmem:[%s1628_s1 + $0x78] sm:$0xff] (!%p140_p2)   ;;  %v1550_v61 = vld [vmem:[%s1629_s2] ss:$0 sm:$0xff] (!%p140_p2) }
   0xb   : > { %1122 = vmatpush3.bf16.msra.mxu0 (!%p140_p2), %v1276_v4  ;;  %v1289_v20 = vld [vmem:[%s1628_s1 + $0x38] sm:$0xff] (!%p140_p2)  }
   0xc   : > { %1123 = vmatprep.subr.bf16.mxu0 (!%p140_p2), %v1277_v5 }
   0xd   : > { %s1632_s18 = smov (!%p165_p3, %s164_s18), 43  ;;  %1217 = vmatpush3.bf16.msra.mxu1 %v1293_v16 }
   0xe   : > { %s1262_s4 = smul.u32 12, %s1632_s18  ;;  %s1009_s5 = sshll.u32 %s1632_s18, 2 }
   0xf   : > { %1124 = vmatpush3.bf16.msra.mxu0 %v1278_v6  ;;  %s1560_s8 = scalar_lea.vmem %s1630_s3, %s1009_s5 }
  0x10   : > { %1125 = vmatprep.subr.bf16.mxu0 %v1279_v7  ;;  %s1459_s14 = scalar_lea.vmem %s1627_s0, %s1262_s4 }
  0x11   : > { %v1292_v15 = vld [vmem:[%s1459_s14 + $0x4] ss:$12 sps:$4 sm:$0xff]   ;;  %v1294_v17 = vld [vmem:[%s1459_s14 + $0x8] ss:$12 sps:$4 sm:$0xff]   ;;  %v1298_v21 = vld [vmem:[%s1459_s14 + $0x20] ss:$12 sps:$4 sm:$0xff]  }
  0x12   : > { %604 = vmatprep.mubr.bf16.mxu0 %v1292_v15  ;;  %1219 = vmatmul.mubr.msk.bf16.vlgmr.msra.gmra.mrb[0].mxu1 %vm538_vm1, %v1294_v17  ;;  %v1290_v22 = vld [vmem:[%s1459_s14] ss:$12 sps:$4 sm:$0xff]   ;;  %v1295_v23 = vld [vmem:[%s1459_s14 + $0x1c] ss:$12 sps:$4 sm:$0xff]   ;;  %v1302_v24 = vld [vmem:[%s1459_s14 + $0x38] ss:$12 sps:$4 sm:$0xff]  }
  0x13   : > { %1126 = vmatpush3.bf16.msra.mxu0 %v1280_v8  ;;  %1222 = vmatprep.mubr.msk.bf16.mxu1 %vm1388_vm0, %v1387_v2  ;;  %v1297_v25 = vld [vmem:[%s1459_s14 + $0x18] ss:$12 sps:$4 sm:$0xff]   ;;  %v1299_v26 = vld [vmem:[%s1459_s14 + $0x34] ss:$12 sps:$4 sm:$0xff]   ;;  %v1306_v27 = vld [vmem:[%s1459_s14 + $0x50] ss:$12 sps:$4 sm:$0xff]  }
  0x14   : > { %1127 = vmatprep.subr.bf16.mxu0 %v1281_v9  ;;  %v1301_v28 = vld [vmem:[%s1459_s14 + $0x30] ss:$12 sps:$4 sm:$0xff]   ;;  %v1303_v29 = vld [vmem:[%s1459_s14 + $0x4c] ss:$12 sps:$4 sm:$0xff]   ;;  %v1310_v30 = vld [vmem:[%s1459_s14 + $0x68] ss:$12 sps:$4 sm:$0xff]  }
  0x15   : > { %v1305_v31 = vld [vmem:[%s1459_s14 + $0x48] ss:$12 sps:$4 sm:$0xff]   ;;  %v1307_v32 = vld [vmem:[%s1459_s14 + $0x64] ss:$12 sps:$4 sm:$0xff]   ;;  %v1314_v33 = vld [vmem:[%s1459_s14 + $0x80] ss:$12 sps:$4 sm:$0xff]  }
  0x16   : > { %v1309_v34 = vld [vmem:[%s1459_s14 + $0x60] ss:$12 sps:$4 sm:$0xff]   ;;  %v1311_v35 = vld [vmem:[%s1459_s14 + $0x7c] ss:$12 sps:$4 sm:$0xff]   ;;  %v1318_v36 = vld [vmem:[%s1459_s14 + $0x98] ss:$12 sps:$4 sm:$0xff]  }
  0x17   : > { %1128 = vmatpush3.bf16.msra.mxu0 %v1282_v11  ;;  %v1313_v37 = vld [vmem:[%s1459_s14 + $0x78] ss:$12 sps:$4 sm:$0xff]   ;;  %v1315_v38 = vld [vmem:[%s1459_s14 + $0x94] ss:$12 sps:$4 sm:$0xff]   ;;  %v1322_v39 = vld [vmem:[%s1459_s14 + $0xb0] ss:$12 sps:$4 sm:$0xff]  }
  0x18   : > { %1129 = vmatprep.subr.bf16.mxu0 %v1283_v12  ;;  %v1317_v40 = vld [vmem:[%s1459_s14 + $0x90] ss:$12 sps:$4 sm:$0xff]   ;;  %v1319_v41 = vld [vmem:[%s1459_s14 + $0xac] ss:$12 sps:$4 sm:$0xff]   ;;  %v1326_v42 = vld [vmem:[%s1459_s14 + $0xc8] ss:$12 sps:$4 sm:$0xff]  }
  0x19   : > { %v1321_v43 = vld [vmem:[%s1459_s14 + $0xa8] ss:$12 sps:$4 sm:$0xff]   ;;  %v1323_v44 = vld [vmem:[%s1459_s14 + $0xc4] ss:$12 sps:$4 sm:$0xff]   ;;  %v1330_v45 = vld [vmem:[%s1459_s14 + $0xe0] ss:$12 sps:$4 sm:$0xff]  }
  0x1a   : > { %1223 = vmatmul.mubr.msk.bf16.gmra.mrb[4].mxu1 %vm538_vm1, %v1298_v21  ;;  %v1325_v46 = vld [vmem:[%s1459_s14 + $0xc0] ss:$12 sps:$4 sm:$0xff]   ;;  %v1327_v47 = vld [vmem:[%s1459_s14 + $0xdc] ss:$12 sps:$4 sm:$0xff]   ;;  %v1334_v48 = vld [vmem:[%s1459_s14 + $0xf8] ss:$12 sps:$4 sm:$0xff]  }
  0x1b   : > { %1130 = vmatpush3.bf16.msra.mxu0 %v1284_v13  ;;  %1226 = vmatprep.mubr.msk.bf16.mxu1 %vm1388_vm0, %v1387_v2  ;;  %v1329_v49 = vld [vmem:[%s1459_s14 + $0xd8] ss:$12 sps:$4 sm:$0xff]   ;;  %v1331_v50 = vld [vmem:[%s1459_s14 + $0xf4] ss:$12 sps:$4 sm:$0xff]   ;;  %v1333_v51 = vld [vmem:[%s1459_s14 + $0xf0] ss:$12 sps:$4 sm:$0xff]  }
  0x1c   : > { %1131 = vmatprep.subr.bf16.mxu0 %v1285_v14 }
  0x1f   : > { %1132 = vmatpush3.bf16.msra.mxu0 %v1286_v18 }
  0x20   : > { %1133 = vmatprep.subr.bf16.mxu0 %v1288_v19 }
  0x22   : > { %1227 = vmatmul.mubr.msk.bf16.gmra.mrb[8].mxu1 %vm538_vm1, %v1302_v24 }
  0x23   : > { %1134 = vmatpush3.bf16.msra.mxu0 %v1289_v20  ;;  %1230 = vmatprep.mubr.msk.bf16.mxu1 %vm1388_vm0, %v1387_v2 }
  0x26   : > { %605 = vmatmul.mubr.bf16.vlgmr.msra.gmra.mrb[0].mxu0 %v1290_v22 }
  0x27   : > { %612 = vmatprep.mubr.bf16.mxu0 %v1295_v23 }
  0x2a   : > { %1231 = vmatmul.mubr.msk.bf16.gmra.mrb[12].mxu1 %vm538_vm1, %v1306_v27 }
  0x2b   : > { %1234 = vmatprep.mubr.msk.bf16.mxu1 %vm1388_vm0, %v1387_v2 }
  0x2e   : > { %613 = vmatmul.mubr.bf16.gmra.mrb[4].mxu0 %v1297_v25 }
  0x2f   : > { %620 = vmatprep.mubr.bf16.mxu0 %v1299_v26 }
  0x32   : > { %1235 = vmatmul.mubr.msk.bf16.gmra.mrb[16].mxu1 %vm538_vm1, %v1310_v30 }
  0x33   : > { %1238 = vmatprep.mubr.msk.bf16.mxu1 %vm1388_vm0, %v1387_v2 }
  0x36   : > { %621 = vmatmul.mubr.bf16.gmra.mrb[8].mxu0 %v1301_v28 }
  0x37   : > { %628 = vmatprep.mubr.bf16.mxu0 %v1303_v29 }
  0x3a   : > { %1239 = vmatmul.mubr.msk.bf16.gmra.mrb[20].mxu1 %vm538_vm1, %v1314_v33 }
  0x3b   : > { %1242 = vmatprep.mubr.msk.bf16.mxu1 %vm1388_vm0, %v1387_v2 }
  0x3e   : > { %629 = vmatmul.mubr.bf16.gmra.mrb[12].mxu0 %v1305_v31 }
  0x3f   : > { %636 = vmatprep.mubr.bf16.mxu0 %v1307_v32 }
  0x42   : > { %1243 = vmatmul.mubr.msk.bf16.gmra.mrb[24].mxu1 %vm538_vm1, %v1318_v36 }
  0x43   : > { %1246 = vmatprep.mubr.msk.bf16.mxu1 %vm1388_vm0, %v1387_v2 }
  0x46   : > { %637 = vmatmul.mubr.bf16.gmra.mrb[16].mxu0 %v1309_v34 }
  0x47   : > { %644 = vmatprep.mubr.bf16.mxu0 %v1311_v35 }
  0x4a   : > { %1247 = vmatmul.mubr.msk.bf16.gmra.mrb[28].mxu1 %vm538_vm1, %v1322_v39 }
  0x4b   : > { %1250 = vmatprep.mubr.msk.bf16.mxu1 %vm1388_vm0, %v1387_v2 }
  0x4e   : > { %645 = vmatmul.mubr.bf16.gmra.mrb[20].mxu0 %v1313_v37 }
  0x4f   : > { %652 = vmatprep.mubr.bf16.mxu0 %v1315_v38 }
  0x52   : > { %1251 = vmatmul.mubr.msk.bf16.gmra.mrb[32].mxu1 %vm538_vm1, %v1326_v42 }
  0x53   : > { %1254 = vmatprep.mubr.msk.bf16.mxu1 %vm1388_vm0, %v1387_v2 }
  0x56   : > { %653 = vmatmul.mubr.bf16.gmra.mrb[24].mxu0 %v1317_v40 }
  0x57   : > { %660 = vmatprep.mubr.bf16.mxu0 %v1319_v41 }
  0x5a   : > { %1255 = vmatmul.mubr.msk.bf16.gmra.mrb[36].mxu1 %vm538_vm1, %v1330_v45 }
  0x5b   : > { %1258 = vmatprep.mubr.msk.bf16.mxu1 %vm1388_vm0, %v1387_v2 }
  0x5e   : > { %661 = vmatmul.mubr.bf16.gmra.mrb[28].mxu0 %v1321_v43 }
  0x5f   : > { %668 = vmatprep.mubr.bf16.mxu0 %v1323_v44 }
  0x62   : > { %1259 = vmatmul.mubr.msk.bf16.gmra.mrb[40].mxu1 %vm538_vm1, %v1334_v48 }
  0x66   : > { %669 = vmatmul.mubr.bf16.gmra.mrb[32].mxu0 %v1325_v46 }
  0x67   : > { %676 = vmatprep.mubr.bf16.mxu0 %v1327_v47 }
  0x6e   : > { %677 = vmatmul.mubr.bf16.gmra.mrb[36].mxu0 %v1329_v49 }
  0x6f   : > { %684 = vmatprep.mubr.bf16.mxu0 %v1331_v50 }
  0x76   : > { %685 = vmatmul.mubr.bf16.gmra.mrb[40].mxu0 %v1333_v51 }
  0xe5   : > { %v727_v52 = vpop.f32.mrb[0].mxu1 }
  0xe6   : > { %v1220_v53 = vpop.f32.mrb[1].mxu1 }
  0xe7   : > { %v730_v54 = vpop.f32.mrb[2].mxu1 }
  0xe8   : > { %v1221_v55 = vpop.f32.mrb[3].mxu1 }
  0xed   : > { %v735_v56 = vpop.f32.mrb[4].mxu1 }
  0xee   : > { %v1224_v57 = vpop.f32.mrb[5].mxu1 }
  0xef   : > { %v738_v59 = vpop.f32.mrb[6].mxu1 }
  0xf0   : > { %v1225_v62 = vpop.f32.mrb[7].mxu1 }
  0xf5   : > { %v743_v6 = vpop.f32.mrb[8].mxu1 }
  0xf6   : > { %v1228_v7 = vpop.f32.mrb[9].mxu1 }
  0xf7   : > { %v746_v10 = vpop.f32.mrb[10].mxu1 }
  0xf8   : > { %v1229_v12 = vpop.f32.mrb[11].mxu1 }
  0xf9   : > { %v1135_v58 = vpop.f32.mrb[0].mxu0 }
  0xfa   : > { %v1136_v60 = vpop.f32.mrb[1].mxu0 }
  0xfb   : > { %v1137_v63 = vadd.f32 %v1136_v60, %v1135_v58  ;;  %v1138_v0 = vpop.f32.mrb[2].mxu0 }
  0xfc   : > { %v1139_v1 = vpop.f32.mrb[3].mxu0 }
  0xfd   : > { %v607_v2 = vadd.f32 %v1137_v63, %v1550_v61  ;;  %v1140_v3 = vadd.f32 %v1139_v1, %v1138_v0  ;;  %v751_v20 = vpop.f32.mrb[12].mxu1 }
  0xfe   : > { %v1232_v21 = vpop.f32.mrb[13].mxu1 }
  0xff   : > { %v728_v4 = vadd.f32 %v727_v52, %v607_v2  ;;  %v610_v5 = vadd.f32 %v1140_v3, %v1550_v61  ;;  %v754_v24 = vpop.f32.mrb[14].mxu1 }
 0x100   : > { %v1233_v26 = vpop.f32.mrb[15].mxu1 }
 0x101   : > { %1335 = vtanh.f32 %v728_v4  ;;  %v731_v8 = vadd.f32 %v730_v54, %v610_v5  ;;  %v1141_v9 = vpop.f32.mrb[4].mxu0 }
 0x102   : > { %v1142_v11 = vpop.f32.mrb[5].mxu0 }
 0x103   : > { %1337 = vtanh.f32 %v731_v8  ;;  %v1143_v13 = vadd.f32 %v1142_v11, %v1141_v9  ;;  %v1144_v14 = vpop.f32.mrb[6].mxu0 }
 0x104   : > { %v1145_v15 = vpop.f32.mrb[7].mxu0 }
 0x105   : > { %v615_v16 = vadd.f32 %v1143_v13, %v1550_v61  ;;  %v1146_v17 = vadd.f32 %v1145_v15, %v1144_v14  ;;  %v759_v38 = vpop.f32.mrb[16].mxu1 }
 0x106   : > { %v1236_v39 = vpop.f32.mrb[17].mxu1 }
 0x107   : > { %v736_v18 = vadd.f32 %v735_v56, %v615_v16  ;;  %v618_v19 = vadd.f32 %v1146_v17, %v1550_v61  ;;  %v762_v42 = vpop.f32.mrb[18].mxu1 }
 0x108   : > { %v1237_v44 = vpop.f32.mrb[19].mxu1 }
 0x109   : > { %1339 = vtanh.f32 %v736_v18  ;;  %v739_v22 = vadd.f32 %v738_v59, %v618_v19  ;;  %v1147_v23 = vpop.f32.mrb[8].mxu0 }
 0x10a   : > { %v1148_v25 = vpop.f32.mrb[9].mxu0 }
 0x10b   : > { %v1336_v27 = vpop.eup %1335  ;;  %1341 = vtanh.f32 %v739_v22  ;;  %v1149_v28 = vadd.f32 %v1148_v25, %v1147_v23  ;;  %v1150_v29 = vpop.f32.mrb[10].mxu0 }
 0x10c   : > { %v1097_v30 = vpack.c.bf16 %v1336_v27, %v1336_v27  ;;  %v1151_v31 = vpop.f32.mrb[11].mxu0 }
 0x10d   : > { %v1338_v32 = vpop.eup %1337  ;;  %v623_v33 = vadd.f32 %v1149_v28, %v1550_v61  ;;  %v1152_v34 = vadd.f32 %v1151_v31, %v1150_v29  ;;  %v767_v56 = vpop.f32.mrb[20].mxu1 }
 0x10e   : > { %925 = vst.msk [vmem:[%s1560_s8] sm:$0xf] %vm924_vm2, %v1097_v30  ;;  %v1098_v35 = vpack.c.bf16 %v1338_v32, %v1338_v32  ;;  %v1240_v57 = vpop.f32.mrb[21].mxu1 }
 0x10f   : > { %v744_v36 = vadd.f32 %v743_v6, %v623_v33  ;;  %v626_v37 = vadd.f32 %v1152_v34, %v1550_v61  ;;  %v770_v60 = vpop.f32.mrb[22].mxu1 }
 0x110   : > { %926 = vst.msk [vmem:[%s1560_s8 + $0x4] sm:$0xf] %vm924_vm2, %v1098_v35  ;;  %v1241_v63 = vpop.f32.mrb[23].mxu1 }
 0x111   : > { %1343 = vtanh.f32 %v744_v36  ;;  %v747_v40 = vadd.f32 %v746_v10, %v626_v37  ;;  %v1153_v41 = vpop.f32.mrb[12].mxu0 }
 0x112   : > { %v1154_v43 = vpop.f32.mrb[13].mxu0 }
 0x113   : > { %v1340_v45 = vpop.eup %1339  ;;  %1345 = vtanh.f32 %v747_v40  ;;  %v1155_v46 = vadd.f32 %v1154_v43, %v1153_v41  ;;  %v1156_v47 = vpop.f32.mrb[14].mxu0 }
 0x114   : > { %v1099_v48 = vpack.c.bf16 %v1340_v45, %v1340_v45  ;;  %v1157_v49 = vpop.f32.mrb[15].mxu0 }
 0x115   : > { %v1342_v50 = vpop.eup %1341  ;;  %v631_v51 = vadd.f32 %v1155_v46, %v1550_v61  ;;  %v1158_v52 = vadd.f32 %v1157_v49, %v1156_v47  ;;  %v775_v11 = vpop.f32.mrb[24].mxu1 }
 0x116   : > { %927 = vst.msk [vmem:[%s1560_s8 + $0x8] sm:$0xf] %vm924_vm2, %v1099_v48  ;;  %v1100_v53 = vpack.c.bf16 %v1342_v50, %v1342_v50  ;;  %v1244_v12 = vpop.f32.mrb[25].mxu1 }
 0x117   : > { %v752_v54 = vadd.f32 %v751_v20, %v631_v51  ;;  %v634_v55 = vadd.f32 %v1158_v52, %v1550_v61  ;;  %v778_v15 = vpop.f32.mrb[26].mxu1 }
 0x118   : > { %928 = vst.msk [vmem:[%s1560_s8 + $0xc] sm:$0xf] %vm924_vm2, %v1100_v53  ;;  %v1245_v17 = vpop.f32.mrb[27].mxu1 }
 0x119   : > { %1347 = vtanh.f32 %v752_v54  ;;  %v755_v58 = vadd.f32 %v754_v24, %v634_v55  ;;  %v1159_v59 = vpop.f32.mrb[16].mxu0 }
 0x11a   : > { %v1160_v62 = vpop.f32.mrb[17].mxu0 }
 0x11b   : > { %v1344_v0 = vpop.eup %1343  ;;  %1349 = vtanh.f32 %v755_v58  ;;  %v1161_v1 = vadd.f32 %v1160_v62, %v1159_v59  ;;  %v1162_v2 = vpop.f32.mrb[18].mxu0 }
 0x11c   : > { %v1101_v3 = vpack.c.bf16 %v1344_v0, %v1344_v0  ;;  %v1163_v4 = vpop.f32.mrb[19].mxu0 }
 0x11d   : > { %v1346_v5 = vpop.eup %1345  ;;  %v639_v6 = vadd.f32 %v1161_v1, %v1550_v61  ;;  %v1164_v7 = vadd.f32 %v1163_v4, %v1162_v2  ;;  %v783_v29 = vpop.f32.mrb[28].mxu1 }
 0x11e   : > { %929 = vst.msk [vmem:[%s1560_s8 + $0x10] sm:$0xf] %vm924_vm2, %v1101_v3  ;;  %v1102_v8 = vpack.c.bf16 %v1346_v5, %v1346_v5  ;;  %v1248_v30 = vpop.f32.mrb[29].mxu1 }
 0x11f   : > { %v760_v9 = vadd.f32 %v759_v38, %v639_v6  ;;  %v642_v10 = vadd.f32 %v1164_v7, %v1550_v61  ;;  %v786_v33 = vpop.f32.mrb[30].mxu1 }
 0x120   : > { %930 = vst.msk [vmem:[%s1560_s8 + $0x14] sm:$0xf] %vm924_vm2, %v1102_v8  ;;  %v1249_v35 = vpop.f32.mrb[31].mxu1 }
 0x121   : > { %1351 = vtanh.f32 %v760_v9  ;;  %v763_v13 = vadd.f32 %v762_v42, %v642_v10  ;;  %v1165_v14 = vpop.f32.mrb[20].mxu0 }
 0x122   : > { %v1166_v16 = vpop.f32.mrb[21].mxu0 }
 0x123   : > { %v1348_v18 = vpop.eup %1347  ;;  %1353 = vtanh.f32 %v763_v13  ;;  %v1167_v19 = vadd.f32 %v1166_v16, %v1165_v14  ;;  %v1168_v20 = vpop.f32.mrb[22].mxu0 }
 0x124   : > { %v1103_v21 = vpack.c.bf16 %v1348_v18, %v1348_v18  ;;  %v1169_v22 = vpop.f32.mrb[23].mxu0 }
 0x125   : > { %v1350_v23 = vpop.eup %1349  ;;  %v647_v24 = vadd.f32 %v1167_v19, %v1550_v61  ;;  %v1170_v25 = vadd.f32 %v1169_v22, %v1168_v20  ;;  %v791_v47 = vpop.f32.mrb[32].mxu1 }
 0x126   : > { %931 = vst.msk [vmem:[%s1560_s8 + $0x18] sm:$0xf] %vm924_vm2, %v1103_v21  ;;  %v1104_v26 = vpack.c.bf16 %v1350_v23, %v1350_v23  ;;  %v1252_v48 = vpop.f32.mrb[33].mxu1 }
 0x127   : > { %v768_v27 = vadd.f32 %v767_v56, %v647_v24  ;;  %v650_v28 = vadd.f32 %v1170_v25, %v1550_v61  ;;  %v794_v51 = vpop.f32.mrb[34].mxu1 }
 0x128   : > { %932 = vst.msk [vmem:[%s1560_s8 + $0x1c] sm:$0xf] %vm924_vm2, %v1104_v26  ;;  %v1253_v53 = vpop.f32.mrb[35].mxu1 }
 0x129   : > { %1355 = vtanh.f32 %v768_v27  ;;  %v771_v31 = vadd.f32 %v770_v60, %v650_v28  ;;  %v1171_v32 = vpop.f32.mrb[24].mxu0 }
 0x12a   : > { %v1172_v34 = vpop.f32.mrb[25].mxu0 }
 0x12b   : > { %v1352_v36 = vpop.eup %1351  ;;  %1357 = vtanh.f32 %v771_v31  ;;  %v1173_v37 = vadd.f32 %v1172_v34, %v1171_v32  ;;  %v1174_v38 = vpop.f32.mrb[26].mxu0 }
 0x12c   : > { %v1105_v39 = vpack.c.bf16 %v1352_v36, %v1352_v36  ;;  %v1175_v40 = vpop.f32.mrb[27].mxu0 }
 0x12d   : > { %v1354_v41 = vpop.eup %1353  ;;  %v655_v42 = vadd.f32 %v1173_v37, %v1550_v61  ;;  %v1176_v43 = vadd.f32 %v1175_v40, %v1174_v38  ;;  %v799_v2 = vpop.f32.mrb[36].mxu1 }
 0x12e   : > { %933 = vst.msk [vmem:[%s1560_s8 + $0x20] sm:$0xf] %vm924_vm2, %v1105_v39  ;;  %v1106_v44 = vpack.c.bf16 %v1354_v41, %v1354_v41  ;;  %v1256_v3 = vpop.f32.mrb[37].mxu1 }
 0x12f   : > { %v776_v45 = vadd.f32 %v775_v11, %v655_v42  ;;  %v658_v46 = vadd.f32 %v1176_v43, %v1550_v61  ;;  %v802_v6 = vpop.f32.mrb[38].mxu1 }
 0x130   : > { %934 = vst.msk [vmem:[%s1560_s8 + $0x24] sm:$0xf] %vm924_vm2, %v1106_v44  ;;  %v1257_v8 = vpop.f32.mrb[39].mxu1 }
 0x131   : > { %1359 = vtanh.f32 %v776_v45  ;;  %v779_v49 = vadd.f32 %v778_v15, %v658_v46  ;;  %v1177_v50 = vpop.f32.mrb[28].mxu0 }
 0x132   : > { %v1178_v52 = vpop.f32.mrb[29].mxu0 }
 0x133   : > { %v1356_v54 = vpop.eup %1355  ;;  %1361 = vtanh.f32 %v779_v49  ;;  %v1179_v55 = vadd.f32 %v1178_v52, %v1177_v50  ;;  %v1180_v56 = vpop.f32.mrb[30].mxu0 }
 0x134   : > { %v1107_v57 = vpack.c.bf16 %v1356_v54, %v1356_v54  ;;  %v1181_v58 = vpop.f32.mrb[31].mxu0 }
 0x135   : > { %v1358_v59 = vpop.eup %1357  ;;  %v663_v60 = vadd.f32 %v1179_v55, %v1550_v61  ;;  %v1182_v62 = vadd.f32 %v1181_v58, %v1180_v56  ;;  %v807_v20 = vpop.f32.mrb[40].mxu1 }
 0x136   : > { %935 = vst.msk [vmem:[%s1560_s8 + $0x28] sm:$0xf] %vm924_vm2, %v1107_v57  ;;  %v1108_v63 = vpack.c.bf16 %v1358_v59, %v1358_v59  ;;  %v1260_v21 = vpop.f32.mrb[41].mxu1 }
 0x137   : > { %v784_v0 = vadd.f32 %v783_v29, %v663_v60  ;;  %v666_v1 = vadd.f32 %v1182_v62, %v1550_v61  ;;  %v810_v24 = vpop.f32.mrb[42].mxu1 }
 0x138   : > { %936 = vst.msk [vmem:[%s1560_s8 + $0x2c] sm:$0xf] %vm924_vm2, %v1108_v63  ;;  %v1261_v26 = vpop.f32.mrb[43].mxu1 }
 0x139   : > { %1363 = vtanh.f32 %v784_v0  ;;  %v787_v4 = vadd.f32 %v786_v33, %v666_v1  ;;  %v1183_v5 = vpop.f32.mrb[32].mxu0 }
 0x13a   : > { %v1184_v7 = vpop.f32.mrb[33].mxu0 }
 0x13b   : > { %v1360_v9 = vpop.eup %1359  ;;  %1365 = vtanh.f32 %v787_v4  ;;  %v1185_v10 = vadd.f32 %v1184_v7, %v1183_v5  ;;  %v1186_v11 = vpop.f32.mrb[34].mxu0 }
 0x13c   : > { %v1109_v12 = vpack.c.bf16 %v1360_v9, %v1360_v9  ;;  %v1187_v13 = vpop.f32.mrb[35].mxu0 }
 0x13d   : > { %v1362_v14 = vpop.eup %1361  ;;  %v671_v15 = vadd.f32 %v1185_v10, %v1550_v61  ;;  %v1188_v16 = vadd.f32 %v1187_v13, %v1186_v11 }
 0x13e   : > { %937 = vst.msk [vmem:[%s1560_s8 + $0x30] sm:$0xf] %vm924_vm2, %v1109_v12  ;;  %v1110_v17 = vpack.c.bf16 %v1362_v14, %v1362_v14 }
 0x13f   : > { %v792_v18 = vadd.f32 %v791_v47, %v671_v15  ;;  %v674_v19 = vadd.f32 %v1188_v16, %v1550_v61 }
 0x140   : > { %938 = vst.msk [vmem:[%s1560_s8 + $0x34] sm:$0xf] %vm924_vm2, %v1110_v17 }
 0x141   : > { %1367 = vtanh.f32 %v792_v18  ;;  %v795_v22 = vadd.f32 %v794_v51, %v674_v19  ;;  %v1189_v23 = vpop.f32.mrb[36].mxu0 }
 0x142   : > { %v1190_v25 = vpop.f32.mrb[37].mxu0 }
 0x143   : > { %v1364_v27 = vpop.eup %1363  ;;  %1369 = vtanh.f32 %v795_v22  ;;  %v1191_v28 = vadd.f32 %v1190_v25, %v1189_v23  ;;  %v1192_v29 = vpop.f32.mrb[38].mxu0 }
 0x144   : > { %v1111_v30 = vpack.c.bf16 %v1364_v27, %v1364_v27  ;;  %v1193_v31 = vpop.f32.mrb[39].mxu0 }
 0x145   : > { %v1366_v32 = vpop.eup %1365  ;;  %v679_v33 = vadd.f32 %v1191_v28, %v1550_v61  ;;  %v1194_v34 = vadd.f32 %v1193_v31, %v1192_v29 }
 0x146   : > { %939 = vst.msk [vmem:[%s1560_s8 + $0x38] sm:$0xf] %vm924_vm2, %v1111_v30  ;;  %v1112_v35 = vpack.c.bf16 %v1366_v32, %v1366_v32 }
 0x147   : > { %v800_v36 = vadd.f32 %v799_v2, %v679_v33  ;;  %v682_v37 = vadd.f32 %v1194_v34, %v1550_v61 }
 0x148   : > { %940 = vst.msk [vmem:[%s1560_s8 + $0x3c] sm:$0xf] %vm924_vm2, %v1112_v35 }
 0x149   : > { %1371 = vtanh.f32 %v800_v36  ;;  %v803_v38 = vadd.f32 %v802_v6, %v682_v37  ;;  %v1195_v39 = vpop.f32.mrb[40].mxu0 }
 0x14a   : > { %v1196_v40 = vpop.f32.mrb[41].mxu0 }
 0x14b   : > { %v1368_v41 = vpop.eup %1367  ;;  %1373 = vtanh.f32 %v803_v38  ;;  %v1197_v42 = vadd.f32 %v1196_v40, %v1195_v39  ;;  %v1198_v43 = vpop.f32.mrb[42].mxu0 }
 0x14c   : > { %v1113_v44 = vpack.c.bf16 %v1368_v41, %v1368_v41  ;;  %v1199_v45 = vpop.f32.mrb[43].mxu0 }
 0x14d   : > { %v1370_v46 = vpop.eup %1369  ;;  %v687_v47 = vadd.f32 %v1197_v42, %v1550_v61  ;;  %v1200_v48 = vadd.f32 %v1199_v45, %v1198_v43 }
 0x14e   : > { %941 = vst.msk [vmem:[%s1560_s8 + $0x40] sm:$0xf] %vm924_vm2, %v1113_v44  ;;  %v1114_v49 = vpack.c.bf16 %v1370_v46, %v1370_v46 }
 0x14f   : > { %v808_v50 = vadd.f32 %v807_v20, %v687_v47  ;;  %v690_v51 = vadd.f32 %v1200_v48, %v1550_v61 }
 0x150   : > { %942 = vst.msk [vmem:[%s1560_s8 + $0x44] sm:$0xf] %vm924_vm2, %v1114_v49 }
 0x151   : > { %1375 = vtanh.f32 %v808_v50  ;;  %v811_v52 = vadd.f32 %v810_v24, %v690_v51 }
 0x153   : > { %v1372_v53 = vpop.eup %1371  ;;  %1377 = vtanh.f32 %v811_v52 }
 0x154   : > { %v1115_v54 = vpack.c.bf16 %v1372_v53, %v1372_v53 }
 0x155   : > { %v1374_v55 = vpop.eup %1373 }
 0x156   : > { %943 = vst.msk [vmem:[%s1560_s8 + $0x48] sm:$0xf] %vm924_vm2, %v1115_v54  ;;  %v1116_v56 = vpack.c.bf16 %v1374_v55, %v1374_v55 }
 0x158   : > { %944 = vst.msk [vmem:[%s1560_s8 + $0x4c] sm:$0xf] %vm924_vm2, %v1116_v56 }
 0x15b   : > { %v1376_v57 = vpop.eup %1375 }
 0x15c   : > { %v1117_v58 = vpack.c.bf16 %v1376_v57, %v1376_v57 }
 0x15d   : > { %v1378_v59 = vpop.eup %1377 }
 0x15e   : > { %945 = vst.msk [vmem:[%s1560_s8 + $0x50] sm:$0xf] %vm924_vm2, %v1117_v58  ;;  %v1118_v61 = vpack.c.bf16 %v1378_v59, %v1378_v59 }
 0x160   : > { %946 = vst.msk [vmem:[%s1560_s8 + $0x54] sm:$0xf] %vm924_vm2, %v1118_v61 }
 0x161 PF: > { %s13_s12 = sadd.s32 1, %s1385_s12  }
 0x162   : > { %p10_p4 = scmp.ge.s32.totalorder %s13_s12, 4  }
 0x164   :  { %12 = sbr.rel (!%p10_p4) target bundleno = 1 (0x1), region = 62 }

// kernel: _lambda_.11
= control target key start
LH: loop header
LB: loop body
LE: loop exit
PB: predicated region body
PF: predicated region fallthrough
CT: control target
= control target key end

     0   :  { %s1651_s12 = smov 0   ;;  %s1914_s0 = inlined_call_operand.vmem [shape: bf16[256,576], index: 0, kind: input, shape index: {}]   ;;  %s1915_s1 = inlined_call_operand.vmem [shape: bf16[576,64], index: 1, kind: input, shape index: {}]   ;;  %s1916_s2 = inlined_call_operand.vmem [shape: f32[1,64], index: 2, kind: input, shape index: {}]   ;;  %s1917_s3 = inlined_call_operand.vmem [shape: bf16[256,64], index: 3, kind: output, shape index: {}]  }
   0x1 LB: > { %s1190_s13 = sadd.s32 4294967295, %s1629_s12   ;;  %p1194_p0 = scmp.ge.s32.totalorder %s1629_s12, 1  ;;  %s1629_s12 = sphi %s1651_s12, %s13_s12  }
   0x2   : > { %p139_p1 = scmp.lt.s32.totalorder %s1629_s12, 3 }
   0x4   : > { %p140_p2 = pnand %p1194_p0, %p139_p1 }
   0x5   : > { %v1499_v0 = vld [vmem:[%s1915_s1 + $0x40] sm:$0xff] (!%p140_p2)   ;;  %v1503_v4 = vld [vmem:[%s1915_s1 + $0x48] sm:$0xff] (!%p140_p2)   ;;  %v1507_v8 = vld [vmem:[%s1915_s1 + $0x50] sm:$0xff] (!%p140_p2)   ;;  %s1195_s19 = sshll.u32 (!%p140_p2), %s1190_s13, 4  ;;  %vm721_vm0 = vcmask (!%p140_p2), 523264   ;;  %vm1117_vm1 = vcmask (!%p140_p2), 519168  }
   0x6   : > { %143 = sbr.rel (%p140_p2) target bundleno = 346 (0x15a), region = 32  ;;  %v1500_v1 = vld [vmem:[%s1915_s1 + $0xc0] sm:$0xff] (!%p140_p2)   ;;  %1318 = vmatprep.subr.bf16.mxu0 (!%p140_p2), %v1499_v0  ;;  %v1504_v5 = vld [vmem:[%s1915_s1 + $0xc8] sm:$0xff] (!%p140_p2)   ;;  %v1508_v9 = vld [vmem:[%s1915_s1 + $0xd0] sm:$0xff] (!%p140_p2)   ;;  %p165_p3 = scmp.lt.s32.totalorder (!%p140_p2), %s1195_s19, 31 }
   0x7   : > { %v1501_v2 = vld [vmem:[%s1915_s1] sm:$0xff] (!%p140_p2)   ;;  %1382 = vmatprep.subr.bf16.mxu1 (!%p140_p2), %v1500_v1  ;;  %v1505_v6 = vld [vmem:[%s1915_s1 + $0x8] sm:$0xff] (!%p140_p2)   ;;  %v1509_v10 = vld [vmem:[%s1915_s1 + $0x10] sm:$0xff] (!%p140_p2)  }
   0x8   : > { %v1502_v3 = vld [vmem:[%s1915_s1 + $0x80] sm:$0xff] (!%p140_p2)   ;;  %1319 = vmatpush3.bf16.msra.mxu0 (!%p140_p2), %v1501_v2  ;;  %v1506_v7 = vld [vmem:[%s1915_s1 + $0x88] sm:$0xff] (!%p140_p2)   ;;  %v1510_v11 = vld [vmem:[%s1915_s1 + $0x90] sm:$0xff] (!%p140_p2)  }
   0x9   : > { %1383 = vmatpush3.bf16.msra.mxu1 (!%p140_p2), %v1502_v3  ;;  %1320 = vmatprep.subr.bf16.mxu0 (!%p140_p2), %v1503_v4  ;;  %v1511_v12 = vld [vmem:[%s1915_s1 + $0x58] sm:$0xff] (!%p140_p2)   ;;  %v1515_v16 = vld [vmem:[%s1915_s1 + $0x60] sm:$0xff] (!%p140_p2)   ;;  %v1519_v20 = vld [vmem:[%s1915_s1 + $0x68] sm:$0xff] (!%p140_p2)  }
   0xa   : > { %1384 = vmatprep.subr.bf16.mxu1 (!%p140_p2), %v1504_v5  ;;  %v1512_v13 = vld [vmem:[%s1915_s1 + $0xd8] sm:$0xff] (!%p140_p2)   ;;  %v1516_v17 = vld [vmem:[%s1915_s1 + $0xe0] sm:$0xff] (!%p140_p2)   ;;  %v1520_v21 = vld [vmem:[%s1915_s1 + $0xe8] sm:$0xff] (!%p140_p2)  }
   0xb   : > { %v1513_v14 = vld [vmem:[%s1915_s1 + $0x18] sm:$0xff] (!%p140_p2)   ;;  %v1517_v18 = vld [vmem:[%s1915_s1 + $0x20] sm:$0xff] (!%p140_p2)   ;;  %v1521_v22 = vld [vmem:[%s1915_s1 + $0x28] sm:$0xff] (!%p140_p2)  }
   0xc   : > { %1321 = vmatpush3.bf16.msra.mxu0 (!%p140_p2), %v1505_v6  ;;  %v1514_v15 = vld [vmem:[%s1915_s1 + $0x98] sm:$0xff] (!%p140_p2)   ;;  %v1518_v19 = vld [vmem:[%s1915_s1 + $0xa0] sm:$0xff] (!%p140_p2)   ;;  %v1522_v23 = vld [vmem:[%s1915_s1 + $0xa8] sm:$0xff] (!%p140_p2)  }
   0xd   : > { %1385 = vmatpush3.bf16.msra.mxu1 %v1506_v7  ;;  %1322 = vmatprep.subr.bf16.mxu0 %v1507_v8  ;;  %s1919_s19 = smov (!%p165_p3, %s1195_s19), 31  ;;  %v1523_v24 = vld [vmem:[%s1915_s1 + $0x70] sm:$0xff]   ;;  %v1527_v28 = vld [vmem:[%s1915_s1 + $0x78] sm:$0xff]   ;;  %v1537_v36 = vld [vmem:[%s1915_s1 + $0x100] sm:$0xff]  }
   0xe   : > { %1386 = vmatprep.subr.bf16.mxu1 %v1508_v9  ;;  %v1524_v25 = vld [vmem:[%s1915_s1 + $0xf0] sm:$0xff]   ;;  %s1490_s16 = smul.u32 20, %s1919_s19  ;;  %v1528_v29 = vld [vmem:[%s1915_s1 + $0xf8] sm:$0xff]   ;;  %v1550_v42 = vld [vmem:[%s1915_s1 + $0x108] sm:$0xff]   ;;  %s1198_s17 = sshll.u32 %s1919_s19, 2 }
   0xf   : > { %v1525_v26 = vld [vmem:[%s1915_s1 + $0x30] sm:$0xff]   ;;  %v1529_v30 = vld [vmem:[%s1915_s1 + $0x38] sm:$0xff]   ;;  %s1877_s20 = scalar_lea.vmem %s1917_s3, %s1198_s17 }
  0x10   : > { %1323 = vmatpush3.bf16.msra.mxu0 %v1509_v10  ;;  %v1526_v27 = vld [vmem:[%s1915_s1 + $0xb0] sm:$0xff]   ;;  %s1757_s13 = scalar_lea.vmem %s1914_s0, %s1490_s16  ;;  %v1530_v31 = vld [vmem:[%s1915_s1 + $0xb8] sm:$0xff]  }
  0x11   : > { %1387 = vmatpush3.bf16.msra.mxu1 %v1510_v11  ;;  %1324 = vmatprep.subr.bf16.mxu0 %v1511_v12  ;;  %v1531_v32 = vld [vmem:[%s1757_s13] ss:$20 sps:$4 sm:$0xff]   ;;  %v1533_v33 = vld [vmem:[%s1757_s13 + $0x4] ss:$20 sps:$4 sm:$0xff]   ;;  %v1534_v34 = vld [vmem:[%s1757_s13 + $0x8] ss:$20 sps:$4 sm:$0xff]  }
  0x12   : > { %1388 = vmatprep.subr.bf16.mxu1 %v1512_v13  ;;  %v1536_v35 = vld [vmem:[%s1757_s13 + $0xc] ss:$20 sps:$4 sm:$0xff]   ;;  %778 = vmatprep.mubr.bf16.mxu0 %v1533_v33  ;;  %v1540_v38 = vld [vmem:[%s1757_s13 + $0x34] ss:$20 sps:$4 sm:$0xff]   ;;  %v1543_v40 = vld [vmem:[%s1757_s13 + $0x30] ss:$20 sps:$4 sm:$0xff]  }
  0x13   : > { %875 = vmatprep.mubr.bf16.mxu1 %v1536_v35  ;;  %v1538_v37 = vld [vmem:[%s1757_s13 + $0x2c] ss:$20 sps:$4 sm:$0xff]   ;;  %v1542_v39 = vld [vmem:[%s1757_s13 + $0x28] ss:$20 sps:$4 sm:$0xff]   ;;  %v1548_v44 = vld [vmem:[%s1757_s13 + $0x50] ss:$20 sps:$4 sm:$0xff]  }
  0x14   : > { %1325 = vmatpush3.bf16.msra.mxu0 %v1513_v14  ;;  %v1544_v41 = vld [vmem:[%s1757_s13 + $0x54] ss:$20 sps:$4 sm:$0xff]   ;;  %v1546_v43 = vld [vmem:[%s1757_s13 + $0x5c] ss:$20 sps:$4 sm:$0xff]   ;;  %v1549_v45 = vld [vmem:[%s1757_s13 + $0x58] ss:$20 sps:$4 sm:$0xff]  }
  0x15   : > { %1389 = vmatpush3.bf16.msra.mxu1 %v1514_v15  ;;  %1326 = vmatprep.subr.bf16.mxu0 %v1515_v16  ;;  %v1563_v46 = vld [vmem:[%s1915_s1 + $0x110] sm:$0xff]   ;;  %v1553_v48 = vld [vmem:[%s1757_s13 + $0x84] ss:$20 sps:$4 sm:$0xff]   ;;  %v1559_v53 = vld [vmem:[%s1757_s13 + $0xac] ss:$20 sps:$4 sm:$0xff]  }
  0x16   : > { %1390 = vmatprep.subr.bf16.mxu1 %v1516_v17  ;;  %v1551_v47 = vld [vmem:[%s1757_s13 + $0x7c] ss:$20 sps:$4 sm:$0xff]   ;;  %v1555_v50 = vld [vmem:[%s1757_s13 + $0x78] ss:$20 sps:$4 sm:$0xff]   ;;  %v1556_v51 = vld [vmem:[%s1757_s13 + $0x80] ss:$20 sps:$4 sm:$0xff]  }
  0x17   : > { %v1576_v49 = vld [vmem:[%s1915_s1 + $0x118] sm:$0xff]   ;;  %v1561_v54 = vld [vmem:[%s1757_s13 + $0xa0] ss:$20 sps:$4 sm:$0xff]   ;;  %v1569_v59 = vld [vmem:[%s1757_s13 + $0xd0] ss:$20 sps:$4 sm:$0xff]  }
  0x18   : > { %1327 = vmatpush3.bf16.msra.mxu0 %v1517_v18  ;;  %v1557_v52 = vld [vmem:[%s1757_s13 + $0xa4] ss:$20 sps:$4 sm:$0xff]   ;;  %v1562_v55 = vld [vmem:[%s1757_s13 + $0xa8] ss:$20 sps:$4 sm:$0xff]   ;;  %v1564_v56 = vld [vmem:[%s1757_s13 + $0xcc] ss:$20 sps:$4 sm:$0xff]  }
  0x19   : > { %1391 = vmatpush3.bf16.msra.mxu1 %v1518_v19  ;;  %1328 = vmatprep.subr.bf16.mxu0 %v1519_v20  ;;  %v1566_v57 = vld [vmem:[%s1757_s13 + $0xd4] ss:$20 sps:$4 sm:$0xff]   ;;  %v1572_v61 = vld [vmem:[%s1757_s13 + $0xfc] ss:$20 sps:$4 sm:$0xff]   ;;  %v1575_v63 = vld [vmem:[%s1757_s13 + $0xf8] ss:$20 sps:$4 sm:$0xff]  }
  0x1a   : > { %1392 = vmatprep.subr.bf16.mxu1 %v1520_v21  ;;  %v1568_v58 = vld [vmem:[%s1757_s13 + $0xc8] ss:$20 sps:$4 sm:$0xff]   ;;  %v1574_v62 = vld [vmem:[%s1757_s13 + $0xf0] ss:$20 sps:$4 sm:$0xff]   ;;  %v1581_v2 = vld [vmem:[%s1757_s13 + $0x118] ss:$20 sps:$4 sm:$0xff]  }
  0x1b   : > { %v1570_v60 = vld [vmem:[%s1757_s13 + $0xf4] ss:$20 sps:$4 sm:$0xff]   ;;  %v1577_v0 = vld [vmem:[%s1757_s13 + $0x11c] ss:$20 sps:$4 sm:$0xff]   ;;  %v1579_v1 = vld [vmem:[%s1757_s13 + $0x124] ss:$20 sps:$4 sm:$0xff]  }
  0x1c   : > { %1329 = vmatpush3.bf16.msra.mxu0 %v1521_v22  ;;  %v1582_v3 = vld [vmem:[%s1757_s13 + $0x120] ss:$20 sps:$4 sm:$0xff]   ;;  %v1583_v4 = vld [vmem:[%s1757_s13 + $0x10] ss:$20 sps:$4 sm:$0xff]   ;;  %v1585_v6 = vld [vmem:[%s1757_s13 + $0x38] ss:$20 sps:$4 sm:$0xff]  }
  0x1d   : > { %1393 = vmatpush3.bf16.msra.mxu1 %v1522_v23  ;;  %1330 = vmatprep.subr.bf16.mxu0 %v1523_v24  ;;  %v1584_v5 = vld [vmem:[%s1757_s13 + $0xb0] ss:$20 sps:$4 sm:$0xff]   ;;  %v1586_v7 = vld [vmem:[%s1757_s13 + $0xd8] ss:$20 sps:$4 sm:$0xff]   ;;  %v1587_v8 = vld [vmem:[%s1757_s13 + $0x60] ss:$20 sps:$4 sm:$0xff]  }
  0x1e   : > { %1394 = vmatprep.subr.bf16.mxu1 %v1524_v25  ;;  %v1588_v9 = vld [vmem:[%s1757_s13 + $0x100] ss:$20 sps:$4 sm:$0xff]   ;;  %v1589_v10 = vld [vmem:[%s1757_s13 + $0x88] ss:$20 sps:$4 sm:$0xff]  }
  0x1f   : > { %v1590_v11 = vld [vmem:[%s1757_s13 + $0x128] ss:$20 sps:$4 sm:$0xff]   ;;  %v1828_v14 = vld [vmem:[%s1916_s2] ss:$0 sm:$0xff] }
  0x20   : > { %1331 = vmatpush3.bf16.msra.mxu0 %v1525_v26 }
  0x21   : > { %1395 = vmatpush3.bf16.msra.mxu1 %v1526_v27  ;;  %1332 = vmatprep.subr.bf16.mxu0 %v1527_v28 }
  0x22   : > { %1396 = vmatprep.subr.bf16.mxu1 %v1528_v29 }
  0x24   : > { %1333 = vmatpush3.bf16.msra.mxu0 %v1529_v30 }
  0x25   : > { %1397 = vmatpush3.bf16.msra.mxu1 %v1530_v31  ;;  %1458 = vmatprep.subr.bf16.mxu0 %v1537_v36 }
  0x26   : > { %1482 = vmatprep.subr.bf16.mxu1 %v1537_v36 }
  0x27   : > { %779 = vmatmul.mubr.bf16.vlgmr.msra.gmra.mrb[0].mxu0 %v1531_v32 }
  0x28   : > { %876 = vmatmul.mubr.bf16.vlgmr.msra.gmra.mrb[0].mxu1 %v1534_v34  ;;  %1459 = vmatpush3.bf16.msra.mxu0 %v1537_v36 }
  0x29   : > { %1486 = vmatpush3.bf16.msra.mxu1 %v1537_v36  ;;  %786 = vmatprep.mubr.bf16.mxu0 %v1538_v37 }
  0x2a   : > { %883 = vmatprep.mubr.bf16.mxu1 %v1540_v38  ;;  %1460 = vmatprep.subr.bf16.mxu0 %v1550_v42 }
  0x2b   : > { %1483 = vmatprep.subr.bf16.mxu1 %v1550_v42 }
  0x2c   : > { %1461 = vmatpush3.bf16.msra.mxu0 %v1550_v42 }
  0x2d   : > { %1487 = vmatpush3.bf16.msra.mxu1 %v1550_v42  ;;  %1462 = vmatprep.subr.bf16.mxu0 %v1563_v46 }
  0x2e   : > { %1484 = vmatprep.subr.bf16.mxu1 %v1563_v46 }
  0x2f   : > { %787 = vmatmul.mubr.bf16.gmra.mrb[4].mxu0 %v1542_v39 }
  0x30   : > { %884 = vmatmul.mubr.bf16.gmra.mrb[4].mxu1 %v1543_v40  ;;  %794 = vmatprep.mubr.bf16.mxu0 %v1544_v41 }
  0x31   : > { %891 = vmatprep.mubr.bf16.mxu1 %v1546_v43  ;;  %1463 = vmatpush3.bf16.msra.mxu0 %v1563_v46 }
  0x32   : > { %1488 = vmatpush3.bf16.msra.mxu1 %v1563_v46  ;;  %1464 = vmatprep.subr.bf16.mxu0 %v1576_v49 }
  0x33   : > { %1485 = vmatprep.subr.bf16.mxu1 %v1576_v49 }
  0x35   : > { %1465 = vmatpush3.bf16.msra.mxu0 %v1576_v49 }
  0x36   : > { %1489 = vmatpush3.bf16.msra.mxu1 %v1576_v49 }
  0x37   : > { %795 = vmatmul.mubr.bf16.gmra.mrb[8].mxu0 %v1548_v44 }
  0x38   : > { %892 = vmatmul.mubr.bf16.gmra.mrb[8].mxu1 %v1549_v45  ;;  %802 = vmatprep.mubr.bf16.mxu0 %v1551_v47 }
  0x39   : > { %899 = vmatprep.mubr.bf16.mxu1 %v1553_v48 }
  0x3f   : > { %803 = vmatmul.mubr.bf16.gmra.mrb[12].mxu0 %v1555_v50 }
  0x40   : > { %900 = vmatmul.mubr.bf16.gmra.mrb[12].mxu1 %v1556_v51  ;;  %810 = vmatprep.mubr.bf16.mxu0 %v1557_v52 }
  0x41   : > { %907 = vmatprep.mubr.bf16.mxu1 %v1559_v53 }
  0x47   : > { %811 = vmatmul.mubr.bf16.gmra.mrb[16].mxu0 %v1561_v54 }
  0x48   : > { %908 = vmatmul.mubr.bf16.gmra.mrb[16].mxu1 %v1562_v55  ;;  %818 = vmatprep.mubr.bf16.mxu0 %v1564_v56 }
  0x49   : > { %915 = vmatprep.mubr.bf16.mxu1 %v1566_v57 }
  0x4f   : > { %819 = vmatmul.mubr.bf16.gmra.mrb[20].mxu0 %v1568_v58 }
  0x50   : > { %916 = vmatmul.mubr.bf16.gmra.mrb[20].mxu1 %v1569_v59  ;;  %826 = vmatprep.mubr.bf16.mxu0 %v1570_v60 }
  0x51   : > { %923 = vmatprep.mubr.bf16.mxu1 %v1572_v61 }
  0x57   : > { %827 = vmatmul.mubr.bf16.gmra.mrb[24].mxu0 %v1574_v62 }
  0x58   : > { %924 = vmatmul.mubr.bf16.gmra.mrb[24].mxu1 %v1575_v63  ;;  %834 = vmatprep.mubr.bf16.mxu0 %v1577_v0 }
  0x59   : > { %931 = vmatprep.mubr.bf16.mxu1 %v1579_v1 }
  0x5f   : > { %835 = vmatmul.mubr.bf16.gmra.mrb[28].mxu0 %v1581_v2 }
  0x60   : > { %932 = vmatmul.mubr.bf16.gmra.mrb[28].mxu1 %v1582_v3  ;;  %1466 = vmatprep.mubr.msk.bf16.mxu0 %vm721_vm0, %v1583_v4 }
  0x61   : > { %1474 = vmatprep.mubr.msk.bf16.mxu1 %vm721_vm0, %v1584_v5 }
  0x67   : > { %1467 = vmatmul.mubr.msk.bf16.vlgmr.msra.gmra.mrb[32].mxu0 %vm721_vm0, %v1585_v6 }
  0x68   : > { %1475 = vmatmul.mubr.msk.bf16.vlgmr.msra.gmra.mrb[32].mxu1 %vm721_vm0, %v1586_v7  ;;  %1470 = vmatprep.mubr.msk.bf16.mxu0 %vm721_vm0, %v1587_v8 }
  0x69   : > { %1478 = vmatprep.mubr.msk.bf16.mxu1 %vm721_vm0, %v1588_v9 }
  0x6f   : > { %1471 = vmatmul.mubr.msk.bf16.gmra.mrb[36].mxu0 %vm721_vm0, %v1589_v10 }
  0x70   : > { %1479 = vmatmul.mubr.msk.bf16.gmra.mrb[36].mxu1 %vm721_vm0, %v1590_v11 }
  0xfa   : > { %v1334_v12 = vpop.f32.mrb[0].mxu0 }
  0xfb   : > { %v1398_v13 = vpop.f32.mrb[0].mxu1  ;;  %v1335_v15 = vpop.f32.mrb[1].mxu0 }
  0xfc   : > { %v1336_v16 = vadd.f32 %v1335_v15, %v1334_v12  ;;  %v1399_v17 = vpop.f32.mrb[1].mxu1  ;;  %v1337_v18 = vpop.f32.mrb[2].mxu0 }
  0xfd   : > { %v1400_v19 = vadd.f32 %v1399_v17, %v1398_v13  ;;  %v1401_v20 = vpop.f32.mrb[2].mxu1  ;;  %v1338_v21 = vpop.f32.mrb[3].mxu0 }
  0xfe   : > { %v781_v22 = vadd.f32 %v1336_v16, %v1828_v14  ;;  %v1339_v23 = vadd.f32 %v1338_v21, %v1337_v18  ;;  %v1402_v24 = vpop.f32.mrb[3].mxu1 }
  0xff   : > { %v1403_v25 = vadd.f32 %v1402_v24, %v1401_v20 }
 0x100   : > { %v784_v26 = vadd.f32 %v1339_v23, %v1828_v14  ;;  %v1832_v27 = vadd.f32 %v1400_v19, %v781_v22 }
 0x102   : > { %v1340_v28 = vpop.f32.mrb[4].mxu0  ;;  %v1834_v29 = vadd.f32 %v1403_v25, %v784_v26 }
 0x103   : > { %v1404_v30 = vpop.f32.mrb[4].mxu1  ;;  %v1341_v31 = vpop.f32.mrb[5].mxu0 }
 0x104   : > { %v1342_v32 = vadd.f32 %v1341_v31, %v1340_v28  ;;  %v1405_v33 = vpop.f32.mrb[5].mxu1  ;;  %v1343_v34 = vpop.f32.mrb[6].mxu0 }
 0x105   : > { %v1406_v35 = vadd.f32 %v1405_v33, %v1404_v30  ;;  %v1407_v36 = vpop.f32.mrb[6].mxu1  ;;  %v1344_v37 = vpop.f32.mrb[7].mxu0 }
 0x106   : > { %v789_v38 = vadd.f32 %v1342_v32, %v1828_v14  ;;  %v1345_v39 = vadd.f32 %v1344_v37, %v1343_v34  ;;  %v1408_v40 = vpop.f32.mrb[7].mxu1 }
 0x107   : > { %v1409_v41 = vadd.f32 %v1408_v40, %v1407_v36 }
 0x108   : > { %v792_v42 = vadd.f32 %v1345_v39, %v1828_v14  ;;  %v1838_v43 = vadd.f32 %v1406_v35, %v789_v38 }
 0x10a   : > { %v1346_v44 = vpop.f32.mrb[8].mxu0  ;;  %v1840_v45 = vadd.f32 %v1409_v41, %v792_v42 }
 0x10b   : > { %v1410_v46 = vpop.f32.mrb[8].mxu1  ;;  %v1347_v47 = vpop.f32.mrb[9].mxu0 }
 0x10c   : > { %v1348_v48 = vadd.f32 %v1347_v47, %v1346_v44  ;;  %v1411_v49 = vpop.f32.mrb[9].mxu1  ;;  %v1349_v50 = vpop.f32.mrb[10].mxu0 }
 0x10d   : > { %v1412_v51 = vadd.f32 %v1411_v49, %v1410_v46  ;;  %v1413_v52 = vpop.f32.mrb[10].mxu1  ;;  %v1350_v53 = vpop.f32.mrb[11].mxu0 }
 0x10e   : > { %v797_v54 = vadd.f32 %v1348_v48, %v1828_v14  ;;  %v1351_v55 = vadd.f32 %v1350_v53, %v1349_v50  ;;  %v1414_v56 = vpop.f32.mrb[11].mxu1 }
 0x10f   : > { %v1415_v57 = vadd.f32 %v1414_v56, %v1413_v52 }
 0x110   : > { %v800_v58 = vadd.f32 %v1351_v55, %v1828_v14  ;;  %v1844_v59 = vadd.f32 %v1412_v51, %v797_v54 }
 0x112   : > { %v1352_v60 = vpop.f32.mrb[12].mxu0  ;;  %v1846_v61 = vadd.f32 %v1415_v57, %v800_v58 }
 0x113   : > { %v1416_v62 = vpop.f32.mrb[12].mxu1  ;;  %v1353_v63 = vpop.f32.mrb[13].mxu0 }
 0x114   : > { %v1354_v0 = vadd.f32 %v1353_v63, %v1352_v60  ;;  %v1417_v1 = vpop.f32.mrb[13].mxu1  ;;  %v1355_v2 = vpop.f32.mrb[14].mxu0 }
 0x115   : > { %v1418_v3 = vadd.f32 %v1417_v1, %v1416_v62  ;;  %v1419_v4 = vpop.f32.mrb[14].mxu1  ;;  %v1356_v5 = vpop.f32.mrb[15].mxu0 }
 0x116   : > { %v805_v6 = vadd.f32 %v1354_v0, %v1828_v14  ;;  %v1357_v7 = vadd.f32 %v1356_v5, %v1355_v2  ;;  %v1420_v8 = vpop.f32.mrb[15].mxu1 }
 0x117   : > { %v1421_v9 = vadd.f32 %v1420_v8, %v1419_v4 }
 0x118   : > { %v808_v10 = vadd.f32 %v1357_v7, %v1828_v14  ;;  %v1850_v11 = vadd.f32 %v1418_v3, %v805_v6 }
 0x11a   : > { %v1358_v12 = vpop.f32.mrb[16].mxu0  ;;  %v1852_v13 = vadd.f32 %v1421_v9, %v808_v10 }
 0x11b   : > { %v1422_v15 = vpop.f32.mrb[16].mxu1  ;;  %v1359_v16 = vpop.f32.mrb[17].mxu0 }
 0x11c   : > { %v1360_v17 = vadd.f32 %v1359_v16, %v1358_v12  ;;  %v1423_v18 = vpop.f32.mrb[17].mxu1  ;;  %v1361_v19 = vpop.f32.mrb[18].mxu0 }
 0x11d   : > { %v1424_v20 = vadd.f32 %v1423_v18, %v1422_v15  ;;  %v1425_v21 = vpop.f32.mrb[18].mxu1  ;;  %v1362_v22 = vpop.f32.mrb[19].mxu0 }
 0x11e   : > { %v813_v23 = vadd.f32 %v1360_v17, %v1828_v14  ;;  %v1363_v24 = vadd.f32 %v1362_v22, %v1361_v19  ;;  %v1426_v25 = vpop.f32.mrb[19].mxu1 }
 0x11f   : > { %v1427_v26 = vadd.f32 %v1426_v25, %v1425_v21 }
 0x120   : > { %v816_v28 = vadd.f32 %v1363_v24, %v1828_v14  ;;  %v910_v30 = vadd.f32 %v1424_v20, %v813_v23 }
 0x122   : > { %v1364_v31 = vpop.f32.mrb[20].mxu0  ;;  %v1856_v32 = vadd.f32 %v1427_v26, %v816_v28 }
 0x123   : > { %v1428_v33 = vpop.f32.mrb[20].mxu1  ;;  %v1365_v34 = vpop.f32.mrb[21].mxu0 }
 0x124   : > { %v1366_v35 = vadd.f32 %v1365_v34, %v1364_v31  ;;  %v1429_v36 = vpop.f32.mrb[21].mxu1  ;;  %v1367_v37 = vpop.f32.mrb[22].mxu0 }
 0x125   : > { %v1430_v38 = vadd.f32 %v1429_v36, %v1428_v33  ;;  %v1431_v39 = vpop.f32.mrb[22].mxu1  ;;  %v1368_v40 = vpop.f32.mrb[23].mxu0 }
 0x126   : > { %v821_v41 = vadd.f32 %v1366_v35, %v1828_v14  ;;  %v1369_v42 = vadd.f32 %v1368_v40, %v1367_v37  ;;  %v1432_v44 = vpop.f32.mrb[23].mxu1 }
 0x127   : > { %v1433_v46 = vadd.f32 %v1432_v44, %v1431_v39 }
 0x128   : > { %v824_v47 = vadd.f32 %v1369_v42, %v1828_v14  ;;  %v918_v48 = vadd.f32 %v1430_v38, %v821_v41 }
 0x12a   : > { %v1370_v49 = vpop.f32.mrb[24].mxu0  ;;  %v921_v50 = vadd.f32 %v1433_v46, %v824_v47 }
 0x12b   : > { %v1434_v51 = vpop.f32.mrb[24].mxu1  ;;  %v1371_v52 = vpop.f32.mrb[25].mxu0 }
 0x12c   : > { %v1372_v53 = vadd.f32 %v1371_v52, %v1370_v49  ;;  %v1435_v54 = vpop.f32.mrb[25].mxu1  ;;  %v1373_v55 = vpop.f32.mrb[26].mxu0 }
 0x12d   : > { %v1436_v56 = vadd.f32 %v1435_v54, %v1434_v51  ;;  %v1437_v57 = vpop.f32.mrb[26].mxu1  ;;  %v1374_v58 = vpop.f32.mrb[27].mxu0 }
 0x12e   : > { %v829_v60 = vadd.f32 %v1372_v53, %v1828_v14  ;;  %v1375_v62 = vadd.f32 %v1374_v58, %v1373_v55  ;;  %v1438_v63 = vpop.f32.mrb[27].mxu1 }
 0x12f   : > { %v1439_v0 = vadd.f32 %v1438_v63, %v1437_v57 }
 0x130   : > { %v832_v1 = vadd.f32 %v1375_v62, %v1828_v14  ;;  %v926_v2 = vadd.f32 %v1436_v56, %v829_v60 }
 0x132   : > { %v1376_v3 = vpop.f32.mrb[28].mxu0  ;;  %v929_v4 = vadd.f32 %v1439_v0, %v832_v1 }
 0x133   : > { %v1440_v5 = vpop.f32.mrb[28].mxu1  ;;  %v1377_v6 = vpop.f32.mrb[29].mxu0 }
 0x134   : > { %v1378_v7 = vadd.f32 %v1377_v6, %v1376_v3  ;;  %v1441_v8 = vpop.f32.mrb[29].mxu1  ;;  %v1379_v9 = vpop.f32.mrb[30].mxu0 }
 0x135   : > { %v1442_v10 = vadd.f32 %v1441_v8, %v1440_v5  ;;  %v1443_v12 = vpop.f32.mrb[30].mxu1  ;;  %v1380_v15 = vpop.f32.mrb[31].mxu0 }
 0x136   : > { %v837_v16 = vadd.f32 %v1378_v7, %v1828_v14  ;;  %v1381_v17 = vadd.f32 %v1380_v15, %v1379_v9  ;;  %v1444_v18 = vpop.f32.mrb[31].mxu1 }
 0x137   : > { %v1445_v19 = vadd.f32 %v1444_v18, %v1443_v12 }
 0x138   : > { %v840_v20 = vadd.f32 %v1381_v17, %v1828_v14  ;;  %v934_v21 = vadd.f32 %v1442_v10, %v837_v16 }
 0x13a   : > { %v1468_v22 = vpop.f32.mrb[32].mxu0  ;;  %v937_v23 = vadd.f32 %v1445_v19, %v840_v20 }
 0x13b   : > { %v983_v24 = vadd.f32 %v1468_v22, %v1838_v43  ;;  %v1476_v25 = vpop.f32.mrb[32].mxu1  ;;  %v974_v26 = vpop.f32.mrb[33].mxu0 }
 0x13c   : > { %v1015_v28 = vadd.f32 %v1476_v25, %v918_v48  ;;  %v975_v31 = vadd.f32 %v974_v26, %v1832_v27  ;;  %v1006_v33 = vpop.f32.mrb[33].mxu1  ;;  %v1469_v34 = vpop.f32.mrb[34].mxu0 }
 0x13d   : > { %1591 = vtanh.f32 %v983_v24  ;;  %v1007_v35 = vadd.f32 %v1006_v33, %v910_v30  ;;  %v986_v36 = vadd.f32 %v1469_v34, %v1840_v45  ;;  %v1477_v37 = vpop.f32.mrb[34].mxu1  ;;  %v977_v38 = vpop.f32.mrb[35].mxu0 }
 0x13e   : > { %1593 = vtanh.f32 %v1015_v28  ;;  %v1018_v14 = vadd.f32 %v1477_v37, %v921_v50  ;;  %v978_v39 = vadd.f32 %v977_v38, %v1834_v29  ;;  %v1009_v40 = vpop.f32.mrb[35].mxu1 }
 0x13f   : > { %1595 = vtanh.f32 %v975_v31  ;;  %v1010_v43 = vadd.f32 %v1009_v40, %v1856_v32 }
 0x140   : > { %1597 = vtanh.f32 %v1007_v35 }
 0x141   : > { %1599 = vtanh.f32 %v986_v36 }
 0x142   : > { %1601 = vtanh.f32 %v1018_v14  ;;  %v1472_v27 = vpop.f32.mrb[36].mxu0 }
 0x143   : > { %1603 = vtanh.f32 %v978_v39  ;;  %v999_v30 = vadd.f32 %v1472_v27, %v1850_v11  ;;  %v1480_v41 = vpop.f32.mrb[36].mxu1  ;;  %v990_v45 = vpop.f32.mrb[37].mxu0 }
 0x144   : > { %1605 = vtanh.f32 %v1010_v43  ;;  %v1031_v42 = vadd.f32 %v1480_v41, %v934_v21  ;;  %v991_v44 = vadd.f32 %v990_v45, %v1844_v59  ;;  %v1022_v46 = vpop.f32.mrb[37].mxu1  ;;  %v1473_v29 = vpop.f32.mrb[38].mxu0 }
 0x145   : > { %1607 = vtanh.f32 %v999_v30  ;;  %v1023_v47 = vadd.f32 %v1022_v46, %v926_v2  ;;  %v1002_v32 = vadd.f32 %v1473_v29, %v1852_v13  ;;  %v1481_v48 = vpop.f32.mrb[38].mxu1  ;;  %v993_v49 = vpop.f32.mrb[39].mxu0 }
 0x146   : > { %1609 = vtanh.f32 %v1031_v42  ;;  %v1034_v50 = vadd.f32 %v1481_v48, %v937_v23  ;;  %v994_v51 = vadd.f32 %v993_v49, %v1846_v61  ;;  %v1025_v11 = vpop.f32.mrb[39].mxu1 }
 0x147   : > { %v1592_v52 = vpop.eup %1591  ;;  %1611 = vtanh.f32 %v991_v44  ;;  %v1026_v59 = vadd.f32 %v1025_v11, %v929_v4 }
 0x148   : > { %v1594_v13 = vpop.eup %1593  ;;  %v1304_v53 = vpack.c.bf16 %v1592_v52, %v1592_v52  ;;  %1613 = vtanh.f32 %v1023_v47 }
 0x149   : > { %v1596_v54 = vpop.eup %1595  ;;  %v1312_v55 = vpack.c.bf16 %v1594_v13, %v1594_v13  ;;  %1615 = vtanh.f32 %v1002_v32 }
 0x14a   : > { %v1598_v61 = vpop.eup %1597  ;;  %1120 = vst.msk [vmem:[%s1877_s20 + $0x8] sm:$0xf] %vm1117_vm1, %v1304_v53  ;;  %v1302_v56 = vpack.c.bf16 %v1596_v54, %v1596_v54  ;;  %1617 = vtanh.f32 %v1034_v50 }
 0x14b   : > { %v1600_v57 = vpop.eup %1599  ;;  %1128 = vst.msk [vmem:[%s1877_s20 + $0x28] sm:$0xf] %vm1117_vm1, %v1312_v55  ;;  %v1310_v58 = vpack.c.bf16 %v1598_v61, %v1598_v61  ;;  %1619 = vtanh.f32 %v994_v51 }
 0x14c   : > { %v1602_v60 = vpop.eup %1601  ;;  %1118 = vst.msk [vmem:[%s1877_s20] sm:$0xf] %vm1117_vm1, %v1302_v56  ;;  %v1305_v62 = vpack.c.bf16 %v1600_v57, %v1600_v57  ;;  %1621 = vtanh.f32 %v1026_v59 }
 0x14d   : > { %v1604_v63 = vpop.eup %1603  ;;  %1126 = vst.msk [vmem:[%s1877_s20 + $0x20] sm:$0xf] %vm1117_vm1, %v1310_v58  ;;  %v1313_v0 = vpack.c.bf16 %v1602_v60, %v1602_v60 }
 0x14e   : > { %v1606_v1 = vpop.eup %1605  ;;  %1121 = vst.msk [vmem:[%s1877_s20 + $0xc] sm:$0xf] %vm1117_vm1, %v1305_v62  ;;  %v1303_v2 = vpack.c.bf16 %v1604_v63, %v1604_v63 }
 0x14f   : > { %v1608_v3 = vpop.eup %1607  ;;  %1129 = vst.msk [vmem:[%s1877_s20 + $0x2c] sm:$0xf] %vm1117_vm1, %v1313_v0  ;;  %v1311_v4 = vpack.c.bf16 %v1606_v1, %v1606_v1 }
 0x150   : > { %v1610_v5 = vpop.eup %1609  ;;  %1119 = vst.msk [vmem:[%s1877_s20 + $0x4] sm:$0xf] %vm1117_vm1, %v1303_v2  ;;  %v1308_v6 = vpack.c.bf16 %v1608_v3, %v1608_v3 }
 0x151   : > { %v1612_v7 = vpop.eup %1611  ;;  %1127 = vst.msk [vmem:[%s1877_s20 + $0x24] sm:$0xf] %vm1117_vm1, %v1311_v4  ;;  %v1316_v8 = vpack.c.bf16 %v1610_v5, %v1610_v5 }
 0x152   : > { %v1614_v9 = vpop.eup %1613  ;;  %1124 = vst.msk [vmem:[%s1877_s20 + $0x18] sm:$0xf] %vm1117_vm1, %v1308_v6  ;;  %v1306_v10 = vpack.c.bf16 %v1612_v7, %v1612_v7 }
 0x153   : > { %v1616_v12 = vpop.eup %1615  ;;  %1132 = vst.msk [vmem:[%s1877_s20 + $0x38] sm:$0xf] %vm1117_vm1, %v1316_v8  ;;  %v1314_v15 = vpack.c.bf16 %v1614_v9, %v1614_v9 }
 0x154   : > { %v1618_v16 = vpop.eup %1617  ;;  %1122 = vst.msk [vmem:[%s1877_s20 + $0x10] sm:$0xf] %vm1117_vm1, %v1306_v10  ;;  %v1309_v17 = vpack.c.bf16 %v1616_v12, %v1616_v12 }
 0x155   : > { %v1620_v18 = vpop.eup %1619  ;;  %1130 = vst.msk [vmem:[%s1877_s20 + $0x30] sm:$0xf] %vm1117_vm1, %v1314_v15  ;;  %v1317_v19 = vpack.c.bf16 %v1618_v16, %v1618_v16 }
 0x156   : > { %v1622_v20 = vpop.eup %1621  ;;  %1125 = vst.msk [vmem:[%s1877_s20 + $0x1c] sm:$0xf] %vm1117_vm1, %v1309_v17  ;;  %v1307_v21 = vpack.c.bf16 %v1620_v18, %v1620_v18 }
 0x157   : > { %1133 = vst.msk [vmem:[%s1877_s20 + $0x3c] sm:$0xf] %vm1117_vm1, %v1317_v19  ;;  %v1315_v22 = vpack.c.bf16 %v1622_v20, %v1622_v20 }
 0x158   : > { %1123 = vst.msk [vmem:[%s1877_s20 + $0x14] sm:$0xf] %vm1117_vm1, %v1307_v21 }
 0x159   : > { %1131 = vst.msk [vmem:[%s1877_s20 + $0x34] sm:$0xf] %vm1117_vm1, %v1315_v22 }
 0x15a PF: > { %s13_s12 = sadd.s32 1, %s1629_s12  }
 0x15b   : > { %p10_p4 = scmp.ge.s32.totalorder %s13_s12, 4  }
 0x15d   :  { %12 = sbr.rel (!%p10_p4) target bundleno = 1 (0x1), region = 62 }

// kernel: _lambda_.12
= control target key start
LH: loop header
LB: loop body
LE: loop exit
PB: predicated region body
PF: predicated region fallthrough
CT: control target
= control target key end

     0   :  { %s420_s15 = smov 0   ;;  %s446_s0 = inlined_call_operand.vmem [shape: bf16[16,320], index: 0, kind: input, shape index: {}]   ;;  %s447_s1 = inlined_call_operand.vmem [shape: bf16[16,320], index: 1, kind: input, shape index: {}]   ;;  %s448_s2 = inlined_call_operand.vmem [shape: bf16[16,320], index: 2, kind: input, shape index: {}]   ;;  %s449_s3 = inlined_call_operand.vmem [shape: bf16[16,320], index: 3, kind: input, shape index: {}]   ;;  %s450_s4 = inlined_call_operand.vmem [shape: bf16[16,320], index: 4, kind: output, shape index: {}]  }
   0x1 LB: > { %s366_s16 = sadd.s32 4294967295, %s393_s15   ;;  %p370_p0 = scmp.ge.s32.totalorder %s393_s15, 1  ;;  %s393_s15 = sphi %s420_s15, %s14_s15  }
   0x2   : > { %p192_p1 = scmp.lt.s32.totalorder %s393_s15, 3 }
   0x4   : > { %p193_p2 = pnand %p370_p0, %p192_p1 }
   0x5   : > { %p233_p3 = scmp.lt.s32.totalorder (!%p193_p2), %s366_s16, 1  ;;  %vm273_vm0 = vcmask (!%p193_p2), 519168  }
   0x6   : > { %196 = sbr.rel (%p193_p2) target bundleno = 26 (0x1a), region = 36 }
   0xd   : > { %s452_s16 = smov (!%p233_p3, %s366_s16), 1 }
   0xe   : > { %s378_s17 = smul.u32 12, %s452_s16 }
  0x10   : > { %s237_s20 = scalar_lea.vmem %s446_s0, %s378_s17  ;;  %s242_s23 = scalar_lea.vmem %s447_s1, %s378_s17 }
  0x11   : > { %s247_s26 = scalar_lea.vmem %s448_s2, %s378_s17  ;;  %s252_s29 = scalar_lea.vmem %s449_s3, %s378_s17  ;;  %v258_v0 = vld [vmem:[%s237_s20] sm:$0xff]  ;;  %v259_v1 = vld [vmem:[%s237_s20 + $0x8] sm:$0xf] }
  0x12   : > { %v260_v2 = vld [vmem:[%s242_s23] sm:$0xff]  ;;  %v261_v3 = vld [vmem:[%s242_s23 + $0x8] sm:$0xf]  ;;  %s257_s6 = scalar_lea.vmem %s450_s4, %s378_s17 }
  0x13   : > { %v262_v4 = vmax.bf16 %v260_v2, %v258_v0  ;;  %v264_v5 = vld [vmem:[%s247_s26] sm:$0xff]  ;;  %v265_v6 = vld [vmem:[%s247_s26 + $0x8] sm:$0xf]  ;;  %v263_v9 = vmax.bf16 %v261_v3, %v259_v1 }
  0x14   : > { %v266_v7 = vld [vmem:[%s252_s29] sm:$0xff]  ;;  %v267_v8 = vld [vmem:[%s252_s29 + $0x8] sm:$0xf] }
  0x15   : > { %v268_v10 = vmax.bf16 %v266_v7, %v264_v5  ;;  %v269_v11 = vmax.bf16 %v267_v8, %v265_v6 }
  0x17   : > { %v270_v12 = vmax.bf16 %v268_v10, %v262_v4  ;;  %v271_v13 = vmax.bf16 %v269_v11, %v263_v9 }
  0x19   : > { %272 = vst [vmem:[%s257_s6] sm:$0xff] %v270_v12  ;;  %274 = vst.msk [vmem:[%s257_s6 + $0x8] sm:$0xf] %vm273_vm0, %v271_v13 }
  0x1a PF: > { %s14_s15 = sadd.s32 1, %s393_s15  }
  0x1b   : > { %p11_p4 = scmp.ge.s32.totalorder %s14_s15, 4  }
  0x1d   :  { %13 = sbr.rel (!%p11_p4) target bundleno = 1 (0x1), region = 75 }

// kernel: _lambda_.13
= control target key start
LH: loop header
LB: loop body
LE: loop exit
PB: predicated region body
PF: predicated region fallthrough
CT: control target
= control target key end

     0   :  { %s911_s12 = smov 0   ;;  %s1052_s0 = inlined_call_operand.vmem [shape: bf16[32,576], index: 0, kind: input, shape index: {}]   ;;  %s1053_s1 = inlined_call_operand.vmem [shape: bf16[576,128], index: 1, kind: input, shape index: {}]   ;;  %s1054_s2 = inlined_call_operand.vmem [shape: f32[1,128], index: 2, kind: input, shape index: {}]   ;;  %s1055_s3 = inlined_call_operand.vmem [shape: bf16[32,128], index: 3, kind: output, shape index: {}]  }
   0x1 LB: > { %s699_s13 = sadd.s32 4294967295, %s887_s12   ;;  %p703_p0 = scmp.ge.s32.totalorder %s887_s12, 1  ;;  %s887_s12 = sphi %s911_s12, %s13_s12  }
   0x2   : > { %p139_p1 = scmp.lt.s32.totalorder %s887_s12, 3 }
   0x4   : > { %p140_p2 = pnand %p703_p0, %p139_p1 }
   0x5   : > { %v834_v0 = vld [vmem:[%s1053_s1 + $0x40] sm:$0xff] (!%p140_p2)   ;;  %v838_v4 = vld [vmem:[%s1053_s1 + $0x48] sm:$0xff] (!%p140_p2)   ;;  %v842_v8 = vld [vmem:[%s1053_s1 + $0x50] sm:$0xff] (!%p140_p2)   ;;  %s704_s17 = sshll.u32 (!%p140_p2), %s699_s13, 1  ;;  %v889_v33 = vmov (!%p140_p2), 0.0   ;;  %vm890_vm0 = vmmov (!%p140_p2), 0  }
   0x6   : > { %143 = sbr.rel (%p140_p2) target bundleno = 284 (0x11c), region = 32  ;;  %v835_v1 = vld [vmem:[%s1053_s1] sm:$0xff] (!%p140_p2)   ;;  %762 = vmatprep.subr.bf16.mxu0 (!%p140_p2), %v834_v0  ;;  %v839_v5 = vld [vmem:[%s1053_s1 + $0x8] sm:$0xff] (!%p140_p2)   ;;  %v843_v9 = vld [vmem:[%s1053_s1 + $0x10] sm:$0xff] (!%p140_p2)   ;;  %p165_p3 = scmp.lt.s32.totalorder (!%p140_p2), %s704_s17, 3  ;;  %vm504_vm1 = vcmask (!%p140_p2), 523264  }
   0x7   : > { %v836_v2 = vld [vmem:[%s1053_s1 + $0xc0] sm:$0xff] (!%p140_p2)   ;;  %763 = vmatpush3.bf16.msra.mxu0 (!%p140_p2), %v835_v1  ;;  %v840_v6 = vld [vmem:[%s1053_s1 + $0xc8] sm:$0xff] (!%p140_p2)   ;;  %v844_v10 = vld [vmem:[%s1053_s1 + $0xd0] sm:$0xff] (!%p140_p2)  }
   0x8   : > { %v837_v3 = vld [vmem:[%s1053_s1 + $0x80] sm:$0xff] (!%p140_p2)   ;;  %784 = vmatprep.subr.bf16.mxu1 (!%p140_p2), %v836_v2  ;;  %764 = vmatprep.subr.bf16.mxu0 (!%p140_p2), %v838_v4  ;;  %v841_v7 = vld [vmem:[%s1053_s1 + $0x88] sm:$0xff] (!%p140_p2)   ;;  %v845_v11 = vld [vmem:[%s1053_s1 + $0x90] sm:$0xff] (!%p140_p2)  }
   0x9   : > { %785 = vmatpush3.bf16.msra.mxu1 (!%p140_p2), %v837_v3  ;;  %v846_v12 = vld [vmem:[%s1053_s1 + $0x58] sm:$0xff] (!%p140_p2)   ;;  %v850_v16 = vld [vmem:[%s1053_s1 + $0x60] sm:$0xff] (!%p140_p2)   ;;  %v854_v20 = vld [vmem:[%s1053_s1 + $0x68] sm:$0xff] (!%p140_p2)  }
   0xa   : > { %786 = vmatprep.subr.bf16.mxu1 (!%p140_p2), %v840_v6  ;;  %v847_v13 = vld [vmem:[%s1053_s1 + $0x18] sm:$0xff] (!%p140_p2)   ;;  %v851_v17 = vld [vmem:[%s1053_s1 + $0x20] sm:$0xff] (!%p140_p2)   ;;  %v855_v21 = vld [vmem:[%s1053_s1 + $0x28] sm:$0xff] (!%p140_p2)  }
   0xb   : > { %765 = vmatpush3.bf16.msra.mxu0 (!%p140_p2), %v839_v5  ;;  %v848_v14 = vld [vmem:[%s1053_s1 + $0xd8] sm:$0xff] (!%p140_p2)   ;;  %v852_v18 = vld [vmem:[%s1053_s1 + $0xe0] sm:$0xff] (!%p140_p2)   ;;  %v856_v22 = vld [vmem:[%s1053_s1 + $0xe8] sm:$0xff] (!%p140_p2)  }
   0xc   : > { %766 = vmatprep.subr.bf16.mxu0 (!%p140_p2), %v842_v8  ;;  %v849_v15 = vld [vmem:[%s1053_s1 + $0x98] sm:$0xff] (!%p140_p2)   ;;  %v853_v19 = vld [vmem:[%s1053_s1 + $0xa0] sm:$0xff] (!%p140_p2)   ;;  %v857_v23 = vld [vmem:[%s1053_s1 + $0xa8] sm:$0xff] (!%p140_p2)  }
   0xd   : > { %787 = vmatpush3.bf16.msra.mxu1 %v841_v7  ;;  %s1057_s17 = smov (!%p165_p3, %s704_s17), 3  ;;  %v858_v24 = vld [vmem:[%s1053_s1 + $0x70] sm:$0xff]   ;;  %v862_v28 = vld [vmem:[%s1053_s1 + $0x78] sm:$0xff]   ;;  %v872_v37 = vld [vmem:[%s1053_s1 + $0x100] sm:$0xff]  }
   0xe   : > { %788 = vmatprep.subr.bf16.mxu1 %v844_v10  ;;  %s823_s14 = smul.u32 20, %s1057_s17  ;;  %v859_v25 = vld [vmem:[%s1053_s1 + $0x30] sm:$0xff]   ;;  %v863_v29 = vld [vmem:[%s1053_s1 + $0x38] sm:$0xff]   ;;  %v873_v38 = vld [vmem:[%s1053_s1 + $0x108] sm:$0xff]   ;;  %s707_s18 = sshll.u32 %s1057_s17, 2 }
   0xf   : > { %767 = vmatpush3.bf16.msra.mxu0 %v843_v9  ;;  %v860_v26 = vld [vmem:[%s1053_s1 + $0xf0] sm:$0xff]   ;;  %v864_v30 = vld [vmem:[%s1053_s1 + $0xf8] sm:$0xff]   ;;  %v708_v43 = vld [vmem:[%s1054_s2] ss:$0 sm:$0xff]  ;;  %s175_s21 = scalar_lea.vmem %s1055_s3, %s707_s18 }
  0x10   : > { %768 = vmatprep.subr.bf16.mxu0 %v846_v12  ;;  %v861_v27 = vld [vmem:[%s1053_s1 + $0xb0] sm:$0xff]   ;;  %s1014_s13 = scalar_lea.vmem %s1052_s0, %s823_s14  ;;  %v868_v34 = vld [vmem:[%s1053_s1 + $0xb8] sm:$0xff]  }
  0x11   : > { %789 = vmatpush3.bf16.msra.mxu1 %v845_v11  ;;  %v865_v31 = vld [vmem:[%s1014_s13] ss:$20 sps:$4 sm:$0xff]   ;;  %v867_v32 = vld [vmem:[%s1014_s13 + $0x4] ss:$20 sps:$4 sm:$0xff]   ;;  %v869_v35 = vld [vmem:[%s1014_s13 + $0x8] ss:$20 sps:$4 sm:$0xff]  }
  0x12   : > { %790 = vmatprep.subr.bf16.mxu1 %v848_v14  ;;  %540 = vmatprep.mubr.bf16.mxu0 %v867_v32  ;;  %v871_v36 = vld [vmem:[%s1014_s13 + $0xc] ss:$20 sps:$4 sm:$0xff]   ;;  %v874_v39 = vld [vmem:[%s1053_s1 + $0x110] sm:$0xff]   ;;  %v875_v40 = vld [vmem:[%s1053_s1 + $0x118] sm:$0xff]  }
  0x13   : > { %769 = vmatpush3.bf16.msra.mxu0 %v847_v13  ;;  %581 = vmatprep.mubr.bf16.mxu1 %v871_v36  ;;  %v876_v41 = vld [vmem:[%s1014_s13 + $0x10] ss:$20 sps:$4 sm:$0xff]  }
  0x14   : > { %770 = vmatprep.subr.bf16.mxu0 %v850_v16 }
  0x15   : > { %791 = vmatpush3.bf16.msra.mxu1 %v849_v15 }
  0x16   : > { %792 = vmatprep.subr.bf16.mxu1 %v852_v18 }
  0x17   : > { %771 = vmatpush3.bf16.msra.mxu0 %v851_v17 }
  0x18   : > { %772 = vmatprep.subr.bf16.mxu0 %v854_v20 }
  0x19   : > { %793 = vmatpush3.bf16.msra.mxu1 %v853_v19 }
  0x1a   : > { %794 = vmatprep.subr.bf16.mxu1 %v856_v22 }
  0x1b   : > { %773 = vmatpush3.bf16.msra.mxu0 %v855_v21 }
  0x1c   : > { %774 = vmatprep.subr.bf16.mxu0 %v858_v24 }
  0x1d   : > { %795 = vmatpush3.bf16.msra.mxu1 %v857_v23 }
  0x1e   : > { %796 = vmatprep.subr.bf16.mxu1 %v860_v26 }
  0x1f   : > { %775 = vmatpush3.bf16.msra.mxu0 %v859_v25 }
  0x20   : > { %776 = vmatprep.subr.bf16.mxu0 %v862_v28 }
  0x21   : > { %797 = vmatpush3.bf16.msra.mxu1 %v861_v27 }
  0x22   : > { %798 = vmatprep.subr.bf16.mxu1 %v864_v30 }
  0x23   : > { %777 = vmatpush3.bf16.msra.mxu0 %v863_v29 }
  0x24   : > { %811 = vmatprep.subr.bf16.mxu0 %v889_v33 }
  0x25   : > { %799 = vmatpush3.bf16.msra.mxu1 %v868_v34 }
  0x26   : > { %541 = vmatmul.mubr.bf16.vlgmr.msra.gmra.mrb[0].mxu0 %v865_v31 }
  0x27   : > { %819 = vmatprep.mubr.msk.bf16.mxu0 %vm890_vm0, %v889_v33  ;;  %812 = vmatpush3.bf16.msra.mxu0 %v872_v37 }
  0x28   : > { %582 = vmatmul.mubr.bf16.vlgmr.msra.gmra.mrb[0].mxu1 %v869_v35  ;;  %813 = vmatprep.subr.bf16.mxu0 %v889_v33 }
  0x2b   : > { %814 = vmatpush3.bf16.msra.mxu0 %v873_v38 }
  0x2c   : > { %815 = vmatprep.subr.bf16.mxu0 %v889_v33 }
  0x2f   : > { %816 = vmatpush3.bf16.msra.mxu0 %v874_v39 }
  0x30   : > { %817 = vmatprep.subr.bf16.mxu0 %v889_v33 }
  0x33   : > { %818 = vmatpush3.bf16.msra.mxu0 %v875_v40 }
  0x36   : > { %820 = vmatmul.mubr.msk.bf16.vlgmr.msra.gmra.mrb[4].mxu0 %vm504_vm1, %v876_v41 }
  0xf9   : > { %v778_v42 = vpop.f32.mrb[0].mxu0 }
  0xfa   : > { %v779_v44 = vpop.f32.mrb[1].mxu0 }
  0xfb   : > { %v780_v45 = vadd.f32 %v779_v44, %v778_v42  ;;  %v781_v46 = vpop.f32.mrb[2].mxu0  ;;  %v800_v47 = vpop.f32.mrb[0].mxu1 }
  0xfc   : > { %v782_v48 = vpop.f32.mrb[3].mxu0  ;;  %v801_v51 = vpop.f32.mrb[1].mxu1 }
  0xfd   : > { %v543_v49 = vadd.f32 %v780_v45, %v708_v43  ;;  %v783_v50 = vadd.f32 %v782_v48, %v781_v46  ;;  %v802_v52 = vadd.f32 %v801_v51, %v800_v47  ;;  %v803_v53 = vpop.f32.mrb[2].mxu1 }
  0xfe   : > { %v804_v55 = vpop.f32.mrb[3].mxu1 }
  0xff   : > { %v546_v54 = vadd.f32 %v783_v50, %v708_v43  ;;  %v805_v56 = vadd.f32 %v804_v55, %v803_v53  ;;  %v584_v57 = vadd.f32 %v802_v52, %v543_v49 }
 0x101   : > { %v587_v58 = vadd.f32 %v805_v56, %v546_v54 }
 0x109   : > { %v624_v59 = vpop.f32.mrb[4].mxu0 }
 0x10a   : > { %v625_v60 = vadd.f32 %v624_v59, %v584_v57  ;;  %v821_v61 = vpop.f32.mrb[5].mxu0 }
 0x10b   : > { %v627_v62 = vpop.f32.mrb[6].mxu0 }
 0x10c   : > { %v628_v63 = vadd.f32 %v627_v62, %v587_v58  ;;  %v822_v0 = vpop.f32.mrb[7].mxu0  ;;  %877 = vtanh.f32 %v625_v60 }
 0x10e   : > { %879 = vtanh.f32 %v628_v63 }
 0x116   : > { %v878_v1 = vpop.eup %877 }
 0x118   : > { %v880_v2 = vpop.eup %879 }
 0x119   : > { %v760_v3 = vpack.c.bf16 %v880_v2, %v878_v1 }
 0x11b   : > { %761 = vst [vmem:[%s175_s21] sm:$0xff] %v760_v3  }
 0x11c PF: > { %s13_s12 = sadd.s32 1, %s887_s12  }
 0x11d   : > { %p10_p4 = scmp.ge.s32.totalorder %s13_s12, 4  }
 0x11f   :  { %12 = sbr.rel (!%p10_p4) target bundleno = 1 (0x1), region = 62 }

// kernel: _lambda_.15
= control target key start
LH: loop header
LB: loop body
LE: loop exit
PB: predicated region body
PF: predicated region fallthrough
CT: control target
= control target key end

     0   :  { %v191_v0 = vmov 0   ;;  %vm97_vm0 = vcmask 64512   ;;  %vm101_vm1 = vcmask 1043456   ;;  %vm145_vm2 = vcmask 15360   ;;  %s251_s1 = inlined_call_operand.vmem [shape: bf16[136,2], index: 1, kind: input, shape index: {}]   ;;  %s252_s0 = inlined_call_operand.vmem [shape: bf16[8,136], index: 0, kind: input, shape index: {}]   ;;  %s253_s2 = inlined_call_operand.vmem [shape: f32[1,2], index: 2, kind: input, shape index: {}]   ;;  %s254_s3 = inlined_call_operand.vmem [shape: f32[8,2], index: 3, kind: output, shape index: {}]  }
   0x1   :  { %105 = vmatprep.subr.bf16.mxu0 %v191_v0  ;;  %v176_v1 = vld [vmem:[%s251_s1] sm:$0xff]   ;;  %v177_v2 = vld [vmem:[%s251_s1 + $0x8] sm:$0xff]   ;;  %v178_v3 = vld [vmem:[%s251_s1 + $0x10] sm:$0xff]  }
   0x2   :  { %106 = vmatpush1.bf16.msra.mxu0 %v176_v1  ;;  %v15_v4 = vld [vmem:[%s252_s0] sm:$0xff]  ;;  %v179_v6 = vld [vmem:[%s251_s1 + $0x18] sm:$0xff]   ;;  %v181_v8 = vld [vmem:[%s251_s1 + $0x28] sm:$0xff]  }
   0x3   :  { %107 = vmatprep.subr.bf16.mxu0 %v191_v0  ;;  %v164_v5 = vcombine.high %v15_v4, %v15_v4  ;;  %v180_v7 = vld [vmem:[%s251_s1 + $0x20] sm:$0xff]   ;;  %v182_v9 = vld [vmem:[%s251_s1 + $0x30] sm:$0xff]   ;;  %v183_v10 = vld [vmem:[%s251_s1 + $0x38] sm:$0xff]   ;;  %v163_v13 = vcombine.low %v15_v4, %v15_v4 }
   0x4   :  { %v184_v11 = vld [vmem:[%s251_s1 + $0x40] ss:$0 sps:$4 sm:$0xff]  }
   0x5   :  { %174 = vmatprep.mubr.msk.bf16.mxu0 %vm97_vm0, %v164_v5  ;;  %v103_v12 = vsel %vm101_vm1, %v184_v11, 0  ;;  %v162_v14 = vld [vmem:[%s253_s2] ss:$0 sm:$0xff] }
   0x6   :  { %108 = vmatpush1.bf16.msra.mxu0 %v177_v2 }
   0x7   :  { %109 = vmatprep.subr.bf16.mxu0 %v191_v0 }
   0xa   :  { %110 = vmatpush1.bf16.msra.mxu0 %v178_v3 }
   0xb   :  { %111 = vmatprep.subr.bf16.mxu0 %v191_v0 }
   0xe   :  { %112 = vmatpush1.bf16.msra.mxu0 %v179_v6 }
   0xf   :  { %113 = vmatprep.subr.bf16.mxu0 %v191_v0 }
  0x12   :  { %114 = vmatpush1.bf16.msra.mxu0 %v180_v7 }
  0x13   :  { %115 = vmatprep.subr.bf16.mxu0 %v191_v0 }
  0x16   :  { %116 = vmatpush1.bf16.msra.mxu0 %v181_v8 }
  0x17   :  { %117 = vmatprep.subr.bf16.mxu0 %v191_v0 }
  0x1a   :  { %118 = vmatpush1.bf16.msra.mxu0 %v182_v9 }
  0x1b   :  { %119 = vmatprep.subr.bf16.mxu0 %v191_v0 }
  0x1e   :  { %120 = vmatpush1.bf16.msra.mxu0 %v183_v10 }
  0x1f   :  { %121 = vmatprep.subr.bf16.mxu0 %v191_v0 }
  0x22   :  { %122 = vmatpush1.bf16.msra.mxu0 %v103_v12 }
  0x25   :  { %138 = vmatmul.mubr.bf16.vlgmr.msra.gmra.mrb[0].mxu0 %v163_v13 }
  0xf8   :  { %v139_v15 = vpop.f32.mrb[0].mxu0 }
  0xf9   :  { %v140_v16 = vadd.f32 %v162_v14, %v139_v15  ;;  %v141_v17 = vpop.f32.mrb[1].mxu0 }
  0xfa   :  { %v142_v18 = vpop.f32.mrb[2].mxu0 }
  0xfb   :  { %v143_v19 = vpop.f32.mrb[3].mxu0  ;;  %v146_v20 = vsel %vm145_vm2, %v140_v16, -inf }
  0xfc   :  { %147 = vmax.xlane.f32.xlu0 %v146_v20 }
 0x189   :  { %v148_v21 = vpop.xlane.xlu0 %147 }
 0x18a   :  { %v149_v22 = vsub.f32 %v140_v16, %v148_v21 }
 0x18c   :  { %v150_v23 = vmul.f32 1.442695, %v149_v22 }
 0x18e   :  { %187 = vpow2.f32 %v150_v23 }
 0x198   :  { %v188_v24 = vpop.eup %187 }
 0x199   :  { %v152_v25 = vsel %vm145_vm2, %v188_v24, 0.0 }
 0x19a   :  { %153 = vadd.xlane.f32.xlu0 %v152_v25 }
 0x227   :  { %v154_v26 = vpop.xlane.xlu0 %153 }
 0x228   :  { %189 = vrcp.f32 %v154_v26 }
 0x232   :  { %v190_v27 = vpop.eup %189 }
 0x233   :  { %v156_v28 = vmul.f32 %v190_v27, %v188_v24 }
 0x235   :  { %157 = vst.msk [vmem:[%s254_s3] sm:$0xff] %vm145_vm2, %v156_v28 }

// kernel: _lambda_.14
= control target key start
LH: loop header
LB: loop body
LE: loop exit
PB: predicated region body
PF: predicated region fallthrough
CT: control target
= control target key end

     0   :  { %vm1127_vm0 = vmmov 0   ;;  %s1385_s1 = inlined_call_operand.vmem [shape: bf16[1152,128], index: 1, kind: input, shape index: {}]   ;;  %s1386_s0 = inlined_call_operand.vmem [shape: bf16[8,1152], index: 0, kind: input, shape index: {}]   ;;  %s1387_s2 = inlined_call_operand.vmem [shape: f32[1,128], index: 2, kind: input, shape index: {}]   ;;  %s1388_s3 = inlined_call_operand.vmem [shape: bf16[8,128], index: 3, kind: output, shape index: {}]  }
   0x1   :  { %v1043_v0 = vld [vmem:[%s1385_s1 + $0x40] sm:$0xff]   ;;  %v1047_v4 = vld [vmem:[%s1385_s1 + $0x48] sm:$0xff]   ;;  %v1051_v8 = vld [vmem:[%s1385_s1 + $0x50] sm:$0xff]  }
   0x2   :  { %v1044_v1 = vld [vmem:[%s1385_s1] sm:$0xff]   ;;  %924 = vmatprep.subr.bf16.mxu0 %v1043_v0  ;;  %v1048_v5 = vld [vmem:[%s1385_s1 + $0x8] sm:$0xff]   ;;  %v1052_v9 = vld [vmem:[%s1385_s1 + $0x10] sm:$0xff]  }
   0x3   :  { %v1045_v2 = vld [vmem:[%s1385_s1 + $0xc0] sm:$0xff]   ;;  %925 = vmatpush3.bf16.msra.mxu0 %v1044_v1  ;;  %v1049_v6 = vld [vmem:[%s1385_s1 + $0xc8] sm:$0xff]   ;;  %v1053_v10 = vld [vmem:[%s1385_s1 + $0xd0] sm:$0xff]  }
   0x4   :  { %v1046_v3 = vld [vmem:[%s1385_s1 + $0x80] sm:$0xff]   ;;  %946 = vmatprep.subr.bf16.mxu1 %v1045_v2  ;;  %926 = vmatprep.subr.bf16.mxu0 %v1047_v4  ;;  %v1050_v7 = vld [vmem:[%s1385_s1 + $0x88] sm:$0xff]   ;;  %v1054_v11 = vld [vmem:[%s1385_s1 + $0x90] sm:$0xff]  }
   0x5   :  { %947 = vmatpush3.bf16.msra.mxu1 %v1046_v3  ;;  %v1055_v12 = vld [vmem:[%s1385_s1 + $0x58] sm:$0xff]   ;;  %v1059_v16 = vld [vmem:[%s1385_s1 + $0x60] sm:$0xff]   ;;  %v1063_v20 = vld [vmem:[%s1385_s1 + $0x68] sm:$0xff]  }
   0x6   :  { %948 = vmatprep.subr.bf16.mxu1 %v1049_v6  ;;  %v1056_v13 = vld [vmem:[%s1385_s1 + $0x18] sm:$0xff]   ;;  %v1060_v17 = vld [vmem:[%s1385_s1 + $0x20] sm:$0xff]   ;;  %v1064_v21 = vld [vmem:[%s1385_s1 + $0x28] sm:$0xff]  }
   0x7   :  { %927 = vmatpush3.bf16.msra.mxu0 %v1048_v5  ;;  %v1057_v14 = vld [vmem:[%s1385_s1 + $0xd8] sm:$0xff]   ;;  %v1061_v18 = vld [vmem:[%s1385_s1 + $0xe0] sm:$0xff]   ;;  %v1065_v22 = vld [vmem:[%s1385_s1 + $0xe8] sm:$0xff]  }
   0x8   :  { %928 = vmatprep.subr.bf16.mxu0 %v1051_v8  ;;  %v1058_v15 = vld [vmem:[%s1385_s1 + $0x98] sm:$0xff]   ;;  %v1062_v19 = vld [vmem:[%s1385_s1 + $0xa0] sm:$0xff]   ;;  %v1066_v23 = vld [vmem:[%s1385_s1 + $0xa8] sm:$0xff]  }
   0x9   :  { %949 = vmatpush3.bf16.msra.mxu1 %v1050_v7  ;;  %v1067_v24 = vld [vmem:[%s1385_s1 + $0x70] sm:$0xff]   ;;  %v1071_v28 = vld [vmem:[%s1385_s1 + $0x78] sm:$0xff]   ;;  %v15_v31 = vld [vmem:[%s1386_s0] sm:$0xff] }
   0xa   :  { %950 = vmatprep.subr.bf16.mxu1 %v1053_v10  ;;  %v1068_v25 = vld [vmem:[%s1385_s1 + $0x30] sm:$0xff]   ;;  %v1072_v29 = vld [vmem:[%s1385_s1 + $0x38] sm:$0xff]   ;;  %v843_v32 = vcombine.low %v15_v31, %v15_v31  ;;  %v844_v33 = vcombine.high %v15_v31, %v15_v31  ;;  %v1077_v35 = vld [vmem:[%s1385_s1 + $0x140] sm:$0xff]  }
   0xb   :  { %929 = vmatpush3.bf16.msra.mxu0 %v1052_v9  ;;  %v1069_v26 = vld [vmem:[%s1385_s1 + $0xf0] sm:$0xff]   ;;  %v1073_v30 = vld [vmem:[%s1385_s1 + $0xf8] sm:$0xff]   ;;  %v16_v36 = vld [vmem:[%s1386_s0 + $0x8] sm:$0xff]  ;;  %v1126_v9 = vmov 0.0  }
   0xc   :  { %930 = vmatprep.subr.bf16.mxu0 %v1055_v12  ;;  %v1070_v27 = vld [vmem:[%s1385_s1 + $0xb0] sm:$0xff]   ;;  %v1076_v34 = vld [vmem:[%s1385_s1 + $0xb8] sm:$0xff]   ;;  %667 = vmatprep.mubr.bf16.mxu0 %v844_v33  ;;  %v845_v37 = vcombine.low %v16_v36, %v16_v36  ;;  %v846_v38 = vcombine.high %v16_v36, %v16_v36  ;;  %v1080_v39 = vld [vmem:[%s1385_s1 + $0x100] sm:$0xff]  }
   0xd   :  { %951 = vmatpush3.bf16.msra.mxu1 %v1054_v11  ;;  %v1081_v40 = vld [vmem:[%s1385_s1 + $0x1c0] sm:$0xff]   ;;  %v1083_v42 = vld [vmem:[%s1385_s1 + $0x148] sm:$0xff]   ;;  %v1087_v46 = vld [vmem:[%s1385_s1 + $0x150] sm:$0xff]  }
   0xe   :  { %952 = vmatprep.subr.bf16.mxu1 %v1057_v14  ;;  %707 = vmatprep.mubr.bf16.mxu1 %v846_v38  ;;  %v1082_v41 = vld [vmem:[%s1385_s1 + $0x180] sm:$0xff]   ;;  %v1084_v43 = vld [vmem:[%s1385_s1 + $0x108] sm:$0xff]   ;;  %v1088_v47 = vld [vmem:[%s1385_s1 + $0x110] sm:$0xff]  }
   0xf   :  { %931 = vmatpush3.bf16.msra.mxu0 %v1056_v13  ;;  %v1085_v44 = vld [vmem:[%s1385_s1 + $0x1c8] sm:$0xff]   ;;  %v1089_v48 = vld [vmem:[%s1385_s1 + $0x1d0] sm:$0xff]   ;;  %v1091_v50 = vld [vmem:[%s1385_s1 + $0x158] sm:$0xff]  }
  0x10   :  { %932 = vmatprep.subr.bf16.mxu0 %v1059_v16  ;;  %v1086_v45 = vld [vmem:[%s1385_s1 + $0x188] sm:$0xff]   ;;  %v1090_v49 = vld [vmem:[%s1385_s1 + $0x190] sm:$0xff]   ;;  %v1092_v51 = vld [vmem:[%s1385_s1 + $0x118] sm:$0xff]  }
  0x11   :  { %953 = vmatpush3.bf16.msra.mxu1 %v1058_v15  ;;  %v1093_v52 = vld [vmem:[%s1385_s1 + $0x1d8] sm:$0xff]   ;;  %v1095_v54 = vld [vmem:[%s1385_s1 + $0x160] sm:$0xff]   ;;  %v1099_v58 = vld [vmem:[%s1385_s1 + $0x168] sm:$0xff]  }
  0x12   :  { %954 = vmatprep.subr.bf16.mxu1 %v1061_v18  ;;  %v1094_v53 = vld [vmem:[%s1385_s1 + $0x198] sm:$0xff]   ;;  %v1096_v55 = vld [vmem:[%s1385_s1 + $0x120] sm:$0xff]   ;;  %v1100_v59 = vld [vmem:[%s1385_s1 + $0x128] sm:$0xff]  }
  0x13   :  { %933 = vmatpush3.bf16.msra.mxu0 %v1060_v17  ;;  %v1097_v56 = vld [vmem:[%s1385_s1 + $0x1e0] sm:$0xff]   ;;  %v1101_v60 = vld [vmem:[%s1385_s1 + $0x1e8] sm:$0xff]   ;;  %v1103_v62 = vld [vmem:[%s1385_s1 + $0x170] sm:$0xff]  }
  0x14   :  { %934 = vmatprep.subr.bf16.mxu0 %v1063_v20  ;;  %v1098_v57 = vld [vmem:[%s1385_s1 + $0x1a0] sm:$0xff]   ;;  %v1102_v61 = vld [vmem:[%s1385_s1 + $0x1a8] sm:$0xff]   ;;  %v1104_v63 = vld [vmem:[%s1385_s1 + $0x130] sm:$0xff]  }
  0x15   :  { %955 = vmatpush3.bf16.msra.mxu1 %v1062_v19  ;;  %v1105_v0 = vld [vmem:[%s1385_s1 + $0x1f0] sm:$0xff]   ;;  %v1107_v2 = vld [vmem:[%s1385_s1 + $0x178] sm:$0xff]   ;;  %v1115_v13 = vld [vmem:[%s1385_s1 + $0x200] sm:$0xff]  }
  0x16   :  { %956 = vmatprep.subr.bf16.mxu1 %v1065_v22  ;;  %v1106_v1 = vld [vmem:[%s1385_s1 + $0x1b0] sm:$0xff]   ;;  %v1108_v3 = vld [vmem:[%s1385_s1 + $0x138] sm:$0xff]   ;;  %v1116_v14 = vld [vmem:[%s1385_s1 + $0x208] sm:$0xff]  }
  0x17   :  { %935 = vmatpush3.bf16.msra.mxu0 %v1064_v21  ;;  %v1109_v4 = vld [vmem:[%s1385_s1 + $0x1f8] sm:$0xff]   ;;  %v17_v5 = vld [vmem:[%s1386_s0 + $0x10] sm:$0xff]  ;;  %v1119_v17 = vld [vmem:[%s1385_s1 + $0x220] sm:$0xff]  }
  0x18   :  { %936 = vmatprep.subr.bf16.mxu0 %v1067_v24  ;;  %v847_v6 = vcombine.low %v17_v5, %v17_v5  ;;  %v848_v7 = vcombine.high %v17_v5, %v17_v5  ;;  %v1112_v8 = vld [vmem:[%s1385_s1 + $0x1b8] sm:$0xff]   ;;  %v1117_v15 = vld [vmem:[%s1385_s1 + $0x210] sm:$0xff]   ;;  %v1120_v18 = vld [vmem:[%s1385_s1 + $0x228] sm:$0xff]  }
  0x19   :  { %957 = vmatpush3.bf16.msra.mxu1 %v1066_v23  ;;  %v18_v10 = vld [vmem:[%s1386_s0 + $0x18] sm:$0xff]  ;;  %v1121_v19 = vld [vmem:[%s1385_s1 + $0x230] sm:$0xff]   ;;  %v1123_v21 = vld [vmem:[%s1386_s0 + $0x20] ss:$0 sps:$4 sm:$0xff]  }
  0x1a   :  { %958 = vmatprep.subr.bf16.mxu1 %v1069_v26  ;;  %v849_v11 = vcombine.low %v18_v10, %v18_v10  ;;  %v850_v12 = vcombine.high %v18_v10, %v18_v10  ;;  %v1118_v16 = vld [vmem:[%s1385_s1 + $0x218] sm:$0xff]   ;;  %v842_v23 = vld [vmem:[%s1387_s2] ss:$0 sm:$0xff] }
  0x1b   :  { %937 = vmatpush3.bf16.msra.mxu0 %v1068_v25  ;;  %v1122_v20 = vld [vmem:[%s1385_s1 + $0x238] sm:$0xff]  }
  0x1c   :  { %938 = vmatprep.subr.bf16.mxu0 %v1071_v28 }
  0x1d   :  { %959 = vmatpush3.bf16.msra.mxu1 %v1070_v27 }
  0x1e   :  { %960 = vmatprep.subr.bf16.mxu1 %v1073_v30 }
  0x1f   :  { %939 = vmatpush3.bf16.msra.mxu0 %v1072_v29 }
  0x20   :  { %968 = vmatprep.subr.bf16.mxu0 %v1077_v35 }
  0x21   :  { %961 = vmatpush3.bf16.msra.mxu1 %v1076_v34 }
  0x22   :  { %668 = vmatmul.mubr.bf16.vlgmr.msra.gmra.mrb[0].mxu0 %v843_v32  ;;  %990 = vmatprep.subr.bf16.mxu1 %v1081_v40 }
  0x23   :  { %969 = vmatpush3.bf16.msra.mxu0 %v1080_v39  ;;  %747 = vmatprep.mubr.bf16.mxu0 %v848_v7 }
  0x24   :  { %708 = vmatmul.mubr.bf16.vlgmr.msra.gmra.mrb[0].mxu1 %v845_v37  ;;  %970 = vmatprep.subr.bf16.mxu0 %v1083_v42 }
  0x25   :  { %991 = vmatpush3.bf16.msra.mxu1 %v1082_v41  ;;  %787 = vmatprep.mubr.bf16.mxu1 %v850_v12 }
  0x26   :  { %992 = vmatprep.subr.bf16.mxu1 %v1085_v44 }
  0x27   :  { %971 = vmatpush3.bf16.msra.mxu0 %v1084_v43 }
  0x28   :  { %972 = vmatprep.subr.bf16.mxu0 %v1087_v46 }
  0x29   :  { %993 = vmatpush3.bf16.msra.mxu1 %v1086_v45 }
  0x2a   :  { %994 = vmatprep.subr.bf16.mxu1 %v1089_v48 }
  0x2b   :  { %973 = vmatpush3.bf16.msra.mxu0 %v1088_v47 }
  0x2c   :  { %974 = vmatprep.subr.bf16.mxu0 %v1091_v50 }
  0x2d   :  { %995 = vmatpush3.bf16.msra.mxu1 %v1090_v49 }
  0x2e   :  { %996 = vmatprep.subr.bf16.mxu1 %v1093_v52 }
  0x2f   :  { %975 = vmatpush3.bf16.msra.mxu0 %v1092_v51 }
  0x30   :  { %976 = vmatprep.subr.bf16.mxu0 %v1095_v54 }
  0x31   :  { %997 = vmatpush3.bf16.msra.mxu1 %v1094_v53 }
  0x32   :  { %998 = vmatprep.subr.bf16.mxu1 %v1097_v56 }
  0x33   :  { %977 = vmatpush3.bf16.msra.mxu0 %v1096_v55 }
  0x34   :  { %978 = vmatprep.subr.bf16.mxu0 %v1099_v58 }
  0x35   :  { %999 = vmatpush3.bf16.msra.mxu1 %v1098_v57 }
  0x36   :  { %1000 = vmatprep.subr.bf16.mxu1 %v1101_v60 }
  0x37   :  { %979 = vmatpush3.bf16.msra.mxu0 %v1100_v59 }
  0x38   :  { %980 = vmatprep.subr.bf16.mxu0 %v1103_v62 }
  0x39   :  { %1001 = vmatpush3.bf16.msra.mxu1 %v1102_v61 }
  0x3a   :  { %1002 = vmatprep.subr.bf16.mxu1 %v1105_v0 }
  0x3b   :  { %981 = vmatpush3.bf16.msra.mxu0 %v1104_v63 }
  0x3c   :  { %982 = vmatprep.subr.bf16.mxu0 %v1107_v2 }
  0x3d   :  { %1003 = vmatpush3.bf16.msra.mxu1 %v1106_v1 }
  0x3e   :  { %1004 = vmatprep.subr.bf16.mxu1 %v1109_v4 }
  0x3f   :  { %983 = vmatpush3.bf16.msra.mxu0 %v1108_v3 }
  0x40   :  { %1021 = vmatprep.subr.bf16.mxu0 %v1126_v9 }
  0x41   :  { %1005 = vmatpush3.bf16.msra.mxu1 %v1112_v8 }
  0x42   :  { %748 = vmatmul.mubr.bf16.vlgmr.msra.gmra.mrb[4].mxu0 %v847_v6 }
  0x43   :  { %1022 = vmatpush3.bf16.msra.mxu0 %v1115_v13  ;;  %1037 = vmatprep.mubr.msk.bf16.mxu0 %vm1127_vm0, %v1126_v9 }
  0x44   :  { %788 = vmatmul.mubr.bf16.vlgmr.msra.gmra.mrb[4].mxu1 %v849_v11  ;;  %1023 = vmatprep.subr.bf16.mxu0 %v1126_v9 }
  0x47   :  { %1024 = vmatpush3.bf16.msra.mxu0 %v1116_v14 }
  0x48   :  { %1025 = vmatprep.subr.bf16.mxu0 %v1126_v9 }
  0x4b   :  { %1026 = vmatpush3.bf16.msra.mxu0 %v1117_v15 }
  0x4c   :  { %1027 = vmatprep.subr.bf16.mxu0 %v1126_v9 }
  0x4f   :  { %1028 = vmatpush3.bf16.msra.mxu0 %v1118_v16 }
  0x50   :  { %1029 = vmatprep.subr.bf16.mxu0 %v1126_v9 }
  0x53   :  { %1030 = vmatpush3.bf16.msra.mxu0 %v1119_v17 }
  0x54   :  { %1031 = vmatprep.subr.bf16.mxu0 %v1126_v9 }
  0x57   :  { %1032 = vmatpush3.bf16.msra.mxu0 %v1120_v18 }
  0x58   :  { %1033 = vmatprep.subr.bf16.mxu0 %v1126_v9 }
  0x5b   :  { %1034 = vmatpush3.bf16.msra.mxu0 %v1121_v19 }
  0x5c   :  { %1035 = vmatprep.subr.bf16.mxu0 %v1126_v9 }
  0x5f   :  { %1036 = vmatpush3.bf16.msra.mxu0 %v1122_v20 }
  0x62   :  { %1038 = vmatmul.mubr.bf16.vlgmr.msra.gmra.mrb[8].mxu0 %v1123_v21 }
  0xf5   :  { %v940_v22 = vpop.f32.mrb[0].mxu0 }
  0xf6   :  { %v941_v24 = vpop.f32.mrb[1].mxu0 }
  0xf7   :  { %v942_v25 = vadd.f32 %v941_v24, %v940_v22  ;;  %v943_v26 = vpop.f32.mrb[2].mxu0  ;;  %v962_v27 = vpop.f32.mrb[0].mxu1 }
  0xf8   :  { %v944_v28 = vpop.f32.mrb[3].mxu0  ;;  %v963_v29 = vpop.f32.mrb[1].mxu1 }
  0xf9   :  { %v670_v30 = vadd.f32 %v942_v25, %v842_v23  ;;  %v964_v31 = vadd.f32 %v963_v29, %v962_v27  ;;  %v965_v32 = vpop.f32.mrb[2].mxu1 }
  0xfa   :  { %v966_v33 = vpop.f32.mrb[3].mxu1 }
  0xfb   :  { %v710_v34 = vadd.f32 %v964_v31, %v670_v30 }
 0x115   :  { %v984_v35 = vpop.f32.mrb[4].mxu0 }
 0x116   :  { %v985_v36 = vpop.f32.mrb[5].mxu0 }
 0x117   :  { %v986_v37 = vadd.f32 %v985_v36, %v984_v35  ;;  %v987_v38 = vpop.f32.mrb[6].mxu0  ;;  %v1006_v39 = vpop.f32.mrb[4].mxu1 }
 0x118   :  { %v988_v40 = vpop.f32.mrb[7].mxu0  ;;  %v1007_v41 = vpop.f32.mrb[5].mxu1 }
 0x119   :  { %v750_v42 = vadd.f32 %v986_v37, %v710_v34  ;;  %v1008_v43 = vadd.f32 %v1007_v41, %v1006_v39  ;;  %v1009_v44 = vpop.f32.mrb[6].mxu1 }
 0x11a   :  { %v1010_v45 = vpop.f32.mrb[7].mxu1 }
 0x11b   :  { %v790_v46 = vadd.f32 %v1008_v43, %v750_v42 }
 0x135   :  { %v829_v47 = vpop.f32.mrb[8].mxu0 }
 0x136   :  { %v830_v48 = vadd.f32 %v829_v47, %v790_v46  ;;  %v1039_v49 = vpop.f32.mrb[9].mxu0 }
 0x137   :  { %v832_v50 = vpop.f32.mrb[10].mxu0 }
 0x138   :  { %1124 = vtanh.f32 %v830_v48  ;;  %v1040_v51 = vpop.f32.mrb[11].mxu0 }
 0x142   :  { %v1125_v52 = vpop.eup %1124 }
 0x143   :  { %v836_v53 = vpack.c.bf16 %v1125_v52, %v1125_v52 }
 0x145   :  { %837 = vst [vmem:[%s1388_s3] sm:$0xf] %v836_v53 }

</bundles_post_ra>
